<compile_context>
chip_gen: v7x
topology: tpu7x:2x2x1
jax: 0.10.0
libtpu: 0.0.40
codegen_flags: <defaults>
</compile_context>

<pallas_src>
import functools

import jax
import jax.numpy as jnp
import numpy as np
from jax.experimental import pallas as pl
from jax.experimental.pallas import tpu as pltpu


_C = 2048                # lane width of the f32 slab (multiple of 128)
_BLOCK_ROWS_2BUF = 256   # 2 MiB blocks for 1-in/1-out kernels (8 MiB VMEM w/ dbl buf)
_BLOCK_ROWS_4BUF = 128   # 1 MiB blocks for the 2-in/2-out planar fallback
_OVERFLOW_GUARD = 1e18   # above this, (1+a)^2 + b^2 would overflow float32


# ----------------------------------------------------------------------------
# Slab geometry / generic elementwise pallas_call
# ----------------------------------------------------------------------------

def _plan(n_f32, max_block_rows):
    """Rows of the (rows, _C) slab and the per-grid-step row count."""
    rows = max(8, -(-n_f32 // _C))
    if rows <= max_block_rows:
        if rows >= 16:
            # At least 2 blocks so the grid can shard across both v7x TCs.
            block_rows = ((-(-rows // 2) + 7) // 8) * 8
        else:
            block_rows = 8
    else:
        block_rows = max_block_rows
    return rows, block_rows


def _to_slab(flat_f32, rows):
    """Reshape a flat f32 stream to (rows, _C); pad only if strictly needed."""
    n = flat_f32.shape[0]
    padded = rows * _C
    if padded != n:
        # Zero padding is harmless: (1+0)=1 -> log 0, atan2(0,1)=0 (no NaNs).
        flat_f32 = jnp.pad(flat_f32, (0, padded - n))
    return flat_f32.reshape(rows, _C)


def _pcall(kernel, ins, num_out, rows, block_rows):
    spec = pl.BlockSpec((block_rows, _C), lambda i: (i, 0))
    grid = (-(-rows // block_rows),)
    if num_out == 1:
        out_shape = jax.ShapeDtypeStruct((rows, _C), jnp.float32)
        out_specs = spec
    else:
        out_shape = tuple(jax.ShapeDtypeStruct((rows, _C), jnp.float32)
                          for _ in range(num_out))
        out_specs = [spec] * num_out
    return pl.pallas_call(
        kernel,
        out_shape=out_shape,
        grid_spec=pltpu.PrefetchScalarGridSpec(
            num_scalar_prefetch=0,
            grid=grid,
            in_specs=[spec] * len(ins),
            out_specs=out_specs,
        ),
        compiler_params=pltpu.CompilerParams(
            dimension_semantics=("parallel",)),
    )(*ins)


# ----------------------------------------------------------------------------
# Kernels
# ----------------------------------------------------------------------------

def _make_shift(kind, sign):
    """Return shift(x, s) with np.roll semantics (out[i] = x[i - s]) on lanes."""
    if kind == "pltpu":
        def shift(x, s):
            amount = (sign * s) % x.shape[-1]        # keep the rotate amount >= 0
            return pltpu.roll(x, amount, axis=x.ndim - 1)
    else:  # "jnp": interpret-safe lane shift
        def shift(x, s):
            return jnp.roll(x, s, axis=-1)
    return shift


def _make_clog_interleaved_kernel(shift):
    """log(1+z) on an interleaved [re, im, re, im, ...] f32 block."""
    def kernel(v_ref, o_ref):
        v = v_ref[...]                                     # [a0, b0, a1, b1, ...]
        lane = jax.lax.broadcasted_iota(jnp.int32, v.shape, 1)
        even = (lane & 1) == 0                             # real lanes
        u = jnp.where(even, v + 1.0, v)                    # [x0, b0, x1, b1, ...]

        # Real part (even lanes): 0.5 * log(x^2 + b^2).  b^2 sits one lane to
        # the right; pull it in with a single XLU rotate.
        sq = u * u
        s = sq + shift(sq, -1)                             # even lanes: x^2 + b^2
        real_part = 0.5 * jnp.log(s)

        # Imag part (odd lanes): atan2(b, x).  x sits one lane to the left.
        imag_part = jnp.arctan2(v, shift(u, 1))

        o_ref[...] = jnp.where(even, real_part, imag_part)

        # Rare overflow-safe path: only when some |1+a| or |b| would overflow
        # x^2 + b^2 in f32.  Block-level gate -> common case only pays the
        # |u| reduction.
        absu = jnp.abs(u)

        @pl.when(jnp.max(absu) > _OVERFLOW_GUARD)
        def _():
            partner = shift(u, -1)                         # even lanes: b
            m = jnp.maximum(absu, jnp.abs(partner))        # even lanes: max(|x|,|b|)
            inv_m = 1.0 / m
            us = u * inv_m
            ps = partner * inv_m
            large = jnp.log(m) + 0.5 * jnp.log(us * us + ps * ps)
            upd = even & (m > _OVERFLOW_GUARD)
            o_ref[...] = jnp.where(upd, large, o_ref[...])
        # TODO(synk): |1+z| < ~1e-19 still underflows x^2+b^2 to 0 (-inf real
        # part); a matching tiny-magnitude rescale could reuse the same gate.
    return kernel


def _clog_planar_kernel(re_ref, im_ref, ore_ref, oim_ref):
    """Safe fallback: separate real/imag planes in and out."""
    a = re_ref[...]
    b = im_ref[...]
    x = 1.0 + a                                            # Sterbenz-exact near z ~ -1
    ore_ref[...] = 0.5 * jnp.log(x * x + b * b)
    oim_ref[...] = jnp.arctan2(b, x)

    m = jnp.maximum(jnp.abs(x), jnp.abs(b))

    @pl.when(jnp.max(m) > _OVERFLOW_GUARD)
    def _():
        inv_m = 1.0 / m
        xs = x * inv_m
        bs = b * inv_m
        large = jnp.log(m) + 0.5 * jnp.log(xs * xs + bs * bs)
        ore_ref[...] = jnp.where(m > _OVERFLOW_GUARD, large, ore_ref[...])


def _log_real_kernel(x_ref, o_ref):
    # Exactly the module's semantics: (1 + x) rounded to f32, then log.
    o_ref[...] = jnp.log(1.0 + x_ref[...])


# ----------------------------------------------------------------------------
# Wrappers
# ----------------------------------------------------------------------------

def _complex_forward_interleaved(x, *, shift_kind, shift_sign):
    orig_shape = x.shape
    n = x.size
    n2 = 2 * n
    rows, block_rows = _plan(n2, _BLOCK_ROWS_2BUF)
    # Zero-copy reinterpretation: complex64 -> interleaved f32 (..., 2).
    flat = jax.lax.bitcast_convert_type(x, jnp.float32).reshape(-1)
    slab = _to_slab(flat, rows)
    kernel = _make_clog_interleaved_kernel(_make_shift(shift_kind, shift_sign))
    out_slab = _pcall(kernel, [slab], 1, rows, block_rows)
    out = out_slab.reshape(-1)[:n2].reshape(orig_shape + (2,))
    return jax.lax.bitcast_convert_type(out, jnp.complex64)


def _complex_forward_planar(x):
    orig_shape = x.shape
    n = x.size
    rows, block_rows = _plan(n, _BLOCK_ROWS_4BUF)
    re = _to_slab(jnp.real(x).astype(jnp.float32).reshape(-1), rows)
    im = _to_slab(jnp.imag(x).astype(jnp.float32).reshape(-1), rows)
    out_re, out_im = _pcall(_clog_planar_kernel, [re, im], 2, rows, block_rows)
    out_re = out_re.reshape(-1)[:n].reshape(orig_shape)
    out_im = out_im.reshape(-1)[:n].reshape(orig_shape)
    return jax.lax.complex(out_re, out_im)


def _real_forward(x):
    orig_shape = x.shape
    orig_dtype = x.dtype
    n = x.size
    rows, block_rows = _plan(n, _BLOCK_ROWS_2BUF)
    # TODO(synk): bf16/f16 inputs could stay in the narrow dtype in HBM with an
    # in-kernel cast (halves traffic); upcast in the wrapper for now.
    slab = _to_slab(x.astype(jnp.float32).reshape(-1), rows)
    out = _pcall(_log_real_kernel, [slab], 1, rows, block_rows)
    out = out.reshape(-1)[:n].reshape(orig_shape)
    if jnp.issubdtype(orig_dtype, jnp.floating):
        out = out.astype(orig_dtype)
    return out


_real_fn = jax.jit(_real_forward)

_COMPLEX_CANDIDATES = (
    ("interleaved", "pltpu", 1),    # best: interleaved slab + pltpu.roll
    ("interleaved", "pltpu", -1),   # same, opposite rotate convention
    ("interleaved", "jnp", 1),      # lane shift via jnp.roll (interpret-safe)
    ("planar", None, 0),            # safe fallback: real/imag planes
)

_complex_fns = {}
_chosen_complex_cand = None


def _complex_fn(cand):
    fn = _complex_fns.get(cand)
    if fn is None:
        layout, kind, sign = cand
        if layout == "planar":
            fn = jax.jit(_complex_forward_planar)
        else:
            fn = jax.jit(functools.partial(_complex_forward_interleaved,
                                           shift_kind=kind, shift_sign=sign))
        _complex_fns[cand] = fn
    return fn


def _choose_complex_cand():
    """Pick the fastest complex implementation that is numerically correct on
    this backend (guards roll-direction convention, interpret-mode support and
    complex<->f32 bitcast support); falls back to the planar kernels."""
    global _chosen_complex_cand
    if _chosen_complex_cand is not None:
        return _chosen_complex_cand
    k1, k2 = jax.random.split(jax.random.PRNGKey(1234))
    shp = (3, 7, 37, 23)  # ragged: exercises padding, 2 grid steps, partial block
    z = jax.lax.complex(jax.random.normal(k1, shp, jnp.float32),
                        jax.random.normal(k2, shp, jnp.float32))
    ref = np.log(1.0 + np.asarray(z).astype(np.complex128))
    chosen = _COMPLEX_CANDIDATES[-1]
    for cand in _COMPLEX_CANDIDATES:
        try:
            got = np.asarray(jax.block_until_ready(_complex_fn(cand)(z)))
        except Exception:
            continue
        if np.allclose(got, ref, rtol=1e-3, atol=1e-3):
            chosen = cand
            break
    _chosen_complex_cand = chosen
    return chosen


def complex_logarithm(x):
    """Forward of ComplexLogarithm: elementwise (1 + x).log().

    Complex in -> complex64 out, real in -> real out.  Any shape (e.g. NCHW).
    """
    x = jnp.asarray(x)
    if jnp.issubdtype(x.dtype, jnp.complexfloating):
        if x.dtype != jnp.complex64:
            x = x.astype(jnp.complex64)    # TPU compute path is f32
        return _complex_fn(_choose_complex_cand())(x)
    return _real_fn(x)


# ----------------------------------------------------------------------------
# Self-test
# ----------------------------------------------------------------------------

if __name__ == "__main__":
    key = jax.random.PRNGKey(0)
    k1, k2, k3, k4, k5, k6, k7 = jax.random.split(key, 7)

    B, Cc, H, W = 2, 4, 16, 16  # NCHW, same convention as the PyTorch module

    # 1) Complex input (the intended use of ComplexLogarithm).
    x_re = jax.random.normal(k1, (B, Cc, H, W), jnp.float32) * 0.5
    x_im = jax.random.normal(k2, (B, Cc, H, W), jnp.float32) * 0.5
    x_cplx = jax.lax.complex(x_re, x_im)
    out_c = jax.block_until_ready(complex_logarithm(x_cplx))
    ref_c = np.log(1.0 + np.asarray(x_cplx).astype(np.complex128))
    np.testing.assert_allclose(np.asarray(out_c), ref_c, rtol=1e-4, atol=1e-5)

    # 2) Real fast path (values >= 0 so the log is finite).
    x_real = jnp.abs(jax.random.normal(k3, (B, Cc, H, W), jnp.float32))
    out_r = jax.block_until_ready(complex_logarithm(x_real))
    ref_r = np.log((np.float32(1.0) + np.asarray(x_real)).astype(np.float64))
    np.testing.assert_allclose(np.asarray(out_r), ref_r, rtol=1e-4, atol=1e-6)

    # 3) Real inputs near zero.  The reference follows the module's exact
    #    semantics ((1 + x) rounded to f32 first, then log), so only the
    #    hardware log approximation error near 1 remains -> absolute tolerance.
    x_tiny = jax.random.uniform(k4, (B, Cc, H, W), jnp.float32,
                                minval=-1e-4, maxval=1e-4)
    out_tiny = jax.block_until_ready(complex_logarithm(x_tiny))
    ref_tiny = np.log((np.float32(1.0) + np.asarray(x_tiny)).astype(np.float64))
    np.testing.assert_allclose(np.asarray(out_tiny), ref_tiny,
                               rtol=1e-3, atol=1e-6)

    # 4) Multi-block complex input: rows > block_rows, partial final block,
    #    no padding copy (2*4*320*128 f32 pairs divide exactly into 2048 lanes).
    shp = (2, 4, 320, 128)
    y = jax.lax.complex(jax.random.normal(k5, shp, jnp.float32),
                        jax.random.normal(k6, shp, jnp.float32))
    out_y = jax.block_until_ready(complex_logarithm(y))
    ref_y = np.log(1.0 + np.asarray(y).astype(np.complex128))
    np.testing.assert_allclose(np.asarray(out_y), ref_y, rtol=1e-4, atol=1e-5)

    # 5) Small ragged complex shape: exercises padding, the output slice and
    #    the f32 -> complex64 bitcast on a non-lane-multiple size.
    shp2 = (2, 3, 17, 19)
    kz1, kz2 = jax.random.split(k7)
    z = jax.lax.complex(jax.random.normal(kz1, shp2, jnp.float32) * 0.7,
                        jax.random.normal(kz2, shp2, jnp.float32) * 0.7)
    out_z = jax.block_until_ready(complex_logarithm(z))
    ref_z = np.log(1.0 + np.asarray(z).astype(np.complex128))
    np.testing.assert_allclose(np.asarray(out_z), ref_z, rtol=1e-4, atol=1e-5)

    assert out_c.shape == x_cplx.shape and out_c.dtype == jnp.complex64
    assert out_r.shape == x_real.shape and out_r.dtype == x_real.dtype

    print("KERNEL_OK")
</pallas_src>

<mosaic_0001>
module attributes {stable_mosaic.version = 11 : i64} {
  func.func @_clog_planar_kernel(%arg0: i32, %arg1: memref<8x2048xf32, #tpu.memory_space<vmem>>, %arg2: memref<8x2048xf32, #tpu.memory_space<vmem>>, %arg3: memref<8x2048xf32, #tpu.memory_space<vmem>>, %arg4: memref<8x2048xf32, #tpu.memory_space<vmem>>) attributes {dimension_semantics = [#tpu.dimension_semantics<parallel>], iteration_bounds = array<i64: 2>, scalar_prefetch = 0 : i64, scratch_operands = 0 : i64, tpu.core_type = #tpu.core_type<tc>, window_params = [{transform_indices = @transform_0, window_bounds = array<i64: 8, 2048>}, {transform_indices = @transform_1, window_bounds = array<i64: 8, 2048>}, {transform_indices = @transform_2, window_bounds = array<i64: 8, 2048>}, {transform_indices = @transform_3, window_bounds = array<i64: 8, 2048>}]} {
    %c0 = arith.constant 0 : index
    %c0_0 = arith.constant 0 : index
    %0 = vector.load %arg1[%c0, %c0_0] : memref<8x2048xf32, #tpu.memory_space<vmem>>, vector<8x2048xf32>
    %c0_1 = arith.constant 0 : index
    %c0_2 = arith.constant 0 : index
    %1 = vector.load %arg2[%c0_1, %c0_2] : memref<8x2048xf32, #tpu.memory_space<vmem>>, vector<8x2048xf32>
    %cst = arith.constant 1.000000e+00 : f32
    %2 = vector.broadcast %cst : f32 to vector<8x2048xf32>
    %3 = arith.addf %2, %0 : vector<8x2048xf32>
    %4 = arith.mulf %3, %3 : vector<8x2048xf32>
    %5 = arith.mulf %1, %1 : vector<8x2048xf32>
    %6 = arith.addf %4, %5 : vector<8x2048xf32>
    %7 = math.log %6 : vector<8x2048xf32>
    %cst_3 = arith.constant 5.000000e-01 : f32
    %8 = vector.broadcast %cst_3 : f32 to vector<8x2048xf32>
    %9 = arith.mulf %8, %7 : vector<8x2048xf32>
    %c0_4 = arith.constant 0 : index
    %c0_5 = arith.constant 0 : index
    %10 = vector.load %arg3[%c0_4, %c0_5] : memref<8x2048xf32, #tpu.memory_space<vmem>>, vector<8x2048xf32>
    tpu.vector_store %arg3[%c0_4, %c0_5], %9 {strides = array<i32>} : memref<8x2048xf32, #tpu.memory_space<vmem>>, vector<8x2048xf32>,
    %11 = math.atan2 %1, %3 : vector<8x2048xf32>
    %c0_6 = arith.constant 0 : index
    %c0_7 = arith.constant 0 : index
    %12 = vector.load %arg4[%c0_6, %c0_7] : memref<8x2048xf32, #tpu.memory_space<vmem>>, vector<8x2048xf32>
    tpu.vector_store %arg4[%c0_6, %c0_7], %11 {strides = array<i32>} : memref<8x2048xf32, #tpu.memory_space<vmem>>, vector<8x2048xf32>,
    %13 = math.absf %3 : vector<8x2048xf32>
    %14 = math.absf %1 : vector<8x2048xf32>
    %15 = arith.maximumf %13, %14 : vector<8x2048xf32>
    %16 = vector.shape_cast %15 : vector<8x2048xf32> to vector<1x8x2048xf32>
    %cst_8 = arith.constant dense<0xFF800000> : vector<1xf32>
    %17 = vector.multi_reduction <maximumf>, %16, %cst_8 [1, 2] : vector<1x8x2048xf32> to vector<1xf32>
    %18 = vector.shape_cast %17 : vector<1xf32> to vector<1x1x1xf32>
    %19 = vector.extract %18[0, 0, 0] : f32 from vector<1x1x1xf32>
    %cst_9 = arith.constant 9.99999984E+17 : f32
    %20 = arith.cmpf ogt, %19, %cst_9 : f32
    %21 = arith.extui %20 : i1 to i32
    %c0_i32 = arith.constant 0 : i32
    %22 = arith.cmpi ne, %21, %c0_i32 : i32
    scf.if %22 {
      %cst_10 = arith.constant 1.000000e+00 : f32
      %23 = vector.broadcast %cst_10 : f32 to vector<8x2048xf32>
      %24 = arith.divf %23, %15 : vector<8x2048xf32>
      %25 = arith.mulf %3, %24 : vector<8x2048xf32>
      %26 = arith.mulf %1, %24 : vector<8x2048xf32>
      %27 = math.log %15 : vector<8x2048xf32>
      %28 = arith.mulf %25, %25 : vector<8x2048xf32>
      %29 = arith.mulf %26, %26 : vector<8x2048xf32>
      %30 = arith.addf %28, %29 : vector<8x2048xf32>
      %31 = math.log %30 : vector<8x2048xf32>
      %cst_11 = arith.constant 5.000000e-01 : f32
      %32 = vector.broadcast %cst_11 : f32 to vector<8x2048xf32>
      %33 = arith.mulf %32, %31 : vector<8x2048xf32>
      %34 = arith.addf %27, %33 : vector<8x2048xf32>
      %cst_12 = arith.constant 9.99999984E+17 : f32
      %35 = vector.broadcast %cst_12 : f32 to vector<8x2048xf32>
      %36 = arith.cmpf ogt, %15, %35 : vector<8x2048xf32>
      %c0_13 = arith.constant 0 : index
      %c0_14 = arith.constant 0 : index
      %37 = vector.load %arg3[%c0_13, %c0_14] : memref<8x2048xf32, #tpu.memory_space<vmem>>, vector<8x2048xf32>
      %38 = arith.select %36, %34, %37 : vector<8x2048xi1>, vector<8x2048xf32>
      %c0_15 = arith.constant 0 : index
      %c0_16 = arith.constant 0 : index
      %39 = vector.load %arg3[%c0_15, %c0_16] : memref<8x2048xf32, #tpu.memory_space<vmem>>, vector<8x2048xf32>
      tpu.vector_store %arg3[%c0_15, %c0_16], %38 {strides = array<i32>} : memref<8x2048xf32, #tpu.memory_space<vmem>>, vector<8x2048xf32>,
    } else {
    }
    return
  }
  func.func @transform_0(%arg0: i32) -> (i32, i32) {
    %c0_i32 = arith.constant 0 : i32
    %c0_i32_0 = arith.constant 0 : i32
    return %arg0, %c0_i32 : i32, i32
  }
  func.func @transform_1(%arg0: i32) -> (i32, i32) {
    %c0_i32 = arith.constant 0 : i32
    %c0_i32_0 = arith.constant 0 : i32
    return %arg0, %c0_i32 : i32, i32
  }
  func.func @transform_2(%arg0: i32) -> (i32, i32) {
    %c0_i32 = arith.constant 0 : i32
    %c0_i32_0 = arith.constant 0 : i32
    return %arg0, %c0_i32 : i32, i32
  }
  func.func @transform_3(%arg0: i32) -> (i32, i32) {
    %c0_i32 = arith.constant 0 : i32
    %c0_i32_0 = arith.constant 0 : i32
    return %arg0, %c0_i32 : i32, i32
  }
}

module attributes {stable_mosaic.version = 11 : i64} {
  func.func @_clog_planar_kernel(%arg0: i32, %arg1: memref<8x2048xf32, #tpu.memory_space<vmem>>, %arg2: memref<8x2048xf32, #tpu.memory_space<vmem>>, %arg3: memref<8x2048xf32, #tpu.memory_space<vmem>>, %arg4: memref<8x2048xf32, #tpu.memory_space<vmem>>) attributes {dimension_semantics = [#tpu.dimension_semantics<parallel>], iteration_bounds = array<i64: 1>, scalar_prefetch = 0 : i64, scratch_operands = 0 : i64, tpu.core_type = #tpu.core_type<tc>, window_params = [{transform_indices = @transform_0, window_bounds = array<i64: 8, 2048>}, {transform_indices = @transform_1, window_bounds = array<i64: 8, 2048>}, {transform_indices = @transform_2, window_bounds = array<i64: 8, 2048>}, {transform_indices = @transform_3, window_bounds = array<i64: 8, 2048>}]} {
    %c0 = arith.constant 0 : index
    %c0_0 = arith.constant 0 : index
    %0 = vector.load %arg1[%c0, %c0_0] : memref<8x2048xf32, #tpu.memory_space<vmem>>, vector<8x2048xf32>
    %c0_1 = arith.constant 0 : index
    %c0_2 = arith.constant 0 : index
    %1 = vector.load %arg2[%c0_1, %c0_2] : memref<8x2048xf32, #tpu.memory_space<vmem>>, vector<8x2048xf32>
    %cst = arith.constant 1.000000e+00 : f32
    %2 = vector.broadcast %cst : f32 to vector<8x2048xf32>
    %3 = arith.addf %2, %0 : vector<8x2048xf32>
    %4 = arith.mulf %3, %3 : vector<8x2048xf32>
    %5 = arith.mulf %1, %1 : vector<8x2048xf32>
    %6 = arith.addf %4, %5 : vector<8x2048xf32>
    %7 = math.log %6 : vector<8x2048xf32>
    %cst_3 = arith.constant 5.000000e-01 : f32
    %8 = vector.broadcast %cst_3 : f32 to vector<8x2048xf32>
    %9 = arith.mulf %8, %7 : vector<8x2048xf32>
    %c0_4 = arith.constant 0 : index
    %c0_5 = arith.constant 0 : index
    %10 = vector.load %arg3[%c0_4, %c0_5] : memref<8x2048xf32, #tpu.memory_space<vmem>>, vector<8x2048xf32>
    tpu.vector_store %arg3[%c0_4, %c0_5], %9 {strides = array<i32>} : memref<8x2048xf32, #tpu.memory_space<vmem>>, vector<8x2048xf32>,
    %11 = math.atan2 %1, %3 : vector<8x2048xf32>
    %c0_6 = arith.constant 0 : index
    %c0_7 = arith.constant 0 : index
    %12 = vector.load %arg4[%c0_6, %c0_7] : memref<8x2048xf32, #tpu.memory_space<vmem>>, vector<8x2048xf32>
    tpu.vector_store %arg4[%c0_6, %c0_7], %11 {strides = array<i32>} : memref<8x2048xf32, #tpu.memory_space<vmem>>, vector<8x2048xf32>,
    %13 = math.absf %3 : vector<8x2048xf32>
    %14 = math.absf %1 : vector<8x2048xf32>
    %15 = arith.maximumf %13, %14 : vector<8x2048xf32>
    %16 = vector.shape_cast %15 : vector<8x2048xf32> to vector<1x8x2048xf32>
    %cst_8 = arith.constant dense<0xFF800000> : vector<1xf32>
    %17 = vector.multi_reduction <maximumf>, %16, %cst_8 [1, 2] : vector<1x8x2048xf32> to vector<1xf32>
    %18 = vector.shape_cast %17 : vector<1xf32> to vector<1x1x1xf32>
    %19 = vector.extract %18[0, 0, 0] : f32 from vector<1x1x1xf32>
    %cst_9 = arith.constant 9.99999984E+17 : f32
    %20 = arith.cmpf ogt, %19, %cst_9 : f32
    %21 = arith.extui %20 : i1 to i32
    %c0_i32 = arith.constant 0 : i32
    %22 = arith.cmpi ne, %21, %c0_i32 : i32
    scf.if %22 {
      %cst_10 = arith.constant 1.000000e+00 : f32
      %23 = vector.broadcast %cst_10 : f32 to vector<8x2048xf32>
      %24 = arith.divf %23, %15 : vector<8x2048xf32>
      %25 = arith.mulf %3, %24 : vector<8x2048xf32>
      %26 = arith.mulf %1, %24 : vector<8x2048xf32>
      %27 = math.log %15 : vector<8x2048xf32>
      %28 = arith.mulf %25, %25 : vector<8x2048xf32>
      %29 = arith.mulf %26, %26 : vector<8x2048xf32>
      %30 = arith.addf %28, %29 : vector<8x2048xf32>
      %31 = math.log %30 : vector<8x2048xf32>
      %cst_11 = arith.constant 5.000000e-01 : f32
      %32 = vector.broadcast %cst_11 : f32 to vector<8x2048xf32>
      %33 = arith.mulf %32, %31 : vector<8x2048xf32>
      %34 = arith.addf %27, %33 : vector<8x2048xf32>
      %cst_12 = arith.constant 9.99999984E+17 : f32
      %35 = vector.broadcast %cst_12 : f32 to vector<8x2048xf32>
      %36 = arith.cmpf ogt, %15, %35 : vector<8x2048xf32>
      %c0_13 = arith.constant 0 : index
      %c0_14 = arith.constant 0 : index
      %37 = vector.load %arg3[%c0_13, %c0_14] : memref<8x2048xf32, #tpu.memory_space<vmem>>, vector<8x2048xf32>
      %38 = arith.select %36, %34, %37 : vector<8x2048xi1>, vector<8x2048xf32>
      %c0_15 = arith.constant 0 : index
      %c0_16 = arith.constant 0 : index
      %39 = vector.load %arg3[%c0_15, %c0_16] : memref<8x2048xf32, #tpu.memory_space<vmem>>, vector<8x2048xf32>
      tpu.vector_store %arg3[%c0_15, %c0_16], %38 {strides = array<i32>} : memref<8x2048xf32, #tpu.memory_space<vmem>>, vector<8x2048xf32>,
    } else {
    }
    return
  }
  func.func @transform_0(%arg0: i32) -> (i32, i32) {
    %c0_i32 = arith.constant 0 : i32
    %c0_i32_0 = arith.constant 0 : i32
    return %arg0, %c0_i32 : i32, i32
  }
  func.func @transform_1(%arg0: i32) -> (i32, i32) {
    %c0_i32 = arith.constant 0 : i32
    %c0_i32_0 = arith.constant 0 : i32
    return %arg0, %c0_i32 : i32, i32
  }
  func.func @transform_2(%arg0: i32) -> (i32, i32) {
    %c0_i32 = arith.constant 0 : i32
    %c0_i32_0 = arith.constant 0 : i32
    return %arg0, %c0_i32 : i32, i32
  }
  func.func @transform_3(%arg0: i32) -> (i32, i32) {
    %c0_i32 = arith.constant 0 : i32
    %c0_i32_0 = arith.constant 0 : i32
    return %arg0, %c0_i32 : i32, i32
  }
}

</mosaic_0001>

<bundles_post_ra>
// kernel: custom-call.1
= control target key start
LH: loop header
LB: loop body
LE: loop exit
PB: predicated region body
PF: predicated region fallthrough
CT: control target
= control target key end

     0   :  { %s59_s0 = inlined_call_operand.hbm [shape: c64[3,7,37,23], index: 0, kind: input, shape index: {}]   ;;  %s60_s1 = inlined_call_operand.vmem [shape: f32[3,7,37,23], index: 1, kind: output, shape index: {}]  }
   0x1   :  { %s2_s8 = scalar_lea.hbm %s59_s0, 8064 }
   0x2   :  { %3 = vsyncpa [#allocation0], 0  ;;  %s4_s11 = sshll.u32 %s60_s1, 4  ;;  %s34_s14 = scalar_lea.hbm %s59_s0, 16128  ;;  %s5_s11 = int_to_ptr.vmem [resolvable:$true] %s4_s11 }
   0x3   :  { %p11_p0 = scmp.ne.s32.totalorder %s2_s8, %s34_s14  ;;  %p13_p1 = scmp.lt.u32.totalorder %s2_s8, %s59_s0 }
   0x4   :  { %p14_p2 = scmp.lt.u32.totalorder %s34_s14, %s34_s14  ;;  %p16_p4 = scmp.lt.u32.totalorder %s34_s14, %s2_s8 }
   0x6   :  { %p15_p3 = por %p14_p2, %p13_p1 }
   0x8   :  { %p17_p5 = por %p16_p4, %p15_p3 }
   0xa   :  { %p18_p6 = pnand %p17_p5, %p11_p0 }
   0xc   :  { %21 = shalt.err (!%p18_p6)  }
   0xd   :  { %s22_s17 = scalar_lea.vmem %s5_s11, 8064  ;;  %p27_p8 = scmp.lt.s32.totalorder %s5_s11, %s5_s11 }
   0xe   :  { %p23_p7 = scmp.ne.s32.totalorder %s5_s11, %s22_s17  ;;  %p28_p9 = scmp.lt.s32.totalorder %s22_s17, %s22_s17 }
  0x10   :  { %p29_p10 = por %p28_p9, %p27_p8 }
  0x12   :  { %p30_p11 = pnand %p29_p10, %p23_p7 }
  0x14   :  { %33 = shalt.err (!%p30_p11)  }
  0x15   :  { %7 = dma.hbm_to_vmem [thread:$0]  %s2_s8, 8064, %s5_s11, [#allocation0] }
  0x16   :  { %35 = dma.done.wait [#allocation0], 8064  }
  0x17   :  { %36 = vsyncadd [#allocation0], 4294959232 }
  0x18   :  { %9 = vsyncpa [#allocation0], 1 }

// kernel: custom-call
= control target key start
LH: loop header
LB: loop body
LE: loop exit
PB: predicated region body
PF: predicated region fallthrough
CT: control target
= control target key end

     0   :  { %2 = vsyncpa [#allocation0], 0  ;;  %s61_s0 = inlined_call_operand.hbm [shape: c64[3,7,37,23], index: 0, kind: input, shape index: {}]   ;;  %s62_s1 = inlined_call_operand.vmem [shape: f32[3,7,37,23], index: 1, kind: output, shape index: {}]  }
   0x1   :  { %s3_s8 = sshll.u32 %s62_s1, 4  ;;  %s9_s11 = scalar_lea.hbm %s61_s0, 8064  ;;  %s4_s8 = int_to_ptr.vmem [resolvable:$true] %s3_s8 }
   0x2   :  { %p10_p0 = scmp.ne.s32.totalorder %s61_s0, %s9_s11  ;;  %s11_s16 = scalar_lea.hbm %s61_s0, 16128 }
   0x3   :  { %p12_p1 = scmp.lt.u32.totalorder %s11_s16, %s9_s11  ;;  %p13_p2 = scmp.lt.u32.totalorder %s9_s11, %s61_s0 }
   0x5   :  { %p14_p3 = por %p13_p2, %p12_p1 }
   0x7   :  { %p15_p4 = pnand %p14_p3, %p10_p0 }
   0x9   :  { %18 = shalt.err (!%p15_p4)  }
   0xa   :  { %s19_s1 = scalar_lea.vmem %s4_s8, 8064  ;;  %p24_p6 = scmp.lt.s32.totalorder %s4_s8, %s4_s8 }
   0xb   :  { %p20_p5 = scmp.ne.s32.totalorder %s4_s8, %s19_s1  ;;  %p25_p7 = scmp.lt.s32.totalorder %s19_s1, %s19_s1 }
   0xd   :  { %p26_p8 = por %p25_p7, %p24_p6 }
   0xf   :  { %p27_p9 = pnand %p26_p8, %p20_p5 }
  0x11   :  { %30 = shalt.err (!%p27_p9)  }
  0x12   :  { %6 = dma.hbm_to_vmem [thread:$0]  %s61_s0, 8064, %s4_s8, [#allocation0] }
  0x13   :  { %31 = dma.done.wait [#allocation0], 8064  }
  0x14   :  { %32 = vsyncadd [#allocation0], 4294959232 }
  0x15   :  { %8 = vsyncpa [#allocation0], 1 }

// kernel: custom-call.2
= control target key start
LH: loop header
LB: loop body
LE: loop exit
PB: predicated region body
PF: predicated region fallthrough
CT: control target
= control target key end

     0   :  { %s2637_s0 = inlined_call_operand.vmem [shape: f32[3,7,37,23], index: 0, kind: input, shape index: {}]   ;;  %s2638_s2 = inlined_call_operand.vmem [shape: c64[3,7,37,23], index: 2, kind: output, shape index: {}]   ;;  %s2639_s1 = inlined_call_operand.vmem [shape: f32[3,7,37,23], index: 1, kind: input, shape index: {}]  }
   0x1   :  { %v5_v0 = vld [vmem:[%s2637_s0] sm:$0xff]  ;;  %v945_v1 = vld [vmem:[%s2637_s0 + $0x8] sm:$0xff]  ;;  %v947_v2 = vld [vmem:[%s2637_s0 + $0x10] sm:$0xff] }
   0x2   :  { %6 = vst [vmem:[%s2638_s2] sm:$0xff] %v5_v0  ;;  %946 = vst [vmem:[%s2638_s2 + $0x8] sm:$0xff] %v945_v1  ;;  %v949_v3 = vld [vmem:[%s2637_s0 + $0x18] sm:$0xff]  ;;  %v951_v4 = vld [vmem:[%s2637_s0 + $0x20] sm:$0xff] }
   0x3   :  { %948 = vst [vmem:[%s2638_s2 + $0x10] sm:$0xff] %v947_v2  ;;  %v953_v5 = vld [vmem:[%s2637_s0 + $0x28] sm:$0xff]  ;;  %950 = vst [vmem:[%s2638_s2 + $0x18] sm:$0xff] %v949_v3  ;;  %v955_v6 = vld [vmem:[%s2637_s0 + $0x30] sm:$0xff] }
   0x4   :  { %952 = vst [vmem:[%s2638_s2 + $0x20] sm:$0xff] %v951_v4  ;;  %954 = vst [vmem:[%s2638_s2 + $0x28] sm:$0xff] %v953_v5  ;;  %v957_v7 = vld [vmem:[%s2637_s0 + $0x38] sm:$0xff]  ;;  %v959_v8 = vld [vmem:[%s2637_s0 + $0x40] sm:$0xff] }
   0x5   :  { %956 = vst [vmem:[%s2638_s2 + $0x30] sm:$0xff] %v955_v6  ;;  %958 = vst [vmem:[%s2638_s2 + $0x38] sm:$0xff] %v957_v7  ;;  %v961_v9 = vld [vmem:[%s2637_s0 + $0x48] sm:$0xff]  ;;  %v963_v10 = vld [vmem:[%s2637_s0 + $0x50] sm:$0xff] }
   0x6   :  { %960 = vst [vmem:[%s2638_s2 + $0x40] sm:$0xff] %v959_v8  ;;  %v965_v11 = vld [vmem:[%s2637_s0 + $0x58] sm:$0xff]  ;;  %962 = vst [vmem:[%s2638_s2 + $0x48] sm:$0xff] %v961_v9  ;;  %v967_v12 = vld [vmem:[%s2637_s0 + $0x60] sm:$0xff] }
   0x7   :  { %964 = vst [vmem:[%s2638_s2 + $0x50] sm:$0xff] %v963_v10  ;;  %966 = vst [vmem:[%s2638_s2 + $0x58] sm:$0xff] %v965_v11  ;;  %v969_v13 = vld [vmem:[%s2637_s0 + $0x68] sm:$0xff]  ;;  %v971_v14 = vld [vmem:[%s2637_s0 + $0x70] sm:$0xff] }
   0x8   :  { %968 = vst [vmem:[%s2638_s2 + $0x60] sm:$0xff] %v967_v12  ;;  %970 = vst [vmem:[%s2638_s2 + $0x68] sm:$0xff] %v969_v13  ;;  %v973_v15 = vld [vmem:[%s2637_s0 + $0x78] sm:$0xff]  ;;  %v975_v16 = vld [vmem:[%s2637_s0 + $0x80] sm:$0xff] }
   0x9   :  { %972 = vst [vmem:[%s2638_s2 + $0x70] sm:$0xff] %v971_v14  ;;  %v977_v17 = vld [vmem:[%s2637_s0 + $0x88] sm:$0xff]  ;;  %974 = vst [vmem:[%s2638_s2 + $0x78] sm:$0xff] %v973_v15  ;;  %v979_v18 = vld [vmem:[%s2637_s0 + $0x90] sm:$0xff] }
   0xa   :  { %976 = vst [vmem:[%s2638_s2 + $0x80] sm:$0xff] %v975_v16  ;;  %978 = vst [vmem:[%s2638_s2 + $0x88] sm:$0xff] %v977_v17  ;;  %v981_v19 = vld [vmem:[%s2637_s0 + $0x98] sm:$0xff]  ;;  %v983_v20 = vld [vmem:[%s2637_s0 + $0xa0] sm:$0xff] }
   0xb   :  { %980 = vst [vmem:[%s2638_s2 + $0x90] sm:$0xff] %v979_v18  ;;  %982 = vst [vmem:[%s2638_s2 + $0x98] sm:$0xff] %v981_v19  ;;  %v985_v21 = vld [vmem:[%s2637_s0 + $0xa8] sm:$0xff]  ;;  %v987_v22 = vld [vmem:[%s2637_s0 + $0xb0] sm:$0xff] }
   0xc   :  { %984 = vst [vmem:[%s2638_s2 + $0xa0] sm:$0xff] %v983_v20  ;;  %v989_v23 = vld [vmem:[%s2637_s0 + $0xb8] sm:$0xff]  ;;  %986 = vst [vmem:[%s2638_s2 + $0xa8] sm:$0xff] %v985_v21  ;;  %v991_v24 = vld [vmem:[%s2637_s0 + $0xc0] sm:$0xff] }
   0xd   :  { %988 = vst [vmem:[%s2638_s2 + $0xb0] sm:$0xff] %v987_v22  ;;  %990 = vst [vmem:[%s2638_s2 + $0xb8] sm:$0xff] %v989_v23  ;;  %v993_v25 = vld [vmem:[%s2637_s0 + $0xc8] sm:$0xff]  ;;  %v995_v26 = vld [vmem:[%s2637_s0 + $0xd0] sm:$0xff] }
   0xe   :  { %992 = vst [vmem:[%s2638_s2 + $0xc0] sm:$0xff] %v991_v24  ;;  %994 = vst [vmem:[%s2638_s2 + $0xc8] sm:$0xff] %v993_v25  ;;  %v997_v27 = vld [vmem:[%s2637_s0 + $0xd8] sm:$0xff]  ;;  %v999_v28 = vld [vmem:[%s2637_s0 + $0xe0] sm:$0xff] }
   0xf   :  { %996 = vst [vmem:[%s2638_s2 + $0xd0] sm:$0xff] %v995_v26  ;;  %v1001_v29 = vld [vmem:[%s2637_s0 + $0xe8] sm:$0xff]  ;;  %998 = vst [vmem:[%s2638_s2 + $0xd8] sm:$0xff] %v997_v27  ;;  %v1003_v30 = vld [vmem:[%s2637_s0 + $0xf0] sm:$0xff] }
  0x10   :  { %1000 = vst [vmem:[%s2638_s2 + $0xe0] sm:$0xff] %v999_v28  ;;  %1002 = vst [vmem:[%s2638_s2 + $0xe8] sm:$0xff] %v1001_v29  ;;  %v1005_v31 = vld [vmem:[%s2637_s0 + $0xf8] sm:$0xff]  ;;  %v1007_v32 = vld [vmem:[%s2637_s0 + $0x100] sm:$0xff] }
  0x11   :  { %1004 = vst [vmem:[%s2638_s2 + $0xf0] sm:$0xff] %v1003_v30  ;;  %1006 = vst [vmem:[%s2638_s2 + $0xf8] sm:$0xff] %v1005_v31  ;;  %v1009_v33 = vld [vmem:[%s2637_s0 + $0x108] sm:$0xff]  ;;  %v1011_v34 = vld [vmem:[%s2637_s0 + $0x110] sm:$0xff] }
  0x12   :  { %1008 = vst [vmem:[%s2638_s2 + $0x100] sm:$0xff] %v1007_v32  ;;  %v1013_v35 = vld [vmem:[%s2637_s0 + $0x118] sm:$0xff]  ;;  %1010 = vst [vmem:[%s2638_s2 + $0x108] sm:$0xff] %v1009_v33  ;;  %v1015_v36 = vld [vmem:[%s2637_s0 + $0x120] sm:$0xff] }
  0x13   :  { %1012 = vst [vmem:[%s2638_s2 + $0x110] sm:$0xff] %v1011_v34  ;;  %1014 = vst [vmem:[%s2638_s2 + $0x118] sm:$0xff] %v1013_v35  ;;  %v1017_v37 = vld [vmem:[%s2637_s0 + $0x128] sm:$0xff]  ;;  %v1019_v38 = vld [vmem:[%s2637_s0 + $0x130] sm:$0xff] }
  0x14   :  { %1016 = vst [vmem:[%s2638_s2 + $0x120] sm:$0xff] %v1015_v36  ;;  %1018 = vst [vmem:[%s2638_s2 + $0x128] sm:$0xff] %v1017_v37  ;;  %v1021_v39 = vld [vmem:[%s2637_s0 + $0x138] sm:$0xff]  ;;  %v1023_v40 = vld [vmem:[%s2637_s0 + $0x140] sm:$0xff] }
  0x15   :  { %1020 = vst [vmem:[%s2638_s2 + $0x130] sm:$0xff] %v1019_v38  ;;  %v1025_v41 = vld [vmem:[%s2637_s0 + $0x148] sm:$0xff]  ;;  %1022 = vst [vmem:[%s2638_s2 + $0x138] sm:$0xff] %v1021_v39  ;;  %v1027_v42 = vld [vmem:[%s2637_s0 + $0x150] sm:$0xff] }
  0x16   :  { %1024 = vst [vmem:[%s2638_s2 + $0x140] sm:$0xff] %v1023_v40  ;;  %1026 = vst [vmem:[%s2638_s2 + $0x148] sm:$0xff] %v1025_v41  ;;  %v1029_v43 = vld [vmem:[%s2637_s0 + $0x158] sm:$0xff]  ;;  %v1031_v44 = vld [vmem:[%s2637_s0 + $0x160] sm:$0xff] }
  0x17   :  { %1028 = vst [vmem:[%s2638_s2 + $0x150] sm:$0xff] %v1027_v42  ;;  %1030 = vst [vmem:[%s2638_s2 + $0x158] sm:$0xff] %v1029_v43  ;;  %v1033_v45 = vld [vmem:[%s2637_s0 + $0x168] sm:$0xff]  ;;  %v1035_v46 = vld [vmem:[%s2637_s0 + $0x170] sm:$0xff] }
  0x18   :  { %1032 = vst [vmem:[%s2638_s2 + $0x160] sm:$0xff] %v1031_v44  ;;  %v1037_v47 = vld [vmem:[%s2637_s0 + $0x178] sm:$0xff]  ;;  %1034 = vst [vmem:[%s2638_s2 + $0x168] sm:$0xff] %v1033_v45  ;;  %v1039_v48 = vld [vmem:[%s2637_s0 + $0x180] sm:$0xff] }
  0x19   :  { %1036 = vst [vmem:[%s2638_s2 + $0x170] sm:$0xff] %v1035_v46  ;;  %1038 = vst [vmem:[%s2638_s2 + $0x178] sm:$0xff] %v1037_v47  ;;  %v1041_v49 = vld [vmem:[%s2637_s0 + $0x188] sm:$0xff]  ;;  %v1043_v50 = vld [vmem:[%s2637_s0 + $0x190] sm:$0xff] }
  0x1a   :  { %1040 = vst [vmem:[%s2638_s2 + $0x180] sm:$0xff] %v1039_v48  ;;  %1042 = vst [vmem:[%s2638_s2 + $0x188] sm:$0xff] %v1041_v49  ;;  %v1045_v51 = vld [vmem:[%s2637_s0 + $0x198] sm:$0xff]  ;;  %v1047_v52 = vld [vmem:[%s2637_s0 + $0x1a0] sm:$0xff] }
  0x1b   :  { %1044 = vst [vmem:[%s2638_s2 + $0x190] sm:$0xff] %v1043_v50  ;;  %v1049_v53 = vld [vmem:[%s2637_s0 + $0x1a8] sm:$0xff]  ;;  %1046 = vst [vmem:[%s2638_s2 + $0x198] sm:$0xff] %v1045_v51  ;;  %v1051_v54 = vld [vmem:[%s2637_s0 + $0x1b0] sm:$0xff] }
  0x1c   :  { %1048 = vst [vmem:[%s2638_s2 + $0x1a0] sm:$0xff] %v1047_v52  ;;  %1050 = vst [vmem:[%s2638_s2 + $0x1a8] sm:$0xff] %v1049_v53  ;;  %v1053_v55 = vld [vmem:[%s2637_s0 + $0x1b8] sm:$0xff]  ;;  %v1055_v56 = vld [vmem:[%s2637_s0 + $0x1c0] sm:$0xff] }
  0x1d   :  { %1052 = vst [vmem:[%s2638_s2 + $0x1b0] sm:$0xff] %v1051_v54  ;;  %1054 = vst [vmem:[%s2638_s2 + $0x1b8] sm:$0xff] %v1053_v55  ;;  %v1057_v57 = vld [vmem:[%s2637_s0 + $0x1c8] sm:$0xff]  ;;  %v1059_v58 = vld [vmem:[%s2637_s0 + $0x1d0] sm:$0xff] }
  0x1e   :  { %1056 = vst [vmem:[%s2638_s2 + $0x1c0] sm:$0xff] %v1055_v56  ;;  %v1061_v59 = vld [vmem:[%s2637_s0 + $0x1d8] sm:$0xff]  ;;  %1058 = vst [vmem:[%s2638_s2 + $0x1c8] sm:$0xff] %v1057_v57  ;;  %v1063_v60 = vld [vmem:[%s2637_s0 + $0x1e0] sm:$0xff] }
  0x1f   :  { %1060 = vst [vmem:[%s2638_s2 + $0x1d0] sm:$0xff] %v1059_v58  ;;  %1062 = vst [vmem:[%s2638_s2 + $0x1d8] sm:$0xff] %v1061_v59  ;;  %v1065_v61 = vld [vmem:[%s2637_s0 + $0x1e8] sm:$0xff]  ;;  %v1067_v62 = vld [vmem:[%s2637_s0 + $0x1f0] sm:$0xff] }
  0x20   :  { %1064 = vst [vmem:[%s2638_s2 + $0x1e0] sm:$0xff] %v1063_v60  ;;  %1066 = vst [vmem:[%s2638_s2 + $0x1e8] sm:$0xff] %v1065_v61  ;;  %v1069_v63 = vld [vmem:[%s2637_s0 + $0x1f8] sm:$0xff]  ;;  %v1071_v0 = vld [vmem:[%s2637_s0 + $0x200] sm:$0xff] }
  0x21   :  { %1068 = vst [vmem:[%s2638_s2 + $0x1f0] sm:$0xff] %v1067_v62  ;;  %v1073_v1 = vld [vmem:[%s2637_s0 + $0x208] sm:$0xff]  ;;  %1070 = vst [vmem:[%s2638_s2 + $0x1f8] sm:$0xff] %v1069_v63  ;;  %v1075_v2 = vld [vmem:[%s2637_s0 + $0x210] sm:$0xff] }
  0x22   :  { %1072 = vst [vmem:[%s2638_s2 + $0x200] sm:$0xff] %v1071_v0  ;;  %1074 = vst [vmem:[%s2638_s2 + $0x208] sm:$0xff] %v1073_v1  ;;  %v1077_v3 = vld [vmem:[%s2637_s0 + $0x218] sm:$0xff]  ;;  %v1079_v4 = vld [vmem:[%s2637_s0 + $0x220] sm:$0xff] }
  0x23   :  { %1076 = vst [vmem:[%s2638_s2 + $0x210] sm:$0xff] %v1075_v2  ;;  %1078 = vst [vmem:[%s2638_s2 + $0x218] sm:$0xff] %v1077_v3  ;;  %v1081_v5 = vld [vmem:[%s2637_s0 + $0x228] sm:$0xff]  ;;  %v1083_v6 = vld [vmem:[%s2637_s0 + $0x230] sm:$0xff] }
  0x24   :  { %1080 = vst [vmem:[%s2638_s2 + $0x220] sm:$0xff] %v1079_v4  ;;  %v1085_v7 = vld [vmem:[%s2637_s0 + $0x238] sm:$0xff]  ;;  %1082 = vst [vmem:[%s2638_s2 + $0x228] sm:$0xff] %v1081_v5  ;;  %v1087_v8 = vld [vmem:[%s2637_s0 + $0x240] sm:$0xff] }
  0x25   :  { %1084 = vst [vmem:[%s2638_s2 + $0x230] sm:$0xff] %v1083_v6  ;;  %1086 = vst [vmem:[%s2638_s2 + $0x238] sm:$0xff] %v1085_v7  ;;  %v1089_v9 = vld [vmem:[%s2637_s0 + $0x248] sm:$0xff]  ;;  %v1091_v10 = vld [vmem:[%s2637_s0 + $0x250] sm:$0xff] }
  0x26   :  { %1088 = vst [vmem:[%s2638_s2 + $0x240] sm:$0xff] %v1087_v8  ;;  %1090 = vst [vmem:[%s2638_s2 + $0x248] sm:$0xff] %v1089_v9  ;;  %v1093_v11 = vld [vmem:[%s2637_s0 + $0x258] sm:$0xff]  ;;  %v1095_v12 = vld [vmem:[%s2637_s0 + $0x260] sm:$0xff] }
  0x27   :  { %1092 = vst [vmem:[%s2638_s2 + $0x250] sm:$0xff] %v1091_v10  ;;  %v1097_v13 = vld [vmem:[%s2637_s0 + $0x268] sm:$0xff]  ;;  %1094 = vst [vmem:[%s2638_s2 + $0x258] sm:$0xff] %v1093_v11  ;;  %v1099_v14 = vld [vmem:[%s2637_s0 + $0x270] sm:$0xff] }
  0x28   :  { %1096 = vst [vmem:[%s2638_s2 + $0x260] sm:$0xff] %v1095_v12  ;;  %1098 = vst [vmem:[%s2638_s2 + $0x268] sm:$0xff] %v1097_v13  ;;  %v1101_v15 = vld [vmem:[%s2637_s0 + $0x278] sm:$0xff]  ;;  %v1103_v16 = vld [vmem:[%s2637_s0 + $0x280] sm:$0xff] }
  0x29   :  { %1100 = vst [vmem:[%s2638_s2 + $0x270] sm:$0xff] %v1099_v14  ;;  %1102 = vst [vmem:[%s2638_s2 + $0x278] sm:$0xff] %v1101_v15  ;;  %v1105_v17 = vld [vmem:[%s2637_s0 + $0x288] sm:$0xff]  ;;  %v1107_v18 = vld [vmem:[%s2637_s0 + $0x290] sm:$0xff] }
  0x2a   :  { %1104 = vst [vmem:[%s2638_s2 + $0x280] sm:$0xff] %v1103_v16  ;;  %v1109_v19 = vld [vmem:[%s2637_s0 + $0x298] sm:$0xff]  ;;  %1106 = vst [vmem:[%s2638_s2 + $0x288] sm:$0xff] %v1105_v17  ;;  %v1111_v20 = vld [vmem:[%s2637_s0 + $0x2a0] sm:$0xff] }
  0x2b   :  { %1108 = vst [vmem:[%s2638_s2 + $0x290] sm:$0xff] %v1107_v18  ;;  %1110 = vst [vmem:[%s2638_s2 + $0x298] sm:$0xff] %v1109_v19  ;;  %v1113_v21 = vld [vmem:[%s2637_s0 + $0x2a8] sm:$0xff]  ;;  %v1115_v22 = vld [vmem:[%s2637_s0 + $0x2b0] sm:$0xff] }
  0x2c   :  { %1112 = vst [vmem:[%s2638_s2 + $0x2a0] sm:$0xff] %v1111_v20  ;;  %1114 = vst [vmem:[%s2638_s2 + $0x2a8] sm:$0xff] %v1113_v21  ;;  %v1117_v23 = vld [vmem:[%s2637_s0 + $0x2b8] sm:$0xff]  ;;  %v1119_v24 = vld [vmem:[%s2637_s0 + $0x2c0] sm:$0xff] }
  0x2d   :  { %1116 = vst [vmem:[%s2638_s2 + $0x2b0] sm:$0xff] %v1115_v22  ;;  %v1121_v25 = vld [vmem:[%s2637_s0 + $0x2c8] sm:$0xff]  ;;  %1118 = vst [vmem:[%s2638_s2 + $0x2b8] sm:$0xff] %v1117_v23  ;;  %v1123_v26 = vld [vmem:[%s2637_s0 + $0x2d0] sm:$0xff] }
  0x2e   :  { %1120 = vst [vmem:[%s2638_s2 + $0x2c0] sm:$0xff] %v1119_v24  ;;  %1122 = vst [vmem:[%s2638_s2 + $0x2c8] sm:$0xff] %v1121_v25  ;;  %v1125_v27 = vld [vmem:[%s2637_s0 + $0x2d8] sm:$0xff]  ;;  %v1127_v28 = vld [vmem:[%s2637_s0 + $0x2e0] sm:$0xff] }
  0x2f   :  { %1124 = vst [vmem:[%s2638_s2 + $0x2d0] sm:$0xff] %v1123_v26  ;;  %1126 = vst [vmem:[%s2638_s2 + $0x2d8] sm:$0xff] %v1125_v27  ;;  %v1129_v29 = vld [vmem:[%s2637_s0 + $0x2e8] sm:$0xff]  ;;  %v1131_v30 = vld [vmem:[%s2637_s0 + $0x2f0] sm:$0xff] }
  0x30   :  { %1128 = vst [vmem:[%s2638_s2 + $0x2e0] sm:$0xff] %v1127_v28  ;;  %v1133_v31 = vld [vmem:[%s2637_s0 + $0x2f8] sm:$0xff]  ;;  %1130 = vst [vmem:[%s2638_s2 + $0x2e8] sm:$0xff] %v1129_v29  ;;  %v1135_v32 = vld [vmem:[%s2637_s0 + $0x300] sm:$0xff] }
  0x31   :  { %1132 = vst [vmem:[%s2638_s2 + $0x2f0] sm:$0xff] %v1131_v30  ;;  %1134 = vst [vmem:[%s2638_s2 + $0x2f8] sm:$0xff] %v1133_v31  ;;  %v1137_v33 = vld [vmem:[%s2637_s0 + $0x308] sm:$0xff]  ;;  %v1139_v34 = vld [vmem:[%s2637_s0 + $0x310] sm:$0xff] }
  0x32   :  { %1136 = vst [vmem:[%s2638_s2 + $0x300] sm:$0xff] %v1135_v32  ;;  %1138 = vst [vmem:[%s2638_s2 + $0x308] sm:$0xff] %v1137_v33  ;;  %v1141_v35 = vld [vmem:[%s2637_s0 + $0x318] sm:$0xff]  ;;  %v1143_v36 = vld [vmem:[%s2637_s0 + $0x320] sm:$0xff] }
  0x33   :  { %1140 = vst [vmem:[%s2638_s2 + $0x310] sm:$0xff] %v1139_v34  ;;  %v1145_v37 = vld [vmem:[%s2637_s0 + $0x328] sm:$0xff]  ;;  %1142 = vst [vmem:[%s2638_s2 + $0x318] sm:$0xff] %v1141_v35  ;;  %v1147_v38 = vld [vmem:[%s2637_s0 + $0x330] sm:$0xff] }
  0x34   :  { %1144 = vst [vmem:[%s2638_s2 + $0x320] sm:$0xff] %v1143_v36  ;;  %1146 = vst [vmem:[%s2638_s2 + $0x328] sm:$0xff] %v1145_v37  ;;  %v1149_v39 = vld [vmem:[%s2637_s0 + $0x338] sm:$0xff]  ;;  %v1151_v40 = vld [vmem:[%s2637_s0 + $0x340] sm:$0xff] }
  0x35   :  { %1148 = vst [vmem:[%s2638_s2 + $0x330] sm:$0xff] %v1147_v38  ;;  %1150 = vst [vmem:[%s2638_s2 + $0x338] sm:$0xff] %v1149_v39  ;;  %v423_v41 = vld [vmem:[%s2639_s1] sm:$0xff]  ;;  %v1154_v42 = vld [vmem:[%s2639_s1 + $0x8] sm:$0xff] }
  0x36   :  { %1152 = vst [vmem:[%s2638_s2 + $0x340] sm:$0xff] %v1151_v40  ;;  %v1156_v43 = vld [vmem:[%s2639_s1 + $0x10] sm:$0xff]  ;;  %1153 = vst [vmem:[%s2638_s2 + $0x348] sm:$0xff] %v423_v41  ;;  %v1158_v44 = vld [vmem:[%s2639_s1 + $0x18] sm:$0xff] }
  0x37   :  { %1155 = vst [vmem:[%s2638_s2 + $0x350] sm:$0xff] %v1154_v42  ;;  %1157 = vst [vmem:[%s2638_s2 + $0x358] sm:$0xff] %v1156_v43  ;;  %v1160_v45 = vld [vmem:[%s2639_s1 + $0x20] sm:$0xff]  ;;  %v1162_v46 = vld [vmem:[%s2639_s1 + $0x28] sm:$0xff] }
  0x38   :  { %1159 = vst [vmem:[%s2638_s2 + $0x360] sm:$0xff] %v1158_v44  ;;  %1161 = vst [vmem:[%s2638_s2 + $0x368] sm:$0xff] %v1160_v45  ;;  %v1164_v47 = vld [vmem:[%s2639_s1 + $0x30] sm:$0xff]  ;;  %v1166_v48 = vld [vmem:[%s2639_s1 + $0x38] sm:$0xff] }
  0x39   :  { %1163 = vst [vmem:[%s2638_s2 + $0x370] sm:$0xff] %v1162_v46  ;;  %v1168_v49 = vld [vmem:[%s2639_s1 + $0x40] sm:$0xff]  ;;  %1165 = vst [vmem:[%s2638_s2 + $0x378] sm:$0xff] %v1164_v47  ;;  %v1170_v50 = vld [vmem:[%s2639_s1 + $0x48] sm:$0xff] }
  0x3a   :  { %1167 = vst [vmem:[%s2638_s2 + $0x380] sm:$0xff] %v1166_v48  ;;  %1169 = vst [vmem:[%s2638_s2 + $0x388] sm:$0xff] %v1168_v49  ;;  %v1172_v51 = vld [vmem:[%s2639_s1 + $0x50] sm:$0xff]  ;;  %v1174_v52 = vld [vmem:[%s2639_s1 + $0x58] sm:$0xff] }
  0x3b   :  { %1171 = vst [vmem:[%s2638_s2 + $0x390] sm:$0xff] %v1170_v50  ;;  %1173 = vst [vmem:[%s2638_s2 + $0x398] sm:$0xff] %v1172_v51  ;;  %v1176_v53 = vld [vmem:[%s2639_s1 + $0x60] sm:$0xff]  ;;  %v1178_v54 = vld [vmem:[%s2639_s1 + $0x68] sm:$0xff] }
  0x3c   :  { %1175 = vst [vmem:[%s2638_s2 + $0x3a0] sm:$0xff] %v1174_v52  ;;  %v1180_v55 = vld [vmem:[%s2639_s1 + $0x70] sm:$0xff]  ;;  %1177 = vst [vmem:[%s2638_s2 + $0x3a8] sm:$0xff] %v1176_v53  ;;  %v1182_v56 = vld [vmem:[%s2639_s1 + $0x78] sm:$0xff] }
  0x3d   :  { %1179 = vst [vmem:[%s2638_s2 + $0x3b0] sm:$0xff] %v1178_v54  ;;  %1181 = vst [vmem:[%s2638_s2 + $0x3b8] sm:$0xff] %v1180_v55  ;;  %v1184_v57 = vld [vmem:[%s2639_s1 + $0x80] sm:$0xff]  ;;  %v1186_v58 = vld [vmem:[%s2639_s1 + $0x88] sm:$0xff] }
  0x3e   :  { %1183 = vst [vmem:[%s2638_s2 + $0x3c0] sm:$0xff] %v1182_v56  ;;  %1185 = vst [vmem:[%s2638_s2 + $0x3c8] sm:$0xff] %v1184_v57  ;;  %v1188_v59 = vld [vmem:[%s2639_s1 + $0x90] sm:$0xff]  ;;  %v1190_v60 = vld [vmem:[%s2639_s1 + $0x98] sm:$0xff] }
  0x3f   :  { %1187 = vst [vmem:[%s2638_s2 + $0x3d0] sm:$0xff] %v1186_v58  ;;  %v1192_v61 = vld [vmem:[%s2639_s1 + $0xa0] sm:$0xff]  ;;  %1189 = vst [vmem:[%s2638_s2 + $0x3d8] sm:$0xff] %v1188_v59  ;;  %v1194_v62 = vld [vmem:[%s2639_s1 + $0xa8] sm:$0xff] }
  0x40   :  { %1191 = vst [vmem:[%s2638_s2 + $0x3e0] sm:$0xff] %v1190_v60  ;;  %1193 = vst [vmem:[%s2638_s2 + $0x3e8] sm:$0xff] %v1192_v61  ;;  %v1196_v63 = vld [vmem:[%s2639_s1 + $0xb0] sm:$0xff]  ;;  %v1198_v0 = vld [vmem:[%s2639_s1 + $0xb8] sm:$0xff] }
  0x41   :  { %1195 = vst [vmem:[%s2638_s2 + $0x3f0] sm:$0xff] %v1194_v62  ;;  %1197 = vst [vmem:[%s2638_s2 + $0x3f8] sm:$0xff] %v1196_v63  ;;  %v1200_v1 = vld [vmem:[%s2639_s1 + $0xc0] sm:$0xff]  ;;  %v1202_v2 = vld [vmem:[%s2639_s1 + $0xc8] sm:$0xff] }
  0x42   :  { %1199 = vst [vmem:[%s2638_s2 + $0x400] sm:$0xff] %v1198_v0  ;;  %v1204_v3 = vld [vmem:[%s2639_s1 + $0xd0] sm:$0xff]  ;;  %1201 = vst [vmem:[%s2638_s2 + $0x408] sm:$0xff] %v1200_v1  ;;  %v1206_v4 = vld [vmem:[%s2639_s1 + $0xd8] sm:$0xff] }
  0x43   :  { %1203 = vst [vmem:[%s2638_s2 + $0x410] sm:$0xff] %v1202_v2  ;;  %1205 = vst [vmem:[%s2638_s2 + $0x418] sm:$0xff] %v1204_v3  ;;  %v1208_v5 = vld [vmem:[%s2639_s1 + $0xe0] sm:$0xff]  ;;  %v1210_v6 = vld [vmem:[%s2639_s1 + $0xe8] sm:$0xff] }
  0x44   :  { %1207 = vst [vmem:[%s2638_s2 + $0x420] sm:$0xff] %v1206_v4  ;;  %1209 = vst [vmem:[%s2638_s2 + $0x428] sm:$0xff] %v1208_v5  ;;  %v1212_v7 = vld [vmem:[%s2639_s1 + $0xf0] sm:$0xff]  ;;  %v1214_v8 = vld [vmem:[%s2639_s1 + $0xf8] sm:$0xff] }
  0x45   :  { %1211 = vst [vmem:[%s2638_s2 + $0x430] sm:$0xff] %v1210_v6  ;;  %v1216_v9 = vld [vmem:[%s2639_s1 + $0x100] sm:$0xff]  ;;  %1213 = vst [vmem:[%s2638_s2 + $0x438] sm:$0xff] %v1212_v7  ;;  %v1218_v10 = vld [vmem:[%s2639_s1 + $0x108] sm:$0xff] }
  0x46   :  { %1215 = vst [vmem:[%s2638_s2 + $0x440] sm:$0xff] %v1214_v8  ;;  %1217 = vst [vmem:[%s2638_s2 + $0x448] sm:$0xff] %v1216_v9  ;;  %v1220_v11 = vld [vmem:[%s2639_s1 + $0x110] sm:$0xff]  ;;  %v1222_v12 = vld [vmem:[%s2639_s1 + $0x118] sm:$0xff] }
  0x47   :  { %1219 = vst [vmem:[%s2638_s2 + $0x450] sm:$0xff] %v1218_v10  ;;  %1221 = vst [vmem:[%s2638_s2 + $0x458] sm:$0xff] %v1220_v11  ;;  %v1224_v13 = vld [vmem:[%s2639_s1 + $0x120] sm:$0xff]  ;;  %v1226_v14 = vld [vmem:[%s2639_s1 + $0x128] sm:$0xff] }
  0x48   :  { %1223 = vst [vmem:[%s2638_s2 + $0x460] sm:$0xff] %v1222_v12  ;;  %v1228_v15 = vld [vmem:[%s2639_s1 + $0x130] sm:$0xff]  ;;  %1225 = vst [vmem:[%s2638_s2 + $0x468] sm:$0xff] %v1224_v13  ;;  %v1230_v16 = vld [vmem:[%s2639_s1 + $0x138] sm:$0xff] }
  0x49   :  { %1227 = vst [vmem:[%s2638_s2 + $0x470] sm:$0xff] %v1226_v14  ;;  %1229 = vst [vmem:[%s2638_s2 + $0x478] sm:$0xff] %v1228_v15  ;;  %v1232_v17 = vld [vmem:[%s2639_s1 + $0x140] sm:$0xff]  ;;  %v1234_v18 = vld [vmem:[%s2639_s1 + $0x148] sm:$0xff] }
  0x4a   :  { %1231 = vst [vmem:[%s2638_s2 + $0x480] sm:$0xff] %v1230_v16  ;;  %1233 = vst [vmem:[%s2638_s2 + $0x488] sm:$0xff] %v1232_v17  ;;  %v1236_v19 = vld [vmem:[%s2639_s1 + $0x150] sm:$0xff]  ;;  %v1238_v20 = vld [vmem:[%s2639_s1 + $0x158] sm:$0xff] }
  0x4b   :  { %1235 = vst [vmem:[%s2638_s2 + $0x490] sm:$0xff] %v1234_v18  ;;  %v1240_v21 = vld [vmem:[%s2639_s1 + $0x160] sm:$0xff]  ;;  %1237 = vst [vmem:[%s2638_s2 + $0x498] sm:$0xff] %v1236_v19  ;;  %v1242_v22 = vld [vmem:[%s2639_s1 + $0x168] sm:$0xff] }
  0x4c   :  { %1239 = vst [vmem:[%s2638_s2 + $0x4a0] sm:$0xff] %v1238_v20  ;;  %1241 = vst [vmem:[%s2638_s2 + $0x4a8] sm:$0xff] %v1240_v21  ;;  %v1244_v23 = vld [vmem:[%s2639_s1 + $0x170] sm:$0xff]  ;;  %v1246_v24 = vld [vmem:[%s2639_s1 + $0x178] sm:$0xff] }
  0x4d   :  { %1243 = vst [vmem:[%s2638_s2 + $0x4b0] sm:$0xff] %v1242_v22  ;;  %1245 = vst [vmem:[%s2638_s2 + $0x4b8] sm:$0xff] %v1244_v23  ;;  %v1248_v25 = vld [vmem:[%s2639_s1 + $0x180] sm:$0xff]  ;;  %v1250_v26 = vld [vmem:[%s2639_s1 + $0x188] sm:$0xff] }
  0x4e   :  { %1247 = vst [vmem:[%s2638_s2 + $0x4c0] sm:$0xff] %v1246_v24  ;;  %v1252_v27 = vld [vmem:[%s2639_s1 + $0x190] sm:$0xff]  ;;  %1249 = vst [vmem:[%s2638_s2 + $0x4c8] sm:$0xff] %v1248_v25  ;;  %v1254_v28 = vld [vmem:[%s2639_s1 + $0x198] sm:$0xff] }
  0x4f   :  { %1251 = vst [vmem:[%s2638_s2 + $0x4d0] sm:$0xff] %v1250_v26  ;;  %1253 = vst [vmem:[%s2638_s2 + $0x4d8] sm:$0xff] %v1252_v27  ;;  %v1256_v29 = vld [vmem:[%s2639_s1 + $0x1a0] sm:$0xff]  ;;  %v1258_v30 = vld [vmem:[%s2639_s1 + $0x1a8] sm:$0xff] }
  0x50   :  { %1255 = vst [vmem:[%s2638_s2 + $0x4e0] sm:$0xff] %v1254_v28  ;;  %1257 = vst [vmem:[%s2638_s2 + $0x4e8] sm:$0xff] %v1256_v29  ;;  %v1260_v31 = vld [vmem:[%s2639_s1 + $0x1b0] sm:$0xff]  ;;  %v1262_v32 = vld [vmem:[%s2639_s1 + $0x1b8] sm:$0xff] }
  0x51   :  { %1259 = vst [vmem:[%s2638_s2 + $0x4f0] sm:$0xff] %v1258_v30  ;;  %v1264_v33 = vld [vmem:[%s2639_s1 + $0x1c0] sm:$0xff]  ;;  %1261 = vst [vmem:[%s2638_s2 + $0x4f8] sm:$0xff] %v1260_v31  ;;  %v1266_v34 = vld [vmem:[%s2639_s1 + $0x1c8] sm:$0xff] }
  0x52   :  { %1263 = vst [vmem:[%s2638_s2 + $0x500] sm:$0xff] %v1262_v32  ;;  %1265 = vst [vmem:[%s2638_s2 + $0x508] sm:$0xff] %v1264_v33  ;;  %v1268_v35 = vld [vmem:[%s2639_s1 + $0x1d0] sm:$0xff]  ;;  %v1270_v36 = vld [vmem:[%s2639_s1 + $0x1d8] sm:$0xff] }
  0x53   :  { %1267 = vst [vmem:[%s2638_s2 + $0x510] sm:$0xff] %v1266_v34  ;;  %1269 = vst [vmem:[%s2638_s2 + $0x518] sm:$0xff] %v1268_v35  ;;  %v1272_v37 = vld [vmem:[%s2639_s1 + $0x1e0] sm:$0xff]  ;;  %v1274_v38 = vld [vmem:[%s2639_s1 + $0x1e8] sm:$0xff] }
  0x54   :  { %1271 = vst [vmem:[%s2638_s2 + $0x520] sm:$0xff] %v1270_v36  ;;  %v1276_v39 = vld [vmem:[%s2639_s1 + $0x1f0] sm:$0xff]  ;;  %1273 = vst [vmem:[%s2638_s2 + $0x528] sm:$0xff] %v1272_v37  ;;  %v1278_v40 = vld [vmem:[%s2639_s1 + $0x1f8] sm:$0xff] }
  0x55   :  { %1275 = vst [vmem:[%s2638_s2 + $0x530] sm:$0xff] %v1274_v38  ;;  %1277 = vst [vmem:[%s2638_s2 + $0x538] sm:$0xff] %v1276_v39  ;;  %v1280_v41 = vld [vmem:[%s2639_s1 + $0x200] sm:$0xff]  ;;  %v1282_v42 = vld [vmem:[%s2639_s1 + $0x208] sm:$0xff] }
  0x56   :  { %1279 = vst [vmem:[%s2638_s2 + $0x540] sm:$0xff] %v1278_v40  ;;  %1281 = vst [vmem:[%s2638_s2 + $0x548] sm:$0xff] %v1280_v41  ;;  %v1284_v43 = vld [vmem:[%s2639_s1 + $0x210] sm:$0xff]  ;;  %v1286_v44 = vld [vmem:[%s2639_s1 + $0x218] sm:$0xff] }
  0x57   :  { %1283 = vst [vmem:[%s2638_s2 + $0x550] sm:$0xff] %v1282_v42  ;;  %v1288_v45 = vld [vmem:[%s2639_s1 + $0x220] sm:$0xff]  ;;  %1285 = vst [vmem:[%s2638_s2 + $0x558] sm:$0xff] %v1284_v43  ;;  %v1290_v46 = vld [vmem:[%s2639_s1 + $0x228] sm:$0xff] }
  0x58   :  { %1287 = vst [vmem:[%s2638_s2 + $0x560] sm:$0xff] %v1286_v44  ;;  %1289 = vst [vmem:[%s2638_s2 + $0x568] sm:$0xff] %v1288_v45  ;;  %v1292_v47 = vld [vmem:[%s2639_s1 + $0x230] sm:$0xff]  ;;  %v1294_v48 = vld [vmem:[%s2639_s1 + $0x238] sm:$0xff] }
  0x59   :  { %1291 = vst [vmem:[%s2638_s2 + $0x570] sm:$0xff] %v1290_v46  ;;  %1293 = vst [vmem:[%s2638_s2 + $0x578] sm:$0xff] %v1292_v47  ;;  %v1296_v49 = vld [vmem:[%s2639_s1 + $0x240] sm:$0xff]  ;;  %v1298_v50 = vld [vmem:[%s2639_s1 + $0x248] sm:$0xff] }
  0x5a   :  { %1295 = vst [vmem:[%s2638_s2 + $0x580] sm:$0xff] %v1294_v48  ;;  %v1300_v51 = vld [vmem:[%s2639_s1 + $0x250] sm:$0xff]  ;;  %1297 = vst [vmem:[%s2638_s2 + $0x588] sm:$0xff] %v1296_v49  ;;  %v1302_v52 = vld [vmem:[%s2639_s1 + $0x258] sm:$0xff] }
  0x5b   :  { %1299 = vst [vmem:[%s2638_s2 + $0x590] sm:$0xff] %v1298_v50  ;;  %1301 = vst [vmem:[%s2638_s2 + $0x598] sm:$0xff] %v1300_v51  ;;  %v1304_v53 = vld [vmem:[%s2639_s1 + $0x260] sm:$0xff]  ;;  %v1306_v54 = vld [vmem:[%s2639_s1 + $0x268] sm:$0xff] }
  0x5c   :  { %1303 = vst [vmem:[%s2638_s2 + $0x5a0] sm:$0xff] %v1302_v52  ;;  %1305 = vst [vmem:[%s2638_s2 + $0x5a8] sm:$0xff] %v1304_v53  ;;  %v1308_v55 = vld [vmem:[%s2639_s1 + $0x270] sm:$0xff]  ;;  %v1310_v56 = vld [vmem:[%s2639_s1 + $0x278] sm:$0xff] }
  0x5d   :  { %1307 = vst [vmem:[%s2638_s2 + $0x5b0] sm:$0xff] %v1306_v54  ;;  %v1312_v57 = vld [vmem:[%s2639_s1 + $0x280] sm:$0xff]  ;;  %1309 = vst [vmem:[%s2638_s2 + $0x5b8] sm:$0xff] %v1308_v55  ;;  %v1314_v58 = vld [vmem:[%s2639_s1 + $0x288] sm:$0xff] }
  0x5e   :  { %1311 = vst [vmem:[%s2638_s2 + $0x5c0] sm:$0xff] %v1310_v56  ;;  %1313 = vst [vmem:[%s2638_s2 + $0x5c8] sm:$0xff] %v1312_v57  ;;  %v1316_v59 = vld [vmem:[%s2639_s1 + $0x290] sm:$0xff]  ;;  %v1318_v60 = vld [vmem:[%s2639_s1 + $0x298] sm:$0xff] }
  0x5f   :  { %1315 = vst [vmem:[%s2638_s2 + $0x5d0] sm:$0xff] %v1314_v58  ;;  %1317 = vst [vmem:[%s2638_s2 + $0x5d8] sm:$0xff] %v1316_v59  ;;  %v1320_v61 = vld [vmem:[%s2639_s1 + $0x2a0] sm:$0xff]  ;;  %v1322_v62 = vld [vmem:[%s2639_s1 + $0x2a8] sm:$0xff] }
  0x60   :  { %1319 = vst [vmem:[%s2638_s2 + $0x5e0] sm:$0xff] %v1318_v60  ;;  %v1324_v63 = vld [vmem:[%s2639_s1 + $0x2b0] sm:$0xff]  ;;  %1321 = vst [vmem:[%s2638_s2 + $0x5e8] sm:$0xff] %v1320_v61  ;;  %v1326_v0 = vld [vmem:[%s2639_s1 + $0x2b8] sm:$0xff] }
  0x61   :  { %1323 = vst [vmem:[%s2638_s2 + $0x5f0] sm:$0xff] %v1322_v62  ;;  %1325 = vst [vmem:[%s2638_s2 + $0x5f8] sm:$0xff] %v1324_v63  ;;  %v1328_v1 = vld [vmem:[%s2639_s1 + $0x2c0] sm:$0xff]  ;;  %v1330_v2 = vld [vmem:[%s2639_s1 + $0x2c8] sm:$0xff] }
  0x62   :  { %1327 = vst [vmem:[%s2638_s2 + $0x600] sm:$0xff] %v1326_v0  ;;  %1329 = vst [vmem:[%s2638_s2 + $0x608] sm:$0xff] %v1328_v1  ;;  %v1332_v3 = vld [vmem:[%s2639_s1 + $0x2d0] sm:$0xff]  ;;  %v1334_v4 = vld [vmem:[%s2639_s1 + $0x2d8] sm:$0xff] }
  0x63   :  { %1331 = vst [vmem:[%s2638_s2 + $0x610] sm:$0xff] %v1330_v2  ;;  %v1336_v5 = vld [vmem:[%s2639_s1 + $0x2e0] sm:$0xff]  ;;  %1333 = vst [vmem:[%s2638_s2 + $0x618] sm:$0xff] %v1332_v3  ;;  %v1338_v6 = vld [vmem:[%s2639_s1 + $0x2e8] sm:$0xff] }
  0x64   :  { %1335 = vst [vmem:[%s2638_s2 + $0x620] sm:$0xff] %v1334_v4  ;;  %1337 = vst [vmem:[%s2638_s2 + $0x628] sm:$0xff] %v1336_v5  ;;  %v1340_v7 = vld [vmem:[%s2639_s1 + $0x2f0] sm:$0xff]  ;;  %v1342_v8 = vld [vmem:[%s2639_s1 + $0x2f8] sm:$0xff] }
  0x65   :  { %1339 = vst [vmem:[%s2638_s2 + $0x630] sm:$0xff] %v1338_v6  ;;  %1341 = vst [vmem:[%s2638_s2 + $0x638] sm:$0xff] %v1340_v7  ;;  %v1344_v9 = vld [vmem:[%s2639_s1 + $0x300] sm:$0xff]  ;;  %v1346_v10 = vld [vmem:[%s2639_s1 + $0x308] sm:$0xff] }
  0x66   :  { %1343 = vst [vmem:[%s2638_s2 + $0x640] sm:$0xff] %v1342_v8  ;;  %v1348_v11 = vld [vmem:[%s2639_s1 + $0x310] sm:$0xff]  ;;  %1345 = vst [vmem:[%s2638_s2 + $0x648] sm:$0xff] %v1344_v9  ;;  %v1350_v12 = vld [vmem:[%s2639_s1 + $0x318] sm:$0xff] }
  0x67   :  { %1347 = vst [vmem:[%s2638_s2 + $0x650] sm:$0xff] %v1346_v10  ;;  %1349 = vst [vmem:[%s2638_s2 + $0x658] sm:$0xff] %v1348_v11  ;;  %v1352_v13 = vld [vmem:[%s2639_s1 + $0x320] sm:$0xff]  ;;  %v1354_v14 = vld [vmem:[%s2639_s1 + $0x328] sm:$0xff] }
  0x68   :  { %1351 = vst [vmem:[%s2638_s2 + $0x660] sm:$0xff] %v1350_v12  ;;  %1353 = vst [vmem:[%s2638_s2 + $0x668] sm:$0xff] %v1352_v13  ;;  %v1356_v15 = vld [vmem:[%s2639_s1 + $0x330] sm:$0xff]  ;;  %v1358_v16 = vld [vmem:[%s2639_s1 + $0x338] sm:$0xff] }
  0x69   :  { %1355 = vst [vmem:[%s2638_s2 + $0x670] sm:$0xff] %v1354_v14  ;;  %v1360_v17 = vld [vmem:[%s2639_s1 + $0x340] sm:$0xff]  ;;  %1357 = vst [vmem:[%s2638_s2 + $0x678] sm:$0xff] %v1356_v15 }
  0x6a   :  { %1359 = vst [vmem:[%s2638_s2 + $0x680] sm:$0xff] %v1358_v16  ;;  %1361 = vst [vmem:[%s2638_s2 + $0x688] sm:$0xff] %v1360_v17 }

// kernel: _complex_forward_planar.1
= control target key start
LH: loop header
LB: loop body
LE: loop exit
PB: predicated region body
PF: predicated region fallthrough
CT: control target
= control target key end

     0   :  { %s1778_s12 = smov 0   ;;  %s3248_s0 = inlined_call_operand.vmem [shape: f32[9,2048], index: 0, kind: input, shape index: {}]   ;;  %s3249_s1 = inlined_call_operand.vmem [shape: f32[9,2048], index: 1, kind: input, shape index: {}]   ;;  %s3250_s2 = inlined_call_operand.vmem [shape: f32[9,2048], index: 2, kind: output, shape index: {0}]   ;;  %s3251_s3 = inlined_call_operand.vmem [shape: f32[9,2048], index: 3, kind: output, shape index: {1}]  }
   0x1 LB: > { %s1580_s13 = sadd.s32 4294967295, %s1754_s12   ;;  %p1584_p0 = scmp.ge.s32.totalorder %s1754_s12, 1  ;;  %s1754_s12 = sphi %s1778_s12, %s14_s12  }
   0x2   : > { %p150_p1 = scmp.lt.s32.totalorder %s1754_s12, 3 }
   0x4   : > { %p151_p2 = pnand %p1584_p0, %p150_p1 }
   0x6   : > { %154 = sbr.rel (%p151_p2) target bundleno = 474 (0x1da), region = 28 }
   0xd   : > { %p184_p3 = scmp.lt.s32.totalorder %s1580_s13, 1 }
   0xf   : > { %s3547_s13 = smov (!%p184_p3, %s1580_s13), 1 }
  0x10   : > { %s1786_s14 = sshll.u32 %s3547_s13, 7 }
  0x11   : > { %s188_s17 = scalar_lea.vmem %s3248_s0, %s1786_s14  ;;  %s1796_s20 = scalar_lea.vmem %s3249_s1, %s1786_s14 }
  0x12   : > { %v204_v0 = vld [vmem:[%s188_s17] sm:$0xff]  ;;  %v205_v1 = vld [vmem:[%s188_s17 + $0x8] sm:$0xff]  ;;  %v206_v2 = vld [vmem:[%s188_s17 + $0x10] sm:$0xff]  ;;  %s1990_s23 = scalar_lea.vmem %s3250_s2, %s1786_s14  ;;  %s2363_s26 = scalar_lea.vmem %s3251_s3, %s1786_s14 }
  0x13   : > { %v207_v3 = vld [vmem:[%s188_s17 + $0x18] sm:$0xff]  ;;  %v208_v4 = vld [vmem:[%s188_s17 + $0x20] sm:$0xff]  ;;  %v209_v5 = vld [vmem:[%s188_s17 + $0x28] sm:$0xff]  ;;  %v1798_v12 = vadd.f32 1.0, %v204_v0  ;;  %v1800_v15 = vadd.f32 1.0, %v205_v1  ;;  %v1802_v16 = vadd.f32 1.0, %v206_v2 }
  0x14   : > { %v210_v6 = vld [vmem:[%s188_s17 + $0x30] sm:$0xff]  ;;  %v211_v7 = vld [vmem:[%s188_s17 + $0x38] sm:$0xff]  ;;  %v212_v8 = vld [vmem:[%s188_s17 + $0x40] sm:$0xff]  ;;  %v1804_v17 = vadd.f32 1.0, %v207_v3  ;;  %v1806_v18 = vadd.f32 1.0, %v208_v4  ;;  %v1808_v21 = vadd.f32 1.0, %v209_v5 }
  0x15   : > { %v213_v9 = vld [vmem:[%s188_s17 + $0x48] sm:$0xff]  ;;  %v214_v10 = vld [vmem:[%s188_s17 + $0x50] sm:$0xff]  ;;  %v215_v11 = vld [vmem:[%s188_s17 + $0x58] sm:$0xff]  ;;  %v1810_v22 = vadd.f32 1.0, %v210_v6  ;;  %v1812_v23 = vadd.f32 1.0, %v211_v7  ;;  %v1814_v24 = vadd.f32 1.0, %v212_v8  ;;  %v252_v29 = vmul.f32 %v1798_v12, %v1798_v12 }
  0x16   : > { %v216_v13 = vld [vmem:[%s188_s17 + $0x60] sm:$0xff]  ;;  %v217_v14 = vld [vmem:[%s188_s17 + $0x68] sm:$0xff]  ;;  %3360 = vst [vmem:[#allocation2_spill] sm:$0xff] %v1804_v17  ;;  %3361 = vst [vmem:[#allocation3_spill] sm:$0xff] %v1806_v18  ;;  %v1819_v26 = vadd.f32 1.0, %v213_v9  ;;  %v1821_v27 = vadd.f32 1.0, %v214_v10  ;;  %v253_v33 = vmul.f32 %v1800_v15, %v1800_v15  ;;  %v254_v38 = vmul.f32 %v1802_v16, %v1802_v16 }
  0x17   : > { %v218_v19 = vld [vmem:[%s188_s17 + $0x70] sm:$0xff]  ;;  %v219_v20 = vld [vmem:[%s188_s17 + $0x78] sm:$0xff]  ;;  %3362 = vst [vmem:[#allocation4_spill] sm:$0xff] %v1808_v21  ;;  %3363 = vst [vmem:[#allocation5_spill] sm:$0xff] %v1810_v22  ;;  %v1823_v28 = vadd.f32 1.0, %v215_v11  ;;  %v1830_v31 = vadd.f32 1.0, %v216_v13  ;;  %v255_v41 = vmul.f32 %v1804_v17, %v1804_v17  ;;  %v256_v42 = vmul.f32 %v1806_v18, %v1806_v18 }
  0x18   : > { %3364 = vst [vmem:[#allocation6_spill] sm:$0xff] %v1812_v23  ;;  %3365 = vst [vmem:[#allocation7_spill] sm:$0xff] %v1814_v24  ;;  %v1817_v25 = vld [vmem:[%s1796_s20] sm:$0xff]  ;;  %v1828_v30 = vld [vmem:[%s1796_s20 + $0x8] sm:$0xff]  ;;  %v1832_v32 = vadd.f32 1.0, %v217_v14  ;;  %v1841_v36 = vadd.f32 1.0, %v218_v19  ;;  %v257_v43 = vmul.f32 %v1808_v21, %v1808_v21  ;;  %v258_v46 = vmul.f32 %v1810_v22, %v1810_v22 }
  0x19   : > { %3366 = vst [vmem:[#allocation8_spill] sm:$0xff] %v1819_v26  ;;  %3367 = vst [vmem:[#allocation9_spill] sm:$0xff] %v1821_v27  ;;  %v268_v34 = vmul.f32 %v1817_v25, %v1817_v25  ;;  %v1839_v35 = vld [vmem:[%s1796_s20 + $0x10] sm:$0xff]  ;;  %v1843_v37 = vadd.f32 1.0, %v219_v20  ;;  %v269_v39 = vmul.f32 %v1828_v30, %v1828_v30  ;;  %v1850_v40 = vld [vmem:[%s1796_s20 + $0x18] sm:$0xff]  ;;  %v259_v47 = vmul.f32 %v1812_v23, %v1812_v23 }
  0x1a   : > { %3368 = vst [vmem:[#allocation10_spill] sm:$0xff] %v1823_v28  ;;  %3369 = vst [vmem:[#allocation11_spill] sm:$0xff] %v1830_v31  ;;  %v270_v44 = vmul.f32 %v1839_v35, %v1839_v35  ;;  %v1861_v45 = vld [vmem:[%s1796_s20 + $0x20] sm:$0xff]  ;;  %v260_v48 = vmul.f32 %v1814_v24, %v1814_v24  ;;  %v271_v49 = vmul.f32 %v1850_v40, %v1850_v40  ;;  %v1872_v50 = vld [vmem:[%s1796_s20 + $0x28] sm:$0xff]  ;;  %vm394_vm15 = vcmp.lt.s32.totalorder %v1798_v12, 0 }
  0x1b   : > { %3370 = vst [vmem:[#allocation12_spill] sm:$0xff] %v1832_v32  ;;  %3371 = vst [vmem:[#allocation13_spill] sm:$0xff] %v1841_v36  ;;  %v1875_v51 = vld [vmem:[%s1796_s20 + $0x30] sm:$0xff]  ;;  %v261_v52 = vmul.f32 %v1819_v26, %v1819_v26  ;;  %v262_v53 = vmul.f32 %v1821_v27, %v1821_v27  ;;  %v272_v54 = vmul.f32 %v1861_v45, %v1861_v45  ;;  %v1890_v60 = vld [vmem:[%s1796_s20 + $0x38] sm:$0xff] }
  0x1c   : > { %3372 = vst [vmem:[#allocation14_spill] sm:$0xff] %v1843_v37  ;;  %3373 = vst [vmem:[#allocation15_spill] sm:$0xff] %v1850_v40  ;;  %v284_v55 = vadd.f32 %v268_v34, %v252_v29  ;;  %v263_v56 = vmul.f32 %v1823_v28, %v1823_v28  ;;  %v273_v57 = vmul.f32 %v1872_v50, %v1872_v50  ;;  %v1893_v61 = vld [vmem:[%s1796_s20 + $0x40] sm:$0xff]  ;;  %v1902_v2 = vld [vmem:[%s1796_s20 + $0x48] sm:$0xff]  ;;  %v1932_v34 = vand.u32 2147483647, %v1817_v25 }
  0x1d   : > { %3374 = vst [vmem:[#allocation16_spill] sm:$0xff] %v1861_v45  ;;  %3375 = vst [vmem:[#allocation17_spill] sm:$0xff] %v1872_v50  ;;  %v274_v58 = vmul.f32 %v1875_v51, %v1875_v51  ;;  %v285_v59 = vadd.f32 %v269_v39, %v253_v33  ;;  %v264_v62 = vmul.f32 %v1830_v31, %v1830_v31  ;;  %v1905_v3 = vld [vmem:[%s1796_s20 + $0x50] sm:$0xff]  ;;  %v1914_v8 = vld [vmem:[%s1796_s20 + $0x58] sm:$0xff]  ;;  %v1929_v33 = vand.u32 2147483647, %v1798_v12 }
  0x1e   : > { %3376 = vst [vmem:[#allocation18_spill] sm:$0xff] %v1875_v51  ;;  %3377 = vst [vmem:[#allocation19_spill] sm:$0xff] %v1890_v60  ;;  %v265_v63 = vmul.f32 %v1832_v32, %v1832_v32  ;;  %v266_v0 = vmul.f32 %v1841_v36, %v1841_v36  ;;  %v286_v1 = vadd.f32 %v270_v44, %v254_v38  ;;  %1611 = vlog2.f32 %v284_v55  ;;  %v1923_v20 = vld [vmem:[%s1796_s20 + $0x60] sm:$0xff]  ;;  %v1926_v29 = vld [vmem:[%s1796_s20 + $0x68] sm:$0xff] }
  0x1f   : > { %3378 = vst [vmem:[#allocation20_spill] sm:$0xff] %v1893_v61  ;;  %3379 = vst [vmem:[#allocation21_spill] sm:$0xff] %v1902_v2  ;;  %v267_v4 = vmul.f32 %v1843_v37, %v1843_v37  ;;  %v275_v5 = vmul.f32 %v1890_v60, %v1890_v60  ;;  %v276_v6 = vmul.f32 %v1893_v61, %v1893_v61  ;;  %1613 = vlog2.f32 %v285_v59  ;;  %v1937_v38 = vld [vmem:[%s1796_s20 + $0x70] sm:$0xff] }
  0x20   : > { %3380 = vst [vmem:[#allocation22_spill] sm:$0xff] %v1905_v3  ;;  %v287_v7 = vadd.f32 %v271_v49, %v255_v41  ;;  %3381 = vst [vmem:[#allocation23_spill] sm:$0xff] %v1914_v8  ;;  %v277_v9 = vmul.f32 %v1902_v2, %v1902_v2  ;;  %v278_v10 = vmul.f32 %v1905_v3, %v1905_v3  ;;  %1615 = vlog2.f32 %v286_v1 }
  0x21   : > { %v288_v11 = vadd.f32 %v272_v54, %v256_v42  ;;  %v279_v13 = vmul.f32 %v1914_v8, %v1914_v8  ;;  %v289_v14 = vadd.f32 %v273_v57, %v257_v43  ;;  %v290_v19 = vadd.f32 %v274_v58, %v258_v46  ;;  %3382 = vst [vmem:[#allocation24_spill] sm:$0xff] %v1923_v20  ;;  %v1944_v43 = vld [vmem:[%s1796_s20 + $0x78] sm:$0xff] }
  0x22   : > { %3383 = vst [vmem:[#allocation25_spill] sm:$0xff] %v1926_v29  ;;  %vm398_vm0 = vcmp.ne.f32.partialorder %v1798_v12, %v1798_v12  ;;  %3384 = vst [vmem:[#allocation26_spill] sm:$0xff] %v1937_v38  ;;  %v280_v39 = vmul.f32 %v1923_v20, %v1923_v20  ;;  %v281_v41 = vmul.f32 %v1926_v29, %v1926_v29  ;;  %1617 = vlog2.f32 %v287_v7 }
  0x23   : > { %v291_v42 = vadd.f32 %v275_v5, %v259_v47  ;;  %3385 = vst [vmem:[#allocation27_spill] sm:$0xff] %v1944_v43  ;;  %v282_v44 = vmul.f32 %v1937_v38, %v1937_v38  ;;  %v292_v46 = vadd.f32 %v276_v6, %v260_v48  ;;  %1619 = vlog2.f32 %v288_v11 }
  0x24   : > { %vm399_vm1 = vcmp.ne.f32.partialorder %v1817_v25, %v1817_v25  ;;  %v283_v49 = vmul.f32 %v1944_v43, %v1944_v43  ;;  %v293_v54 = vadd.f32 %v277_v9, %v261_v52  ;;  %1621 = vlog2.f32 %v289_v14 }
  0x25   : > { %vm1952_vm2 = vmor %vm398_vm0, %vm399_vm1  ;;  %v1957_v47 = vand.u32 2147483647, %v1800_v15  ;;  %v294_v57 = vadd.f32 %v278_v10, %v262_v53  ;;  %1623 = vlog2.f32 %v290_v19  ;;  %v1961_v48 = vmax.f32 %v1929_v33, %v1932_v34 }
  0x26   : > { %v1964_v58 = vand.u32 2147483647, %v1828_v30  ;;  %v295_v59 = vadd.f32 %v279_v13, %v263_v56  ;;  %1625 = vlog2.f32 %v291_v42  ;;  %vm445_vm3 = vcmp.ne.f32.partialorder %v1800_v15, %v1800_v15 }
  0x27   : > { %3388 = vst [vmem:[#allocation28_spill] sm:$0xff] %v1961_v48  ;;  %v296_v52 = vadd.f32 %v280_v39, %v264_v62  ;;  %1627 = vlog2.f32 %v292_v46  ;;  %v297_v53 = vadd.f32 %v281_v41, %v265_v63  ;;  %vm446_vm4 = vcmp.ne.f32.partialorder %v1828_v30, %v1828_v30 }
  0x28   : > { %v1970_v1 = vmax.f32 %v1957_v47, %v1964_v58  ;;  %1629 = vlog2.f32 %v293_v54  ;;  %v1612_v5 = vpop.eup %1611  ;;  %v298_v6 = vadd.f32 %v282_v44, %v266_v0  ;;  %v299_v7 = vadd.f32 %v283_v49, %v267_v4  ;;  %vm1976_vm5 = vmor %vm445_vm3, %vm446_vm4 }
  0x29   : > { %1631 = vlog2.f32 %v294_v57  ;;  %v1614_v9 = vpop.eup %1613  ;;  %v301_v10 = vmul.f32 0.6931472, %v1612_v5  ;;  %v1981_v63 = vand.u32 2147483647, %v1802_v16  ;;  %v1984_v11 = vand.u32 2147483647, %v1839_v35 }
  0x2a   : > { %3389 = vst [vmem:[#allocation29_spill] sm:$0xff] %v1970_v1  ;;  %v1180_v56 = vmax.f32 %v1961_v48, %v1970_v1  ;;  %1633 = vlog2.f32 %v295_v59  ;;  %v1616_v13 = vpop.eup %1615  ;;  %v303_v0 = vmul.f32 0.6931472, %v1614_v9  ;;  %vm492_vm6 = vcmp.ne.f32.partialorder %v1802_v16, %v1802_v16 }
  0x2b   : > { %1635 = vlog2.f32 %v296_v52  ;;  %v305_v14 = vmul.f32 0.6931472, %v1616_v13  ;;  %v332_v19 = vmul.f32 0.5, %v301_v10  ;;  %v1994_v44 = vmax.f32 %v1981_v63, %v1984_v11 }
  0x2c   : > { %v1618_v4 = vpop.eup %1617  ;;  %1637 = vlog2.f32 %v297_v53  ;;  %v333_v42 = vmul.f32 0.5, %v303_v0  ;;  %vm493_vm7 = vcmp.ne.f32.partialorder %v1839_v35, %v1839_v35  ;;  %vm539_vm9 = vcmp.ne.f32.partialorder %v1804_v17, %v1804_v17 }
  0x2d   : > { %v1620_v39 = vpop.eup %1619  ;;  %v307_v41 = vmul.f32 0.6931472, %v1618_v4  ;;  %1639 = vlog2.f32 %v298_v6  ;;  %3392 = vst [vmem:[#allocation30_spill] sm:$0xff] %v1994_v44  ;;  %v334_v54 = vmul.f32 0.5, %v305_v14  ;;  %348 = vst [vmem:[%s1990_s23] sm:$0xff] %v332_v19  ;;  %v2000_v53 = vmax.f32 %v1994_v44, %v1180_v56 }
  0x2e   : > { %v1622_v46 = vpop.eup %1621  ;;  %v309_v49 = vmul.f32 0.6931472, %v1620_v39  ;;  %1641 = vlog2.f32 %v299_v7  ;;  %349 = vst [vmem:[%s1990_s23 + $0x8] sm:$0xff] %v333_v42  ;;  %vm2012_vm8 = vmor %vm492_vm6, %vm493_vm7  ;;  %vm540_vm10 = vcmp.ne.f32.partialorder %v1850_v40, %v1850_v40  ;;  %vm586_vm12 = vcmp.ne.f32.partialorder %v1806_v18, %v1806_v18 }
  0x2f   : > { %v1624_v57 = vpop.eup %1623  ;;  %v311_v59 = vmul.f32 0.6931472, %v1622_v46  ;;  %v335_v52 = vmul.f32 0.5, %v307_v41  ;;  %1643 = vrcp.f32 %v1961_v48  ;;  %350 = vst [vmem:[%s1990_s23 + $0x10] sm:$0xff] %v334_v54  ;;  %vm2070_vm11 = vmor %vm539_vm9, %vm540_vm10  ;;  %vm587_vm13 = vcmp.ne.f32.partialorder %v1861_v45, %v1861_v45 }
  0x30   : > { %v1626_v5 = vpop.eup %1625  ;;  %v313_v6 = vmul.f32 0.6931472, %v1624_v57  ;;  %v336_v9 = vmul.f32 0.5, %v309_v49  ;;  %1645 = vrcp.f32 %v1970_v1  ;;  %vm2108_vm14 = vmor %vm586_vm12, %vm587_vm13  ;;  %v3402_v1 = vmov 0 }
  0x31   : > { %v1628_v7 = vpop.eup %1627  ;;  %v315_v10 = vmul.f32 0.6931472, %v1626_v5  ;;  %v337_v13 = vmul.f32 0.5, %v311_v59  ;;  %351 = vst [vmem:[%s1990_s23 + $0x18] sm:$0xff] %v335_v52  ;;  %1647 = vrcp.f32 %v1994_v44  ;;  %v2019_v52 = vand.u32 2147483647, %v1804_v17 }
  0x32   : > { %v1630_v0 = vpop.eup %1629  ;;  %v317_v4 = vmul.f32 0.6931472, %v1628_v7  ;;  %v338_v14 = vmul.f32 0.5, %v313_v6  ;;  %352 = vst [vmem:[%s1990_s23 + $0x20] sm:$0xff] %v336_v9  ;;  %v366_v7 = vmin.f32 %v1929_v33, %v1932_v34  ;;  %v3403_v1 = vsel %vm2108_vm14, 4294967295, %v3402_v1 }
  0x33   : > { %v1632_v56 = vpop.eup %1631  ;;  %v319_v19 = vmul.f32 0.6931472, %v1630_v0  ;;  %v339_v39 = vmul.f32 0.5, %v315_v10  ;;  %353 = vst [vmem:[%s1990_s23 + $0x28] sm:$0xff] %v337_v13  ;;  %v2025_v10 = vand.u32 2147483647, %v1850_v40  ;;  %vm633_vm1 = vcmp.ne.f32.partialorder %v1808_v21, %v1808_v21 }
  0x34   : > { %v1634_v42 = vpop.eup %1633  ;;  %v321_v46 = vmul.f32 0.6931472, %v1632_v56  ;;  %v340_v49 = vmul.f32 0.5, %v317_v4  ;;  %354 = vst [vmem:[%s1990_s23 + $0x30] sm:$0xff] %v338_v14  ;;  %v413_v14 = vmin.f32 %v1957_v47, %v1964_v58  ;;  %3404 = vst [vmem:[#allocation36_spill] sm:$0xff] %v3403_v1  ;;  %vm391_vm0 = vcmp.lt.f32.partialorder %v1798_v12, 0.0 }
  0x35   : > { %v1636_v54 = vpop.eup %1635  ;;  %v323_v57 = vmul.f32 0.6931472, %v1634_v42  ;;  %v341_v59 = vmul.f32 0.5, %v319_v19  ;;  %355 = vst [vmem:[%s1990_s23 + $0x38] sm:$0xff] %v339_v39  ;;  %v460_v42 = vmin.f32 %v1981_v63, %v1984_v11  ;;  %v507_v29 = vmin.f32 %v2019_v52, %v2025_v10 }
  0x36   : > { %v1638_v5 = vpop.eup %1637  ;;  %v325_v6 = vmul.f32 0.6931472, %v1636_v54  ;;  %v342_v9 = vmul.f32 0.5, %v321_v46  ;;  %356 = vst [vmem:[%s1990_s23 + $0x40] sm:$0xff] %v340_v49  ;;  %v2035_v46 = vmax.f32 %v2019_v52, %v2025_v10  ;;  %v2116_v48 = vand.u32 2147483647, %v1808_v21 }
  0x37   : > { %v1640_v13 = vpop.eup %1639  ;;  %v327_v0 = vmul.f32 0.6931472, %v1638_v5  ;;  %v343_v4 = vmul.f32 0.5, %v323_v57  ;;  %357 = vst [vmem:[%s1990_s23 + $0x48] sm:$0xff] %v341_v59  ;;  %v3284_v32 = vmov 0.0   ;;  %vm634_vm3 = vcmp.ne.f32.partialorder %v1872_v50, %v1872_v50 }
  0x38   : > { %v1642_v56 = vpop.eup %1641  ;;  %v329_v19 = vmul.f32 0.6931472, %v1640_v13  ;;  %v344_v39 = vmul.f32 0.5, %v325_v6  ;;  %358 = vst [vmem:[%s1990_s23 + $0x50] sm:$0xff] %v342_v9  ;;  %3395 = vst [vmem:[#allocation31_spill] sm:$0xff] %v2035_v46  ;;  %v1182_v9 = vmax.f32 %v2035_v46, %v2000_v53  ;;  %1649 = vrcp.f32 %v2035_v46 }
  0x39   : > { %v2037_v49 = vpop.eup %1643  ;;  %v331_v54 = vmul.f32 0.6931472, %v1642_v56  ;;  %v345_v57 = vmul.f32 0.5, %v327_v0  ;;  %359 = vst [vmem:[%s1990_s23 + $0x58] sm:$0xff] %v343_v4  ;;  %3406 = vst [vmem:[#allocation38_spill] sm:$0xff] %v2116_v48  ;;  %vm441_vm6 = vcmp.lt.s32.totalorder %v1800_v15, 0  ;;  %vm388_vm12 = vcmp.gt.f32.partialorder %v1932_v34, %v1929_v33 }
  0x3a   : > { %3396 = vst [vmem:[#allocation32_spill] sm:$0xff] %v2037_v49  ;;  %v2042_v59 = vpop.eup %1645  ;;  %v346_v5 = vmul.f32 0.5, %v329_v19  ;;  %360 = vst [vmem:[%s1990_s23 + $0x60] sm:$0xff] %v344_v39  ;;  %v2046_v6 = vmul.f32 %v2037_v49, %v366_v7  ;;  %v2080_v19 = vand.u32 2147483647, %v1806_v18  ;;  %vm3322_vm7 = vcmp.lt.f32.partialorder %v1800_v15, 0.0 }
  0x3b   : > { %3397 = vst [vmem:[#allocation33_spill] sm:$0xff] %v2042_v59  ;;  %v2051_v13 = vpop.eup %1647  ;;  %v347_v0 = vmul.f32 0.5, %v331_v54  ;;  %361 = vst [vmem:[%s1990_s23 + $0x68] sm:$0xff] %v345_v57  ;;  %v2055_v4 = vmul.f32 %v2042_v59, %v413_v14  ;;  %v2083_v39 = vand.u32 2147483647, %v1861_v45  ;;  %vm488_vm9 = vcmp.lt.s32.totalorder %v1802_v16, 0 }
  0x3c   : > { %3398 = vst [vmem:[#allocation34_spill] sm:$0xff] %v2051_v13  ;;  %362 = vst [vmem:[%s1990_s23 + $0x70] sm:$0xff] %v346_v5  ;;  %v2062_v7 = vmul.f32 %v2046_v6, %v2046_v6  ;;  %v2065_v56 = vmul.f32 %v2051_v13, %v460_v42  ;;  %v2171_v20 = vand.u32 2147483647, %v1810_v22  ;;  %vm3321_vm10 = vcmp.lt.f32.partialorder %v1802_v16, 0.0 }
  0x3d   : > { %363 = vst [vmem:[%s1990_s23 + $0x78] sm:$0xff] %v347_v0  ;;  %v2077_v14 = vmul.f32 %v2055_v4, %v2055_v4  ;;  %v2093_v5 = vmax.f32 %v2080_v19, %v2083_v39  ;;  %vm2160_vm4 = vmor %vm633_vm1, %vm634_vm3  ;;  %vm435_vm13 = vcmp.gt.f32.partialorder %v1964_v58, %v1957_v47  ;;  %vm3428_vm3 = vcmp.lt.f32.partialorder %v1800_v15, 0.0 }
  0x3e   : > { %v371_v42 = vmul.f32 0.002785687, %v2062_v7  ;;  %v2088_v54 = vmul.f32 %v2065_v56, %v2065_v56  ;;  %3413 = vst [vmem:[#allocation43_spill] sm:$0xff] %v2171_v20  ;;  %vm537_vm1 = vcmp.eq.f32.partialorder %v1850_v40, 0.0 }
  0x3f   : > { %v418_v57 = vmul.f32 0.002785687, %v2077_v14  ;;  %3401 = vst [vmem:[#allocation35_spill] sm:$0xff] %v2093_v5  ;;  %v2101_v46 = vmax.f32 %v2093_v5, %v1182_v9  ;;  %1651 = vrcp.f32 %v2093_v5 }
  0x40   : > { %v372_v0 = vadd.f32 -0.015866, %v371_v42  ;;  %v465_v43 = vmul.f32 0.002785687, %v2088_v54 }
  0x41   : > { %v419_v38 = vadd.f32 -0.015866, %v418_v57 }
  0x42   : > { %v373_v44 = vmul.f32 %v372_v0, %v2062_v7  ;;  %v466_v13 = vadd.f32 -0.015866, %v465_v43  ;;  %v2112_v57 = vpop.eup %1649  ;;  %v2119_v0 = vand.u32 2147483647, %v1872_v50  ;;  %v3418_v50 = vmov 0.7853982  }
  0x43   : > { %v420_v42 = vmul.f32 %v419_v38, %v2077_v14  ;;  %3405 = vst [vmem:[#allocation37_spill] sm:$0xff] %v2112_v57  ;;  %v2122_v5 = vmul.f32 %v2112_v57, %v507_v29  ;;  %v2207_v26 = vsel %vm3322_vm7, 2.3561945, %v3418_v50  ;;  %vm452_vm7 = vcmp.eq.s32.totalorder %v1964_v58, inf }
  0x44   : > { %v374_v59 = vadd.f32 0.04247222, %v373_v44  ;;  %v467_v9 = vmul.f32 %v466_v13, %v2088_v54  ;;  %3407 = vst [vmem:[#allocation39_spill] sm:$0xff] %v2119_v0  ;;  %v2127_v37 = vmax.f32 %v2116_v48, %v2119_v0 }
  0x45   : > { %v421_v43 = vadd.f32 0.04247222, %v420_v42  ;;  %v2133_v13 = vmul.f32 %v2122_v5, %v2122_v5  ;;  %v554_v42 = vmin.f32 %v2080_v19, %v2083_v39 }
  0x46   : > { %v375_v38 = vmul.f32 %v374_v59, %v2062_v7  ;;  %v468_v49 = vadd.f32 0.04247222, %v467_v9  ;;  %3408 = vst [vmem:[#allocation40_spill] sm:$0xff] %v2127_v37  ;;  %v1184_v59 = vmax.f32 %v2127_v37, %v2101_v46  ;;  %1653 = vrcp.f32 %v2127_v37 }
  0x47   : > { %v422_v44 = vmul.f32 %v421_v43, %v2077_v14  ;;  %v512_v43 = vmul.f32 0.002785687, %v2133_v13  ;;  %v3290_v37 = vmov 0.7853982  }
  0x48   : > { %v376_v29 = vadd.f32 -0.074975304, %v375_v38  ;;  %v469_v57 = vmul.f32 %v468_v49, %v2088_v54  ;;  %v2147_v38 = vsel %vm394_vm15, 3.1415927, %v3284_v32  ;;  %v3410_v32 = vmov 0 }
  0x49   : > { %v423_v9 = vadd.f32 -0.074975304, %v422_v44  ;;  %v2151_v46 = vpop.eup %1651  ;;  %v2156_v44 = vsel %vm391_vm0, 2.3561945, %v3290_v37  ;;  %v513_v31 = vadd.f32 -0.015866, %v512_v43  ;;  %vm482_vm15 = vcmp.gt.f32.partialorder %v1984_v11, %v1981_v63 }
  0x4a   : > { %v377_v36 = vmul.f32 %v376_v29, %v2062_v7  ;;  %v470_v49 = vadd.f32 -0.074975304, %v469_v57  ;;  %3409 = vst [vmem:[#allocation41_spill] sm:$0xff] %v2151_v46  ;;  %v3411_v32 = vsel %vm2160_vm4, 4294967295, %v3410_v32  ;;  %v2167_v28 = vmul.f32 %v2151_v46, %v554_v42 }
  0x4b   : > { %v424_v29 = vmul.f32 %v423_v9, %v2077_v14  ;;  %3412 = vst [vmem:[#allocation42_spill] sm:$0xff] %v3411_v32  ;;  %v514_v37 = vmul.f32 %v513_v31, %v2133_v13  ;;  %v2174_v9 = vand.u32 2147483647, %v1875_v51  ;;  %v601_v31 = vmin.f32 %v2116_v48, %v2119_v0 }
  0x4c   : > { %v378_v57 = vadd.f32 0.1064488, %v377_v36  ;;  %v471_v8 = vmul.f32 %v470_v49, %v2088_v54  ;;  %v2180_v49 = vmul.f32 %v2167_v28, %v2167_v28  ;;  %v3416_v51 = vmov 0.0  }
  0x4d   : > { %v425_v3 = vadd.f32 0.1064488, %v424_v29  ;;  %3414 = vst [vmem:[#allocation44_spill] sm:$0xff] %v2174_v9  ;;  %v515_v29 = vadd.f32 0.04247222, %v514_v37  ;;  %v2187_v46 = vmax.f32 %v2171_v20, %v2174_v9 }
  0x4e   : > { %v379_v43 = vmul.f32 %v378_v57, %v2062_v7  ;;  %v472_v36 = vadd.f32 0.1064488, %v471_v8  ;;  %v2192_v57 = vsel %vm441_vm6, 3.1415927, %v3416_v51  ;;  %v559_v32 = vmul.f32 0.002785687, %v2180_v49 }
  0x4f   : > { %v426_v42 = vmul.f32 %v425_v3, %v2077_v14  ;;  %3415 = vst [vmem:[#allocation45_spill] sm:$0xff] %v2187_v46  ;;  %v516_v37 = vmul.f32 %v515_v29, %v2133_v13  ;;  %v2198_v3 = vmax.f32 %v2187_v46, %v1184_v59  ;;  %1655 = vrcp.f32 %v2187_v46 }
  0x50   : > { %v380_v27 = vadd.f32 -0.14207031, %v379_v43  ;;  %v473_v8 = vmul.f32 %v472_v36, %v2088_v54  ;;  %v2201_v2 = vpop.eup %1653  ;;  %v560_v0 = vadd.f32 -0.015866, %v559_v32  ;;  %vm535_vm6 = vcmp.lt.s32.totalorder %v1804_v17, 0 }
  0x51   : > { %v427_v22 = vadd.f32 -0.14207031, %v426_v42  ;;  %3417 = vst [vmem:[#allocation46_spill] sm:$0xff] %v2201_v2  ;;  %v517_v29 = vadd.f32 -0.074975304, %v516_v37  ;;  %v2212_v59 = vmul.f32 %v2201_v2, %v601_v31 }
  0x52   : > { %v381_v43 = vmul.f32 %v380_v27, %v2062_v7  ;;  %v474_v36 = vadd.f32 -0.14207031, %v473_v8  ;;  %v561_v21 = vmul.f32 %v560_v0, %v2180_v49  ;;  %v2225_v37 = vsel %vm488_vm9, 3.1415927, %v3416_v51 }
  0x53   : > { %v428_v42 = vmul.f32 %v427_v22, %v2077_v14  ;;  %3419 = vst [vmem:[#allocation47_spill] sm:$0xff] %v2212_v59  ;;  %v518_v32 = vmul.f32 %v517_v29, %v2133_v13  ;;  %v2221_v22 = vmul.f32 %v2212_v59, %v2212_v59  ;;  %vm3433_vm9 = vcmp.eq.s32.totalorder %v1981_v63, inf }
  0x54   : > { %v382_v46 = vadd.f32 0.19993454, %v381_v43  ;;  %v475_v27 = vmul.f32 %v474_v36, %v2088_v54  ;;  %v562_v43 = vadd.f32 0.04247222, %v561_v21  ;;  %v2233_v36 = vsel %vm3321_vm10, 2.3561945, %v3418_v50 }
  0x55   : > { %v429_v1 = vadd.f32 0.19993454, %v428_v42  ;;  %v519_v42 = vadd.f32 0.1064488, %v518_v32  ;;  %v606_v29 = vmul.f32 0.002785687, %v2221_v22 }
  0x56   : > { %v383_v8 = vmul.f32 %v382_v46, %v2062_v7  ;;  %v476_v31 = vadd.f32 0.19993454, %v475_v27  ;;  %v563_v21 = vmul.f32 %v562_v43, %v2180_v49  ;;  %v648_v27 = vmin.f32 %v2171_v20, %v2174_v9 }
  0x57   : > { %v430_v0 = vmul.f32 %v429_v1, %v2077_v14  ;;  %v520_v32 = vmul.f32 %v519_v42, %v2133_v13  ;;  %v607_v59 = vadd.f32 -0.015866, %v606_v29  ;;  %vm3430_vm10 = vcmp.eq.f32.partialorder %v1828_v30, 0.0 }
  0x58   : > { %v384_v48 = vadd.f32 -0.33333147, %v383_v8  ;;  %v477_v46 = vmul.f32 %v476_v31, %v2088_v54  ;;  %v564_v43 = vadd.f32 -0.074975304, %v563_v21 }
  0x59   : > { %v431_v1 = vadd.f32 -0.33333147, %v430_v0  ;;  %v2250_v9 = vpop.eup %1655  ;;  %v521_v42 = vadd.f32 -0.14207031, %v520_v32 }
  0x5a   : > { %v385_v8 = vmul.f32 %v384_v48, %v2062_v7  ;;  %v478_v31 = vadd.f32 -0.33333147, %v477_v46  ;;  %3420 = vst [vmem:[#allocation48_spill] sm:$0xff] %v2250_v9  ;;  %v608_v48 = vmul.f32 %v607_v59, %v2221_v22  ;;  %v2258_v7 = vand.u32 2147483647, %v1812_v23 }
  0x5b   : > { %v432_v0 = vmul.f32 %v431_v1, %v2077_v14  ;;  %v565_v14 = vmul.f32 %v564_v43, %v2180_v49  ;;  %v2267_v21 = vmul.f32 %v2250_v9, %v648_v27  ;;  %v522_v1 = vmul.f32 %v521_v42, %v2133_v13 }
  0x5c   : > { %v386_v29 = vmul.f32 %v385_v8, %v2046_v6  ;;  %v479_v46 = vmul.f32 %v478_v31, %v2088_v54  ;;  %v609_v32 = vadd.f32 0.04247222, %v608_v48  ;;  %v2273_v8 = vand.u32 2147483647, %v1890_v60 }
  0x5d   : > { %3421 = vst [vmem:[#allocation49_spill] sm:$0xff] %v2267_v21  ;;  %v433_v59 = vmul.f32 %v432_v0, %v2055_v4  ;;  %v566_v2 = vadd.f32 0.1064488, %v565_v14  ;;  %v2279_v43 = vmul.f32 %v2267_v21, %v2267_v21  ;;  %v523_v0 = vadd.f32 0.19993454, %v522_v1 }
  0x5e   : > { %v387_v54 = vadd.f32 %v386_v29, %v2046_v6  ;;  %v480_v31 = vmul.f32 %v479_v46, %v2065_v56  ;;  %v2285_v42 = vsel %vm535_vm6, 3.1415927, %v3416_v51  ;;  %v610_v48 = vmul.f32 %v609_v32, %v2221_v22 }
  0x5f   : > { %v434_v27 = vadd.f32 %v433_v59, %v2055_v4  ;;  %v567_v29 = vmul.f32 %v566_v2, %v2180_v49  ;;  %v653_v46 = vmul.f32 0.002785687, %v2279_v43  ;;  %v524_v9 = vmul.f32 %v523_v0, %v2133_v13 }
  0x60   : > { %v389_v60 = vsub.f32 1.5707964, %v387_v54  ;;  %v481_v6 = vadd.f32 %v480_v31, %v2065_v56  ;;  %v611_v23 = vadd.f32 -0.074975304, %v610_v48  ;;  %v2294_v4 = vmax.f32 %v2258_v7, %v2273_v8 }
  0x61   : > { %v436_v14 = vsub.f32 1.5707964, %v434_v27  ;;  %v568_v56 = vadd.f32 -0.14207031, %v567_v29  ;;  %v654_v2 = vadd.f32 -0.015866, %v653_v46  ;;  %v695_v53 = vmin.f32 %v2258_v7, %v2273_v8 }
  0x62   : > { %3422 = vst [vmem:[#allocation50_spill] sm:$0xff] %v2294_v4  ;;  %v390_v59 = vsel %vm388_vm12, %v389_v60, %v387_v54  ;;  %v483_v1 = vsub.f32 1.5707964, %v481_v6  ;;  %v525_v0 = vadd.f32 -0.33333147, %v524_v9  ;;  %v612_v48 = vmul.f32 %v611_v23, %v2221_v22 }
  0x63   : > { %v392_v32 = vsub.f32 3.1415927, %v390_v59  ;;  %v437_v31 = vsel %vm435_vm13, %v436_v14, %v434_v27  ;;  %v569_v60 = vmul.f32 %v568_v56, %v2180_v49  ;;  %v655_v54 = vmul.f32 %v654_v2, %v2279_v43 }
  0x64   : > { %v439_v20 = vsub.f32 3.1415927, %v437_v31  ;;  %v484_v21 = vsel %vm482_vm15, %v483_v1, %v481_v6  ;;  %vm3423_vm12 = vcmp.eq.s32.totalorder %v1932_v34, inf  ;;  %vm3424_vm6 = vcmp.eq.s32.totalorder %v1929_v33, inf }
  0x65   : > { %v393_v29 = vsel %vm391_vm0, %v392_v32, %v390_v59  ;;  %vm2316_vm13 = vmand %vm3424_vm6, %vm3423_vm12  ;;  %v486_v23 = vsub.f32 3.1415927, %v484_v21  ;;  %v526_v27 = vmul.f32 %v525_v0, %v2133_v13  ;;  %vm532_vm15 = vcmp.lt.f32.partialorder %v1804_v17, 0.0 }
  0x66   : > { %v613_v6 = vadd.f32 0.1064488, %v612_v48  ;;  %vm3427_vm0 = vcmp.eq.f32.partialorder %v1817_v25, 0.0  ;;  %v440_v33 = vsel %vm3428_vm3, %v439_v20, %v437_v31  ;;  %vm3429_vm6 = vcmp.eq.s32.totalorder %v1957_v47, inf }
  0x67   : > { %v397_v34 = vsel %vm3427_vm0, %v2147_v38, %v393_v29  ;;  %vm453_vm12 = vmand %vm3429_vm6, %vm452_vm7  ;;  %v570_v13 = vadd.f32 0.19993454, %v569_v60  ;;  %v656_v46 = vadd.f32 0.04247222, %v655_v54  ;;  %v444_v38 = vsel %vm3430_vm10, %v2192_v57, %v440_v33 }
  0x68   : > { %v401_v14 = vsel %vm1952_vm2, nan, %v397_v34  ;;  %vm3431_vm0 = vcmp.lt.f32.partialorder %v1802_v16, 0.0  ;;  %vm3432_vm3 = vcmp.eq.s32.totalorder %v1984_v11, inf  ;;  %v527_v47 = vmul.f32 %v526_v27, %v2122_v5 }
  0x69   : > { %v487_v20 = vsel %vm3431_vm0, %v486_v23, %v484_v21  ;;  %vm500_vm7 = vmand %vm3433_vm9, %vm3432_vm3  ;;  %v407_v58 = vsel %vm2316_vm13, %v2156_v44, %v401_v14  ;;  %v448_v55 = vsel %vm1976_vm5, nan, %v444_v38  ;;  %vm3434_vm2 = vcmp.eq.f32.partialorder %v1839_v35, 0.0 }
  0x6a   : > { %v491_v57 = vsel %vm3434_vm2, %v2225_v37, %v487_v20  ;;  %v571_v21 = vmul.f32 %v570_v13, %v2180_v49  ;;  %v408_v59 = vand.u32 2147483647, %v407_v58  ;;  %v454_v11 = vsel %vm453_vm12, %v2207_v26, %v448_v55 }
  0x6b   : > { %v495_v63 = vsel %vm2012_vm8, nan, %v491_v57  ;;  %v528_v1 = vadd.f32 %v527_v47, %v2122_v5  ;;  %v455_v62 = vand.u32 2147483647, %v454_v11  ;;  %v614_v56 = vmul.f32 %v613_v6, %v2221_v22 }
  0x6c   : > { %v501_v44 = vsel %vm500_vm7, %v2233_v36, %v495_v63  ;;  %v572_v37 = vadd.f32 -0.33333147, %v571_v21  ;;  %v3435_v2 = vand.u32 2147483648, %v1817_v25  ;;  %v657_v5 = vmul.f32 %v656_v46, %v2279_v43 }
  0x6d   : > { %v502_v32 = vand.u32 2147483647, %v501_v44  ;;  %v530_v41 = vsub.f32 1.5707964, %v528_v1  ;;  %v3436_v31 = vand.u32 2147483648, %v1828_v30  ;;  %v1186_v36 = vmax.f32 %v2294_v4, %v2198_v3 }
  0x6e   : > { %v410_v26 = vor.u32 %v3435_v2, %v408_v59  ;;  %v573_v48 = vmul.f32 %v572_v37, %v2180_v49  ;;  %v615_v60 = vadd.f32 -0.14207031, %v614_v56  ;;  %v3437_v54 = vand.u32 2147483648, %v1839_v35 }
  0x6f   : > { %v457_v0 = vor.u32 %v3436_v31, %v455_v62  ;;  %vm3438_vm5 = vcmp.gt.f32.partialorder %v2025_v10, %v2019_v52  ;;  %v658_v23 = vadd.f32 -0.074975304, %v657_v5  ;;  %1657 = vrcp.f32 %v2294_v4 }
  0x70   : > { %v504_v29 = vor.u32 %v3437_v54, %v502_v32  ;;  %v531_v9 = vsel %vm3438_vm5, %v530_v41, %v528_v1  ;;  %1116 = vst [vmem:[%s2363_s26] sm:$0xff] %v410_v26  ;;  %v574_v6 = vmul.f32 %v573_v48, %v2167_v28  ;;  %vm582_vm8 = vcmp.lt.s32.totalorder %v1806_v18, 0  ;;  %v3442_v41 = vld [vmem:[#allocation47_spill] sm:$0xff] }
  0x71   : > { %v533_v27 = vsub.f32 3.1415927, %v531_v9  ;;  %v616_v49 = vmul.f32 %v615_v60, %v2221_v22  ;;  %1117 = vst [vmem:[%s2363_s26 + $0x8] sm:$0xff] %v457_v0  ;;  %v544_v34 = vsel %vm532_vm15, 2.3561945, %v3418_v50  ;;  %v550_v33 = vand.u32 2147483648, %v1850_v40 }
  0x72   : > { %v659_v13 = vmul.f32 %v658_v23, %v2279_v43  ;;  %1118 = vst [vmem:[%s2363_s26 + $0x10] sm:$0xff] %v504_v29  ;;  %vm3439_vm10 = vcmp.eq.s32.totalorder %v2025_v10, inf  ;;  %vm3440_vm9 = vcmp.eq.s32.totalorder %v2019_v52, inf  ;;  %v575_v14 = vadd.f32 %v574_v6, %v2167_v28  ;;  %v3446_v6 = vld [vmem:[#allocation38_spill] sm:$0xff] }
  0x73   : > { %v534_v46 = vsel %vm532_vm15, %v533_v27, %v531_v9  ;;  %vm547_vm13 = vmand %vm3440_vm9, %vm3439_vm10  ;;  %vm579_vm6 = vcmp.lt.f32.partialorder %v1806_v18, 0.0  ;;  %v617_v38 = vadd.f32 0.19993454, %v616_v49  ;;  %vm576_vm12 = vcmp.gt.f32.partialorder %v2083_v39, %v2080_v19  ;;  %v3445_v9 = vld [vmem:[#allocation4_spill] sm:$0xff]  ;;  %v3447_v49 = vld [vmem:[#allocation39_spill] sm:$0xff] }
  0x74   : > { %v538_v20 = vsel %vm537_vm1, %v2285_v42, %v534_v46  ;;  %v583_v47 = vsel %vm582_vm8, 3.1415927, %v3416_v51  ;;  %v660_v58 = vadd.f32 0.1064488, %v659_v13  ;;  %v577_v52 = vsub.f32 1.5707964, %v575_v14 }
  0x75   : > { %v542_v10 = vsel %vm2070_vm11, nan, %v538_v20  ;;  %vm584_vm15 = vcmp.eq.f32.partialorder %v1861_v45, 0.0  ;;  %v618_v28 = vmul.f32 %v617_v38, %v2221_v22  ;;  %vm592_vm0 = vcmp.eq.s32.totalorder %v2080_v19, inf }
  0x76   : > { %v548_v55 = vsel %vm547_vm13, %v544_v34, %v542_v10  ;;  %vm593_vm3 = vcmp.eq.s32.totalorder %v2083_v39, inf  ;;  %v661_v42 = vmul.f32 %v660_v58, %v2279_v43  ;;  %v578_v21 = vsel %vm576_vm12, %v577_v52, %v575_v14  ;;  %v3448_v58 = vld [vmem:[#allocation8_spill] sm:$0xff] }
  0x77   : > { %v549_v57 = vand.u32 2147483647, %v548_v55  ;;  %v619_v59 = vadd.f32 -0.33333147, %v618_v28  ;;  %v580_v11 = vsub.f32 3.1415927, %v578_v21  ;;  %vm594_vm11 = vmand %vm592_vm0, %vm593_vm3 }
  0x78   : > { %v662_v63 = vadd.f32 -0.14207031, %v661_v42  ;;  %v2416_v1 = vand.u32 2147483647, %v1814_v24  ;;  %v2420_v37 = vand.u32 2147483647, %v1893_v61 }
  0x79   : > { %v551_v62 = vor.u32 %v550_v33, %v549_v57  ;;  %v620_v44 = vmul.f32 %v619_v59, %v2221_v22  ;;  %v2422_v56 = vpop.eup %1657  ;;  %v581_v2 = vsel %vm579_vm6, %v580_v11, %v578_v21  ;;  %v591_v26 = vsel %vm579_vm6, 2.3561945, %v3418_v50  ;;  %v3449_v28 = vld [vmem:[#allocation17_spill] sm:$0xff]  ;;  %v2650_v61 = vld [vmem:[%s1796_s20 + $0x68] sm:$0xff] }
  0x7a   : > { %3441 = vst [vmem:[#allocation51_spill] sm:$0xff] %v2422_v56  ;;  %v663_v32 = vmul.f32 %v662_v63, %v2279_v43  ;;  %v585_v22 = vsel %vm584_vm15, %v583_v47, %v581_v2  ;;  %v2438_v31 = vmul.f32 %v2422_v56, %v695_v53  ;;  %v597_v60 = vand.u32 2147483648, %v1861_v45  ;;  %v3450_v42 = vld [vmem:[#allocation21_spill] sm:$0xff]  ;;  %v2659_v45 = vld [vmem:[%s1796_s20 + $0x40] sm:$0xff] }
  0x7b   : > { %v621_v5 = vmul.f32 %v620_v44, %v3442_v41  ;;  %1119 = vst [vmem:[%s2363_s26 + $0x18] sm:$0xff] %v551_v62  ;;  %v589_v48 = vsel %vm2108_vm14, nan, %v585_v22  ;;  %v2446_v19 = vmax.f32 %v2416_v1, %v2420_v37  ;;  %vm629_vm1 = vcmp.lt.s32.totalorder %v3445_v9, 0  ;;  %v3451_v11 = vld [vmem:[#allocation49_spill] sm:$0xff] }
  0x7c   : > { %v664_v39 = vadd.f32 0.19993454, %v663_v32  ;;  %v595_v54 = vsel %vm594_vm11, %v591_v26, %v589_v48  ;;  %v2452_v23 = vmul.f32 %v2438_v31, %v2438_v31  ;;  %vm623_vm14 = vcmp.gt.f32.partialorder %v3447_v49, %v3446_v6  ;;  %v3452_v62 = vld [vmem:[#allocation5_spill] sm:$0xff]  ;;  %v3455_v48 = vld [vmem:[#allocation43_spill] sm:$0xff] }
  0x7d   : > { %3444 = vst [vmem:[#allocation47_spill] sm:$0xff] %v2446_v19  ;;  %v622_v29 = vadd.f32 %v621_v5, %v3442_v41  ;;  %v596_v27 = vand.u32 2147483647, %v595_v54  ;;  %1659 = vrcp.f32 %v2446_v19  ;;  %vm626_vm7 = vcmp.lt.f32.partialorder %v3445_v9, 0.0 }
  0x7e   : > { %v665_v34 = vmul.f32 %v664_v39, %v2279_v43  ;;  %v700_v13 = vmul.f32 0.002785687, %v2452_v23  ;;  %v630_v14 = vsel %vm629_vm1, 3.1415927, %v3416_v51  ;;  %vm639_vm2 = vcmp.eq.s32.totalorder %v3446_v6, inf  ;;  %v3458_v6 = vld [vmem:[#allocation18_spill] sm:$0xff] }
  0x7f   : > { %v624_v33 = vsub.f32 1.5707964, %v622_v29  ;;  %v598_v46 = vor.u32 %v597_v60, %v596_v27  ;;  %vm640_vm5 = vcmp.eq.s32.totalorder %v3447_v49, inf  ;;  %v2464_v10 = vand.u32 2147483647, %v3448_v58  ;;  %v3456_v60 = vld [vmem:[#allocation44_spill] sm:$0xff] }
  0x80   : > { %v666_v38 = vadd.f32 -0.33333147, %v665_v34  ;;  %v701_v47 = vadd.f32 -0.015866, %v700_v13  ;;  %vm631_vm8 = vcmp.eq.f32.partialorder %v3449_v28, 0.0  ;;  %vm641_vm10 = vmand %vm639_vm2, %vm640_vm5  ;;  %vm676_vm9 = vcmp.lt.s32.totalorder %v3452_v62, 0 }
  0x81   : > { %v625_v20 = vsel %vm623_vm14, %v624_v33, %v622_v29  ;;  %v2469_v57 = vand.u32 2147483647, %v3450_v42  ;;  %1120 = vst [vmem:[%s2363_s26 + $0x20] sm:$0xff] %v598_v46  ;;  %v638_v21 = vsel %vm626_vm7, 2.3561945, %v3418_v50  ;;  %v644_v2 = vand.u32 2147483648, %v3449_v28 }
  0x82   : > { %v627_v52 = vsub.f32 3.1415927, %v625_v20  ;;  %v667_v55 = vmul.f32 %v666_v38, %v2279_v43  ;;  %v702_v59 = vmul.f32 %v701_v47, %v2452_v23  ;;  %v742_v32 = vmin.f32 %v2416_v1, %v2420_v37  ;;  %v3459_v33 = vld [vmem:[#allocation9_spill] sm:$0xff]  ;;  %v3460_v38 = vld [vmem:[#allocation22_spill] sm:$0xff] }
  0x83   : > { %v2482_v43 = vmax.f32 %v2464_v10, %v2469_v57  ;;  %vm673_vm13 = vcmp.lt.f32.partialorder %v3452_v62, 0.0  ;;  %vm670_vm6 = vcmp.gt.f32.partialorder %v3456_v60, %v3455_v48  ;;  %v677_v39 = vsel %vm676_vm9, 3.1415927, %v3416_v51 }
  0x84   : > { %v628_v53 = vsel %vm626_vm7, %v627_v52, %v625_v20  ;;  %v668_v63 = vmul.f32 %v667_v55, %v3451_v11  ;;  %v703_v26 = vadd.f32 0.04247222, %v702_v59  ;;  %vm681_vm12 = vcmp.ne.f32.partialorder %v3458_v6, %v3458_v6 }
  0x85   : > { %3453 = vst [vmem:[#allocation36_spill] sm:$0xff] %v2482_v43  ;;  %v632_v44 = vsel %vm631_vm8, %v630_v14, %v628_v53  ;;  %1661 = vrcp.f32 %v2482_v43  ;;  %vm686_vm15 = vcmp.eq.s32.totalorder %v3455_v48, inf  ;;  %v2507_v13 = vand.u32 2147483647, %v3459_v33 }
  0x86   : > { %v636_v41 = vsel %vm2160_vm4, nan, %v632_v44  ;;  %v669_v5 = vadd.f32 %v668_v63, %v3451_v11  ;;  %v704_v54 = vmul.f32 %v703_v26, %v2452_v23  ;;  %vm680_vm4 = vcmp.ne.f32.partialorder %v3452_v62, %v3452_v62 }
  0x87   : > { %v642_v0 = vsel %vm641_vm10, %v638_v21, %v636_v41  ;;  %v2496_v29 = vpop.eup %1659  ;;  %vm687_vm0 = vcmp.eq.s32.totalorder %v3456_v60, inf  ;;  %v2511_v20 = vand.u32 2147483647, %v3460_v38  ;;  %vm678_vm3 = vcmp.eq.f32.partialorder %v3458_v6, 0.0  ;;  %vm2519_vm11 = vmor %vm680_vm4, %vm681_vm12 }
  0x88   : > { %3457 = vst [vmem:[#allocation38_spill] sm:$0xff] %v2496_v29  ;;  %v643_v9 = vand.u32 2147483647, %v642_v0  ;;  %v671_v27 = vsub.f32 1.5707964, %v669_v5  ;;  %v2504_v34 = vmul.f32 %v2496_v29, %v742_v32  ;;  %vm688_vm1 = vmand %vm686_vm15, %vm687_vm0  ;;  %v789_v63 = vmin.f32 %v2464_v10, %v2469_v57 }
  0x89   : > { %v705_v49 = vadd.f32 -0.074975304, %v704_v54  ;;  %v685_v42 = vsel %vm673_vm13, 2.3561945, %v3418_v50  ;;  %v2528_v21 = vmax.f32 %v2507_v13, %v2511_v20  ;;  %v691_v26 = vand.u32 2147483648, %v3458_v6 }
  0x8a   : > { %v645_v46 = vor.u32 %v644_v2, %v643_v9  ;;  %v672_v14 = vsel %vm670_vm6, %v671_v27, %v669_v5  ;;  %v2517_v28 = vmul.f32 %v2504_v34, %v2504_v34  ;;  %v3466_v9 = vld [vmem:[#allocation23_spill] sm:$0xff]  ;;  %vm717_vm7 = vcmp.gt.f32.partialorder %v2273_v8, %v2258_v7 }
  0x8b   : > { %v674_v47 = vsub.f32 3.1415927, %v672_v14  ;;  %v706_v52 = vmul.f32 %v705_v49, %v2452_v23  ;;  %3463 = vst [vmem:[#allocation39_spill] sm:$0xff] %v2528_v21  ;;  %1663 = vrcp.f32 %v2528_v21  ;;  %v2553_v27 = vand.u32 2147483647, %v3466_v9 }
  0x8c   : > { %1121 = vst [vmem:[%s2363_s26 + $0x28] sm:$0xff] %v645_v46  ;;  %v747_v11 = vmul.f32 0.002785687, %v2517_v28  ;;  %vm770_vm9 = vcmp.lt.s32.totalorder %v1814_v24, 0  ;;  %vm734_vm6 = vcmp.eq.s32.totalorder %v2273_v8, inf  ;;  %vm767_vm4 = vcmp.lt.f32.partialorder %v1814_v24, 0.0 }
  0x8d   : > { %v675_v59 = vsel %vm673_vm13, %v674_v47, %v672_v14  ;;  %v707_v53 = vadd.f32 0.1064488, %v706_v52  ;;  %vm733_vm13 = vcmp.eq.s32.totalorder %v2258_v7, inf  ;;  %v2641_v3 = vsel %vm767_vm4, 2.3561945, %v3418_v50 }
  0x8e   : > { %v679_v44 = vsel %vm678_vm3, %v677_v39, %v675_v59  ;;  %v748_v32 = vadd.f32 -0.015866, %v747_v11  ;;  %v3465_v39 = vld [vmem:[#allocation10_spill] sm:$0xff]  ;;  %v2653_v4 = vand.u32 2147483647, %v2650_v61  ;;  %vm817_vm15 = vcmp.lt.s32.totalorder %v3448_v58, 0  ;;  %vm2690_vm0 = vmand %vm733_vm13, %vm734_vm6 }
  0x8f   : > { %v683_v2 = vsel %vm2519_vm11, nan, %v679_v44  ;;  %v708_v62 = vmul.f32 %v707_v53, %v2452_v23  ;;  %v2543_v22 = vpop.eup %1661  ;;  %v2550_v54 = vand.u32 2147483647, %v3465_v39  ;;  %v3467_v53 = vld [vmem:[#allocation6_spill] sm:$0xff]  ;;  %vm764_vm3 = vcmp.gt.f32.partialorder %v2420_v37, %v2416_v1 }
  0x90   : > { %3464 = vst [vmem:[#allocation49_spill] sm:$0xff] %v2543_v22  ;;  %v689_v41 = vsel %vm688_vm1, %v685_v42, %v683_v2  ;;  %v749_v48 = vmul.f32 %v748_v32, %v2517_v28  ;;  %v2547_v60 = vmul.f32 %v2543_v22, %v789_v63  ;;  %v836_v42 = vmin.f32 %v2507_v13, %v2511_v20 }
  0x91   : > { %v690_v5 = vand.u32 2147483647, %v689_v41  ;;  %v709_v0 = vadd.f32 -0.14207031, %v708_v62  ;;  %v2562_v38 = vmax.f32 %v2550_v54, %v2553_v27  ;;  %vm723_vm14 = vcmp.lt.s32.totalorder %v3467_v53, 0 }
  0x92   : > { %v750_v46 = vadd.f32 0.04247222, %v749_v48  ;;  %v2558_v14 = vmul.f32 %v2547_v60, %v2547_v60  ;;  %vm720_vm2 = vcmp.lt.f32.partialorder %v3467_v53, 0.0  ;;  %v724_v41 = vsel %vm723_vm14, 3.1415927, %v3416_v51  ;;  %v3470_v48 = vld [vmem:[#allocation24_spill] sm:$0xff] }
  0x93   : > { %v692_v6 = vor.u32 %v691_v26, %v690_v5  ;;  %v710_v49 = vmul.f32 %v709_v0, %v2452_v23  ;;  %1665 = vrcp.f32 %v2562_v38  ;;  %vm727_vm5 = vcmp.ne.f32.partialorder %v3467_v53, %v3467_v53  ;;  %v3469_v5 = vld [vmem:[#allocation11_spill] sm:$0xff] }
  0x94   : > { %v751_v52 = vmul.f32 %v750_v46, %v2517_v28  ;;  %v794_v55 = vmul.f32 0.002785687, %v2558_v14  ;;  %v2586_v0 = vand.u32 2147483647, %v3469_v5  ;;  %v2589_v9 = vand.u32 2147483647, %v3470_v48 }
  0x95   : > { %v711_v47 = vadd.f32 0.19993454, %v710_v49  ;;  %1122 = vst [vmem:[%s2363_s26 + $0x30] sm:$0xff] %v692_v6  ;;  %v2572_v44 = vpop.eup %1663  ;;  %vm774_vm11 = vcmp.ne.f32.partialorder %v1814_v24, %v1814_v24  ;;  %vm775_vm1 = vcmp.ne.f32.partialorder %v2659_v45, %v2659_v45  ;;  %vm814_vm14 = vcmp.lt.f32.partialorder %v3448_v58, 0.0 }
  0x96   : > { %v752_v11 = vadd.f32 -0.074975304, %v751_v52  ;;  %v795_v63 = vadd.f32 -0.015866, %v794_v55  ;;  %3468 = vst [vmem:[#allocation42_spill] sm:$0xff] %v2572_v44  ;;  %v2580_v32 = vmul.f32 %v2572_v44, %v836_v42  ;;  %v2597_v52 = vld [vmem:[%s1796_s20 + $0x38] sm:$0xff]  ;;  %v2627_v44 = vmax.f32 %v2446_v19, %v1186_v36 }
  0x97   : > { %v712_v59 = vmul.f32 %v711_v47, %v2452_v23  ;;  %vm725_vm8 = vcmp.eq.f32.partialorder %v2597_v52, 0.0  ;;  %vm728_vm10 = vcmp.ne.f32.partialorder %v2597_v52, %v2597_v52  ;;  %v732_v55 = vsel %vm720_vm2, 2.3561945, %v3418_v50  ;;  %v3472_v19 = vld [vmem:[#allocation12_spill] sm:$0xff] }
  0x98   : > { %v753_v26 = vmul.f32 %v752_v11, %v2517_v28  ;;  %v796_v62 = vmul.f32 %v795_v63, %v2558_v14  ;;  %v2594_v47 = vmul.f32 %v2580_v32, %v2580_v32  ;;  %v2647_v22 = vand.u32 2147483647, %v3472_v19  ;;  %vm2676_vm12 = vmor %vm727_vm5, %vm728_vm10 }
  0x99   : > { %v713_v2 = vadd.f32 -0.33333147, %v712_v59  ;;  %vm772_vm5 = vcmp.eq.f32.partialorder %v2659_v45, 0.0  ;;  %vm861_vm10 = vcmp.lt.f32.partialorder %v3459_v33, 0.0  ;;  %vm821_vm13 = vcmp.ne.f32.partialorder %v3448_v58, %v3448_v58 }
  0x9a   : > { %v754_v49 = vadd.f32 0.1064488, %v753_v26  ;;  %v797_v46 = vadd.f32 0.04247222, %v796_v62  ;;  %v841_v63 = vmul.f32 0.002785687, %v2594_v47  ;;  %v2668_v18 = vmax.f32 %v2647_v22, %v2653_v4 }
  0x9b   : > { %v714_v6 = vmul.f32 %v713_v2, %v2452_v23  ;;  %v2608_v23 = vmax.f32 %v2586_v0, %v2589_v9  ;;  %v883_v2 = vmin.f32 %v2550_v54, %v2553_v27 }
  0x9c   : > { %v755_v59 = vmul.f32 %v754_v49, %v2517_v28  ;;  %v798_v11 = vmul.f32 %v797_v46, %v2558_v14  ;;  %v738_v46 = vand.u32 2147483648, %v2597_v52 }
  0x9d   : > { %v715_v42 = vmul.f32 %v714_v6, %v2438_v31  ;;  %1667 = vrcp.f32 %v2608_v23  ;;  %v842_v6 = vadd.f32 -0.015866, %v841_v63  ;;  %v2620_v49 = vpop.eup %1665 }
  0x9e   : > { %v756_v62 = vadd.f32 -0.14207031, %v755_v59  ;;  %v799_v48 = vadd.f32 -0.074975304, %v798_v11  ;;  %3471 = vst [vmem:[#allocation43_spill] sm:$0xff] %v2620_v49  ;;  %v2644_v36 = vmul.f32 %v2620_v49, %v883_v2  ;;  %1669 = vrcp.f32 %v2668_v18 }
  0x9f   : > { %v716_v26 = vadd.f32 %v715_v42, %v2438_v31  ;;  %v2633_v31 = vsel %vm770_vm9, 3.1415927, %v3416_v51  ;;  %v843_v63 = vmul.f32 %v842_v6, %v2594_v47  ;;  %vm811_vm9 = vcmp.gt.f32.partialorder %v2469_v57, %v2464_v10 }
  0xa0   : > { %v757_v59 = vmul.f32 %v756_v62, %v2517_v28  ;;  %v800_v11 = vmul.f32 %v799_v48, %v2558_v14  ;;  %v2664_v49 = vmul.f32 %v2644_v36, %v2644_v36 }
  0xa1   : > { %v718_v42 = vsub.f32 1.5707964, %v716_v26  ;;  %v844_v29 = vadd.f32 0.04247222, %v843_v63 }
  0xa2   : > { %v758_v48 = vadd.f32 0.19993454, %v757_v59  ;;  %v801_v6 = vadd.f32 0.1064488, %v800_v11 }
  0xa3   : > { %v719_v62 = vsel %vm717_vm7, %v718_v42, %v716_v26  ;;  %v845_v11 = vmul.f32 %v844_v29, %v2594_v47  ;;  %vm780_vm7 = vcmp.eq.s32.totalorder %v2416_v1, inf }
  0xa4   : > { %v721_v56 = vsub.f32 3.1415927, %v719_v62  ;;  %v759_v42 = vmul.f32 %v758_v48, %v2517_v28  ;;  %v802_v59 = vmul.f32 %v801_v6, %v2558_v14  ;;  %v888_v48 = vmul.f32 0.002785687, %v2664_v49 }
  0xa5   : > { %v930_v6 = vmin.f32 %v2586_v0, %v2589_v9  ;;  %v846_v7 = vadd.f32 -0.074975304, %v845_v11 }
  0xa6   : > { %v722_v63 = vsel %vm720_vm2, %v721_v56, %v719_v62  ;;  %v760_v8 = vadd.f32 -0.33333147, %v759_v42  ;;  %v803_v29 = vadd.f32 -0.14207031, %v802_v59  ;;  %v889_v52 = vadd.f32 -0.015866, %v888_v48 }
  0xa7   : > { %v726_v56 = vsel %vm725_vm8, %v724_v41, %v722_v63  ;;  %v2702_v53 = vpop.eup %1667  ;;  %v2714_v41 = vsel %vm817_vm15, 3.1415927, %v3416_v51  ;;  %vm781_vm2 = vcmp.eq.s32.totalorder %v2420_v37, inf  ;;  %v847_v11 = vmul.f32 %v846_v7, %v2594_v47 }
  0xa8   : > { %3477 = vst [vmem:[#allocation44_spill] sm:$0xff] %v2702_v53  ;;  %v730_v62 = vsel %vm2676_vm12, nan, %v726_v56  ;;  %v761_v26 = vmul.f32 %v760_v8, %v2517_v28  ;;  %v804_v59 = vmul.f32 %v803_v29, %v2558_v14  ;;  %v1188_v48 = vmax.f32 %v2482_v43, %v2627_v44 }
  0xa9   : > { %v736_v42 = vsel %vm2690_vm0, %v732_v55, %v730_v62  ;;  %v890_v2 = vmul.f32 %v889_v52, %v2664_v49  ;;  %v2728_v55 = vmul.f32 %v2702_v53, %v930_v6  ;;  %v2734_v8 = vsel %vm814_vm14, 2.3561945, %v3418_v50 }
  0xaa   : > { %v737_v63 = vand.u32 2147483647, %v736_v42  ;;  %v762_v28 = vmul.f32 %v761_v26, %v2504_v34  ;;  %v805_v56 = vadd.f32 0.19993454, %v804_v59  ;;  %v848_v29 = vadd.f32 0.1064488, %v847_v11 }
  0xab   : > { %vm864_vm8 = vcmp.lt.s32.totalorder %v3459_v33, 0  ;;  %v891_v62 = vadd.f32 0.04247222, %v890_v2  ;;  %v2739_v44 = vmul.f32 %v2728_v55, %v2728_v55  ;;  %v977_v26 = vmin.f32 %v2647_v22, %v2653_v4  ;;  %v2747_v59 = vld [vmem:[%s1796_s20 + $0x48] sm:$0xff] }
  0xac   : > { %v739_v7 = vor.u32 %v738_v46, %v737_v63  ;;  %v763_v6 = vadd.f32 %v762_v28, %v2504_v34  ;;  %v806_v52 = vmul.f32 %v805_v56, %v2558_v14  ;;  %v849_v42 = vmul.f32 %v848_v29, %v2594_v47  ;;  %v2756_v56 = vpop.eup %1669 }
  0xad   : > { %v892_v11 = vmul.f32 %v891_v62, %v2664_v49  ;;  %v935_v63 = vmul.f32 0.002785687, %v2739_v44  ;;  %3478 = vst [vmem:[#allocation52_spill] sm:$0xff] %v2756_v56  ;;  %vm822_vm6 = vcmp.ne.f32.partialorder %v2747_v59, %v2747_v59  ;;  %v2765_v29 = vsel %vm864_vm8, 3.1415927, %v3416_v51 }
  0xae   : > { %1123 = vst [vmem:[%s2363_s26 + $0x38] sm:$0xff] %v739_v7  ;;  %v765_v2 = vsub.f32 1.5707964, %v763_v6  ;;  %v807_v34 = vadd.f32 -0.33333147, %v806_v52  ;;  %vm827_vm12 = vcmp.eq.s32.totalorder %v2464_v10, inf  ;;  %v2775_v53 = vmul.f32 %v2756_v56, %v977_v26 }
  0xaf   : > { %v850_v28 = vadd.f32 -0.14207031, %v849_v42  ;;  %v893_v7 = vadd.f32 -0.074975304, %v892_v11  ;;  %v936_v62 = vadd.f32 -0.015866, %v935_v63  ;;  %v1189_v11 = vmax.f32 %v2528_v21, %v1188_v48 }
  0xb0   : > { %v766_v52 = vsel %vm764_vm3, %v765_v2, %v763_v6  ;;  %v808_v42 = vmul.f32 %v807_v34, %v2558_v14  ;;  %vm828_vm15 = vcmp.eq.s32.totalorder %v2469_v57, inf  ;;  %vm819_vm0 = vcmp.eq.f32.partialorder %v2747_v59, 0.0  ;;  %vm2787_vm3 = vmor %vm774_vm11, %vm775_vm1  ;;  %v3481_v34 = vld [vmem:[#allocation13_spill] sm:$0xff]  ;;  %v2806_v21 = vld [vmem:[%s1796_s20 + $0x70] sm:$0xff] }
  0xb1   : > { %v851_v46 = vmul.f32 %v850_v28, %v2594_v47  ;;  %v768_v43 = vsub.f32 3.1415927, %v766_v52  ;;  %v894_v63 = vmul.f32 %v893_v7, %v2664_v49  ;;  %v937_v6 = vmul.f32 %v936_v62, %v2739_v44  ;;  %vm782_vm11 = vmand %vm780_vm7, %vm781_vm2  ;;  %v2832_v14 = vld [vmem:[%s1796_s20 + $0x50] sm:$0xff] }
  0xb2   : > { %v809_v26 = vmul.f32 %v808_v42, %v2547_v60  ;;  %v2794_v48 = vmul.f32 %v2775_v53, %v2775_v53  ;;  %v2797_v28 = vand.u32 2147483647, %v3481_v34  ;;  %vm868_vm1 = vcmp.ne.f32.partialorder %v3459_v33, %v3459_v33 }
  0xb3   : > { %v852_v2 = vadd.f32 0.19993454, %v851_v46  ;;  %v769_v7 = vsel %vm767_vm4, %v768_v43, %v766_v52  ;;  %v895_v62 = vadd.f32 0.1064488, %v894_v63  ;;  %v938_v56 = vadd.f32 0.04247222, %v937_v6 }
  0xb4   : > { %v2809_v46 = vand.u32 2147483647, %v2806_v21  ;;  %v773_v42 = vsel %vm772_vm5, %v2633_v31, %v769_v7  ;;  %v810_v24 = vadd.f32 %v809_v26, %v2547_v60  ;;  %v982_v37 = vmul.f32 0.002785687, %v2794_v48  ;;  %vm2857_vm5 = vmor %vm821_vm13, %vm822_vm6 }
  0xb5   : > { %v853_v43 = vmul.f32 %v852_v2, %v2594_v47  ;;  %v777_v1 = vsel %vm2787_vm3, nan, %v773_v42  ;;  %vm858_vm4 = vcmp.gt.f32.partialorder %v2511_v20, %v2507_v13  ;;  %v2824_v52 = vsel %vm861_vm10, 2.3561945, %v3418_v50 }
  0xb6   : > { %v896_v63 = vmul.f32 %v895_v62, %v2664_v49  ;;  %v939_v31 = vmul.f32 %v938_v56, %v2739_v44  ;;  %v783_v60 = vsel %vm782_vm11, %v2641_v3, %v777_v1  ;;  %v812_v6 = vsub.f32 1.5707964, %v810_v24 }
  0xb7   : > { %v854_v26 = vadd.f32 -0.33333147, %v853_v43  ;;  %v983_v2 = vadd.f32 -0.015866, %v982_v37  ;;  %v784_v7 = vand.u32 2147483647, %v783_v60  ;;  %vm869_vm7 = vcmp.ne.f32.partialorder %v2832_v14, %v2832_v14 }
  0xb8   : > { %v1190_v42 = vmax.f32 %v2562_v38, %v1189_v11  ;;  %v897_v40 = vadd.f32 -0.14207031, %v896_v63  ;;  %v940_v62 = vadd.f32 -0.074975304, %v939_v31  ;;  %v813_v3 = vsel %vm811_vm9, %v812_v6, %v810_v24  ;;  %vm829_vm9 = vmand %vm827_vm12, %vm828_vm15 }
  0xb9   : > { %v855_v56 = vmul.f32 %v854_v26, %v2594_v47  ;;  %v984_v43 = vmul.f32 %v983_v2, %v2794_v48  ;;  %v2844_v37 = vmax.f32 %v2797_v28, %v2809_v46  ;;  %v3482_v1 = vand.u32 2147483648, %v2659_v45  ;;  %vm2905_vm15 = vmor %vm868_vm1, %vm869_vm7 }
  0xba   : > { %v815_v17 = vsub.f32 3.1415927, %v813_v3  ;;  %vm866_vm2 = vcmp.eq.f32.partialorder %v2832_v14, 0.0  ;;  %v898_v11 = vmul.f32 %v897_v40, %v2664_v49  ;;  %v941_v63 = vmul.f32 %v940_v62, %v2739_v44 }
  0xbb   : > { %v786_v60 = vor.u32 %v3482_v1, %v784_v7  ;;  %v856_v45 = vmul.f32 %v855_v56, %v2580_v32  ;;  %vm874_vm8 = vcmp.eq.s32.totalorder %v2507_v13, inf  ;;  %v985_v47 = vadd.f32 0.04247222, %v984_v43  ;;  %v1682_v13 = vld [vmem:[%s1796_s20 + $0x58] sm:$0xff] }
  0xbc   : > { %1671 = vrcp.f32 %v2844_v37  ;;  %v816_v40 = vsel %vm814_vm14, %v815_v17, %v813_v3  ;;  %vm875_vm13 = vcmp.eq.s32.totalorder %v2511_v20, inf  ;;  %v899_v31 = vadd.f32 0.19993454, %v898_v11 }
  0xbd   : > { %v942_v6 = vadd.f32 0.1064488, %v941_v63  ;;  %1124 = vst [vmem:[%s2363_s26 + $0x40] sm:$0xff] %v786_v60  ;;  %v820_v26 = vsel %vm819_vm0, %v2714_v41, %v816_v40  ;;  %v857_v2 = vadd.f32 %v856_v45, %v2580_v32  ;;  %v1191_v7 = vmax.f32 %v2608_v23, %v1190_v42  ;;  %vm2923_vm3 = vmand %vm874_vm8, %vm875_vm13 }
  0xbe   : > { %v986_v17 = vmul.f32 %v985_v47, %v2794_v48  ;;  %v824_v58 = vsel %vm2857_vm5, nan, %v820_v26  ;;  %v879_v10 = vand.u32 2147483648, %v2832_v14  ;;  %v900_v57 = vmul.f32 %v899_v31, %v2664_v49 }
  0xbf   : > { %v943_v62 = vmul.f32 %v942_v6, %v2739_v44  ;;  %v830_v3 = vsel %vm829_vm9, %v2734_v8, %v824_v58  ;;  %v859_v56 = vsub.f32 1.5707964, %v857_v2  ;;  %vm911_vm14 = vcmp.lt.s32.totalorder %v3465_v39, 0  ;;  %v3488_v6 = vld [vmem:[#allocation14_spill] sm:$0xff] }
  0xc0   : > { %v987_v41 = vadd.f32 -0.074975304, %v986_v17  ;;  %v831_v32 = vand.u32 2147483647, %v830_v3  ;;  %v901_v43 = vadd.f32 -0.33333147, %v900_v57  ;;  %vm905_vm6 = vcmp.gt.f32.partialorder %v2553_v27, %v2550_v54 }
  0xc1   : > { %v944_v42 = vadd.f32 -0.14207031, %v943_v62  ;;  %v860_v1 = vsel %vm858_vm4, %v859_v56, %v857_v2  ;;  %v1192_v60 = vmax.f32 %v2668_v18, %v1191_v7  ;;  %v1024_v8 = vmin.f32 %v2797_v28, %v2809_v46  ;;  %v2929_v57 = vld [vmem:[%s1796_s20 + $0x78] sm:$0xff] }
  0xc2   : > { %v988_v11 = vmul.f32 %v987_v41, %v2794_v48  ;;  %v3485_v63 = vand.u32 2147483648, %v2747_v59  ;;  %v862_v45 = vsub.f32 3.1415927, %v860_v1  ;;  %v902_v47 = vmul.f32 %v901_v43, %v2664_v49 }
  0xc3   : > { %vm908_vm12 = vcmp.lt.f32.partialorder %v3465_v39, 0.0  ;;  %v945_v40 = vmul.f32 %v944_v42, %v2739_v44  ;;  %v912_v59 = vsel %vm911_vm14, 3.1415927, %v3416_v51  ;;  %vm915_vm0 = vcmp.ne.f32.partialorder %v3465_v39, %v3465_v39 }
  0xc4   : > { %v833_v24 = vor.u32 %v3485_v63, %v831_v32  ;;  %v989_v49 = vadd.f32 0.1064488, %v988_v11  ;;  %v2915_v26 = vand.u32 2147483647, %v3488_v6  ;;  %v863_v2 = vsel %vm861_vm10, %v862_v45, %v860_v1 }
  0xc5   : > { %v903_v17 = vmul.f32 %v902_v47, %v2644_v36  ;;  %v946_v58 = vadd.f32 0.19993454, %v945_v40  ;;  %v2932_v62 = vand.u32 2147483647, %v2929_v57  ;;  %v867_v33 = vsel %vm866_vm2, %v2765_v29, %v863_v2 }
  0xc6   : > { %1125 = vst [vmem:[%s2363_s26 + $0x48] sm:$0xff] %v833_v24  ;;  %v2935_v3 = vpop.eup %1671  ;;  %vm916_vm10 = vcmp.ne.f32.partialorder %v1682_v13, %v1682_v13  ;;  %v990_v20 = vmul.f32 %v989_v49, %v2794_v48  ;;  %v1193_v56 = vmax.f32 %v2844_v37, %v1192_v60  ;;  %v871_v41 = vsel %vm2905_vm15, nan, %v867_v33 }
  0xc7   : > { %v904_v32 = vadd.f32 %v903_v17, %v2644_v36  ;;  %v947_v43 = vmul.f32 %v946_v58, %v2739_v44  ;;  %v2948_v42 = vmul.f32 %v2935_v3, %v1024_v8  ;;  %v877_v29 = vsel %vm2923_vm3, %v2824_v52, %v871_v41  ;;  %vm2975_vm7 = vmor %vm915_vm0, %vm916_vm10 }
  0xc8   : > { %vm921_vm11 = vcmp.eq.s32.totalorder %v2550_v54, inf  ;;  %v991_v14 = vadd.f32 -0.14207031, %v990_v20  ;;  %v2956_v1 = vmax.f32 %v2915_v26, %v2932_v62  ;;  %v878_v60 = vand.u32 2147483647, %v877_v29  ;;  %v1683_v29 = vld [vmem:[%s1796_s20 + $0x60] sm:$0xff] }
  0xc9   : > { %v906_v11 = vsub.f32 1.5707964, %v904_v32  ;;  %v948_v63 = vadd.f32 -0.33333147, %v947_v43  ;;  %v2960_v36 = vmul.f32 %v2948_v42, %v2948_v42  ;;  %vm922_vm4 = vcmp.eq.s32.totalorder %v2553_v27, inf }
  0xca   : > { %v992_v8 = vmul.f32 %v991_v14, %v2794_v48  ;;  %v1194_v52 = vmax.f32 %v2956_v1, %v1193_v56  ;;  %1673 = vrcp.f32 %v2956_v1  ;;  %v880_v24 = vor.u32 %v879_v10, %v878_v60  ;;  %vm923_vm5 = vmand %vm921_vm11, %vm922_vm4 }
  0xcb   : > { %v907_v45 = vsel %vm905_vm6, %v906_v11, %v904_v32  ;;  %v949_v47 = vmul.f32 %v948_v63, %v2739_v44  ;;  %v1029_v40 = vmul.f32 0.002785687, %v2960_v36  ;;  %vm913_vm1 = vcmp.eq.f32.partialorder %v1682_v13, 0.0 }
  0xcc   : > { %v909_v31 = vsub.f32 3.1415927, %v907_v45  ;;  %v993_v49 = vadd.f32 0.19993454, %v992_v8  ;;  %1195 = vmax.xlane.f32.xlu0 %v1194_v52  ;;  %vm958_vm2 = vcmp.lt.s32.totalorder %v3469_v5, 0  ;;  %1126 = vst [vmem:[%s2363_s26 + $0x50] sm:$0xff] %v880_v24  ;;  %vm952_vm9 = vcmp.gt.f32.partialorder %v2589_v9, %v2586_v0 }
  0xcd   : > { %v950_v10 = vmul.f32 %v949_v47, %v2728_v55  ;;  %v1030_v7 = vadd.f32 -0.015866, %v1029_v40  ;;  %v920_v17 = vsel %vm908_vm12, 2.3561945, %v3418_v50  ;;  %v926_v58 = vand.u32 2147483648, %v1682_v13 }
  0xce   : > { %v910_v44 = vsel %vm908_vm12, %v909_v31, %v907_v45  ;;  %v994_v33 = vmul.f32 %v993_v49, %v2794_v48  ;;  %vm955_vm8 = vcmp.lt.f32.partialorder %v3469_v5, 0.0  ;;  %v959_v54 = vsel %vm958_vm2, 3.1415927, %v3416_v51 }
  0xcf   : > { %v914_v20 = vsel %vm913_vm1, %v912_v59, %v910_v44  ;;  %v951_v56 = vadd.f32 %v950_v10, %v2728_v55  ;;  %v1031_v41 = vmul.f32 %v1030_v7, %v2960_v36  ;;  %v1071_v59 = vmin.f32 %v2915_v26, %v2932_v62 }
  0xd0   : > { %v918_v39 = vsel %vm2975_vm7, nan, %v914_v20  ;;  %v995_v27 = vadd.f32 -0.33333147, %v994_v33  ;;  %vm962_vm13 = vcmp.ne.f32.partialorder %v3469_v5, %v3469_v5  ;;  %vm963_vm14 = vcmp.ne.f32.partialorder %v1683_v29, %v1683_v29 }
  0xd1   : > { %v924_v13 = vsel %vm923_vm5, %v920_v17, %v918_v39  ;;  %v953_v32 = vsub.f32 1.5707964, %v951_v56  ;;  %v1032_v43 = vadd.f32 0.04247222, %v1031_v41  ;;  %vm968_vm6 = vcmp.eq.s32.totalorder %v2586_v0, inf  ;;  %vm3012_vm0 = vmor %vm962_vm13, %vm963_vm14 }
  0xd2   : > { %v925_v55 = vand.u32 2147483647, %v924_v13  ;;  %v996_v14 = vmul.f32 %v995_v27, %v2794_v48  ;;  %vm969_vm12 = vcmp.eq.s32.totalorder %v2589_v9, inf  ;;  %vm960_vm15 = vcmp.eq.f32.partialorder %v1683_v29, 0.0 }
  0xd3   : > { %v954_v60 = vsel %vm952_vm9, %v953_v32, %v951_v56  ;;  %v1033_v11 = vmul.f32 %v1032_v43, %v2960_v36  ;;  %v967_v0 = vsel %vm955_vm8, 2.3561945, %v3418_v50  ;;  %vm1005_vm3 = vcmp.lt.s32.totalorder %v3472_v19, 0  ;;  %vm970_vm10 = vmand %vm968_vm6, %vm969_vm12 }
  0xd4   : > { %v3009_v63 = vpop.eup %1673  ;;  %v927_v8 = vor.u32 %v926_v58, %v925_v55  ;;  %v956_v52 = vsub.f32 3.1415927, %v954_v60  ;;  %v997_v24 = vmul.f32 %v996_v14, %v2775_v53  ;;  %v973_v40 = vand.u32 2147483648, %v1683_v29 }
  0xd5   : > { %v1034_v9 = vadd.f32 -0.074975304, %v1033_v11  ;;  %v3021_v48 = vmul.f32 %v3009_v63, %v1071_v59  ;;  %vm999_vm11 = vcmp.gt.f32.partialorder %v2653_v4, %v2647_v22  ;;  %vm1002_vm4 = vcmp.lt.f32.partialorder %v3472_v19, 0.0 }
  0xd6   : > { %v957_v47 = vsel %vm955_vm8, %v956_v52, %v954_v60  ;;  %v998_v31 = vadd.f32 %v997_v24, %v2775_v53  ;;  %1127 = vst [vmem:[%s2363_s26 + $0x58] sm:$0xff] %v927_v8  ;;  %v1006_v44 = vsel %vm1005_vm3, 3.1415927, %v3416_v51  ;;  %vm1009_vm1 = vcmp.ne.f32.partialorder %v3472_v19, %v3472_v19 }
  0xd7   : > { %v961_v49 = vsel %vm960_vm15, %v959_v54, %v957_v47  ;;  %v1035_v2 = vmul.f32 %v1034_v9, %v2960_v36  ;;  %v3033_v10 = vmul.f32 %v3021_v48, %v3021_v48  ;;  %vm1010_vm7 = vcmp.ne.f32.partialorder %v2650_v61, %v2650_v61 }
  0xd8   : > { %v965_v5 = vsel %vm3012_vm0, nan, %v961_v49  ;;  %v1000_v7 = vsub.f32 1.5707964, %v998_v31  ;;  %vm1015_vm2 = vcmp.eq.s32.totalorder %v2647_v22, inf  ;;  %vm1016_vm5 = vcmp.eq.s32.totalorder %v2653_v4, inf  ;;  %vm1011_vm9 = vmor %vm1009_vm1, %vm1010_vm7 }
  0xd9   : > { %v971_v53 = vsel %vm970_vm10, %v967_v0, %v965_v5  ;;  %v1036_v17 = vadd.f32 0.1064488, %v1035_v2  ;;  %v1076_v58 = vmul.f32 0.002785687, %v3033_v10  ;;  %vm1007_vm8 = vcmp.eq.f32.partialorder %v2650_v61, 0.0  ;;  %vm1017_vm13 = vmand %vm1015_vm2, %vm1016_vm5 }
  0xda   : > { %v972_v33 = vand.u32 2147483647, %v971_v53  ;;  %v1001_v20 = vsel %vm999_vm11, %v1000_v7, %v998_v31  ;;  %v1014_v13 = vsel %vm1002_vm4, 2.3561945, %v3418_v50  ;;  %v1020_v59 = vand.u32 2147483648, %v2650_v61 }
  0xdb   : > { %v1003_v56 = vsub.f32 3.1415927, %v1001_v20  ;;  %v1037_v41 = vmul.f32 %v1036_v17, %v2960_v36  ;;  %v1077_v39 = vadd.f32 -0.015866, %v1076_v58  ;;  %vm1046_vm14 = vcmp.gt.f32.partialorder %v2809_v46, %v2797_v28 }
  0xdc   : > { %v974_v54 = vor.u32 %v973_v40, %v972_v33  ;;  %vm1052_vm6 = vcmp.lt.s32.totalorder %v3481_v34, 0  ;;  %vm1049_vm12 = vcmp.lt.f32.partialorder %v3481_v34, 0.0  ;;  %vm1056_vm15 = vcmp.ne.f32.partialorder %v3481_v34, %v3481_v34 }
  0xdd   : > { %v1004_v27 = vsel %vm1002_vm4, %v1003_v56, %v1001_v20  ;;  %v1038_v32 = vadd.f32 -0.14207031, %v1037_v41  ;;  %v1078_v22 = vmul.f32 %v1077_v39, %v3033_v10  ;;  %vm1057_vm0 = vcmp.ne.f32.partialorder %v2806_v21, %v2806_v21 }
  0xde   : > { %v1008_v4 = vsel %vm1007_vm8, %v1006_v44, %v1004_v27  ;;  %1128 = vst [vmem:[%s2363_s26 + $0x60] sm:$0xff] %v974_v54  ;;  %vm1062_vm3 = vcmp.eq.s32.totalorder %v2797_v28, inf  ;;  %vm1063_vm10 = vcmp.eq.s32.totalorder %v2809_v46, inf  ;;  %v1053_v44 = vsel %vm1052_vm6, 3.1415927, %v3416_v51  ;;  %vm1058_vm4 = vmor %vm1056_vm15, %vm1057_vm0 }
  0xdf   : > { %v1012_v43 = vsel %vm1011_vm9, nan, %v1008_v4  ;;  %v1039_v55 = vmul.f32 %v1038_v32, %v2960_v36  ;;  %v1079_v29 = vadd.f32 0.04247222, %v1078_v22  ;;  %vm1054_vm11 = vcmp.eq.f32.partialorder %v2806_v21, 0.0  ;;  %vm1064_vm1 = vmand %vm1062_vm3, %vm1063_vm10 }
  0xe0   : > { %v1018_v14 = vsel %vm1017_vm13, %v1014_v13, %v1012_v43  ;;  %v1061_v34 = vsel %vm1049_vm12, 2.3561945, %v3418_v50  ;;  %v1067_v28 = vand.u32 2147483648, %v2806_v21  ;;  %vm1093_vm7 = vcmp.gt.f32.partialorder %v2932_v62, %v2915_v26 }
  0xe1   : > { %v1019_v60 = vand.u32 2147483647, %v1018_v14  ;;  %v1040_v11 = vadd.f32 0.19993454, %v1039_v55  ;;  %v1080_v8 = vmul.f32 %v1079_v29, %v3033_v10  ;;  %vm1099_vm2 = vcmp.lt.s32.totalorder %v3488_v6, 0 }
  0xe2   : > { %vm1103_vm5 = vcmp.ne.f32.partialorder %v3488_v6, %v3488_v6  ;;  %vm1104_vm8 = vcmp.ne.f32.partialorder %v2929_v57, %v2929_v57  ;;  %vm1096_vm9 = vcmp.lt.f32.partialorder %v3488_v6, 0.0  ;;  %vm1109_vm13 = vcmp.eq.s32.totalorder %v2915_v26, inf }
  0xe3   : > { %v1021_v19 = vor.u32 %v1020_v59, %v1019_v60  ;;  %v1041_v52 = vmul.f32 %v1040_v11, %v2960_v36  ;;  %v1081_v24 = vadd.f32 -0.074975304, %v1080_v8  ;;  %vm1101_vm6 = vcmp.eq.f32.partialorder %v2929_v57, 0.0 }
  0xe4   : > { %v1108_v22 = vsel %vm1096_vm9, 2.3561945, %v3418_v50  ;;  %v1114_v59 = vand.u32 2147483648, %v2929_v57 }
  0xe5   : > { %v1042_v45 = vadd.f32 -0.33333147, %v1041_v52  ;;  %v1082_v0 = vmul.f32 %v1081_v24, %v3033_v10  ;;  %1129 = vst [vmem:[%s2363_s26 + $0x68] sm:$0xff] %v1021_v19 }
  0xe7   : > { %v1043_v9 = vmul.f32 %v1042_v45, %v2960_v36  ;;  %v1083_v47 = vadd.f32 0.1064488, %v1082_v0 }
  0xe9   : > { %v1044_v61 = vmul.f32 %v1043_v9, %v2948_v42  ;;  %v1084_v40 = vmul.f32 %v1083_v47, %v3033_v10 }
  0xeb   : > { %v1045_v31 = vadd.f32 %v1044_v61, %v2948_v42  ;;  %v1085_v49 = vadd.f32 -0.14207031, %v1084_v40 }
  0xed   : > { %v1047_v2 = vsub.f32 1.5707964, %v1045_v31  ;;  %v1086_v5 = vmul.f32 %v1085_v49, %v3033_v10 }
  0xef   : > { %v1048_v36 = vsel %vm1046_vm14, %v1047_v2, %v1045_v31  ;;  %v1087_v42 = vadd.f32 0.19993454, %v1086_v5  ;;  %vm1110_vm14 = vcmp.eq.s32.totalorder %v2932_v62, inf }
  0xf0   : > { %v1050_v7 = vsub.f32 3.1415927, %v1048_v36  ;;  %vm1111_vm15 = vmand %vm1109_vm13, %vm1110_vm14 }
  0xf1   : > { %v1088_v53 = vmul.f32 %v1087_v42, %v3033_v10 }
  0xf2   : > { %v1051_v17 = vsel %vm1049_vm12, %v1050_v7, %v1048_v36  ;;  %vm1105_vm12 = vmor %vm1103_vm5, %vm1104_vm8 }
  0xf3   : > { %v1055_v58 = vsel %vm1054_vm11, %v1053_v44, %v1051_v17  ;;  %v1089_v33 = vadd.f32 -0.33333147, %v1088_v53 }
  0xf4   : > { %v1059_v20 = vsel %vm1058_vm4, nan, %v1055_v58 }
  0xf5   : > { %v1065_v46 = vsel %vm1064_vm1, %v1061_v34, %v1059_v20  ;;  %v1090_v56 = vmul.f32 %v1089_v33, %v3033_v10  ;;  %v1100_v10 = vsel %vm1099_vm2, 3.1415927, %v3416_v51 }
  0xf6   : > { %v1066_v41 = vand.u32 2147483647, %v1065_v46 }
  0xf7   : > { %v1091_v39 = vmul.f32 %v1090_v56, %v3021_v48 }
  0xf8   : > { %v1068_v54 = vor.u32 %v1067_v28, %v1066_v41 }
  0xf9   : > { %v1092_v27 = vadd.f32 %v1091_v39, %v3021_v48 }
  0xfa   : > { %1130 = vst [vmem:[%s2363_s26 + $0x70] sm:$0xff] %v1068_v54 }
  0xfb   : > { %v1094_v13 = vsub.f32 1.5707964, %v1092_v27 }
  0xfd   : > { %v1095_v21 = vsel %vm1093_vm7, %v1094_v13, %v1092_v27 }
  0xfe   : > { %v1097_v48 = vsub.f32 3.1415927, %v1095_v21 }
 0x100   : > { %v1098_v32 = vsel %vm1096_vm9, %v1097_v48, %v1095_v21 }
 0x101   : > { %v1102_v4 = vsel %vm1101_vm6, %v1100_v10, %v1098_v32 }
 0x102   : > { %v1106_v43 = vsel %vm1105_vm12, nan, %v1102_v4 }
 0x103   : > { %v1112_v6 = vsel %vm1111_vm15, %v1108_v22, %v1106_v43 }
 0x104   : > { %v1113_v55 = vand.u32 2147483647, %v1112_v6 }
 0x106   : > { %v1115_v29 = vor.u32 %v1114_v59, %v1113_v55 }
 0x108   : > { %1131 = vst [vmem:[%s2363_s26 + $0x78] sm:$0xff] %v1115_v29 }
 0x159   : > { %v1196_v26 = vpop.xlane.xlu0 %1195 }
 0x15a   : > { %v1197_v62 = vrot.slane %v1196_v26, 4 }
 0x15c   : > { %v1198_v14 = vmax.f32 %v1196_v26, %v1197_v62 }
 0x15e   : > { %v1199_v60 = vrot.slane %v1198_v14, 2 }
 0x160   : > { %v1200_v51 = vmax.f32 %v1198_v14, %v1199_v60 }
 0x162   : > { %v1201_v11 = vrot.slane %v1200_v51, 1 }
 0x164   : > { %v1202_v8 = vmax.f32 %v1200_v51, %v1201_v11 }
 0x166   : > { %1599 = vpush %v1202_v8 }
 0x197   : > { %s1600_s27 = spop %1599 }
 0x198   : > { %p1204_p4 = scmp.gt.f32.partialorder %s1600_s27, 1e+18 }
 0x199   : > { %v3495_v50 = vld [vmem:[#allocation32_spill] sm:$0xff] (%p1204_p4)  ;;  %v3497_v24 = vld [vmem:[#allocation33_spill] sm:$0xff] (%p1204_p4)  ;;  %v3499_v40 = vld [vmem:[#allocation34_spill] sm:$0xff] (%p1204_p4)  ;;  %vm1427_vm13 = vcmp.gt.f32.partialorder (%p1204_p4), %v2562_v38, 1e+18 }
 0x19a   : > { %1207 = sbr.rel (!%p1204_p4) target bundleno = 474 (0x1da), region = 32  ;;  %v1240_v19 = vmul.f32 (%p1204_p4), %v3495_v50, %v1798_v12  ;;  %v1256_v57 = vmul.f32 (%p1204_p4), %v3495_v50, %v1817_v25  ;;  %v3496_v52 = vld [vmem:[#allocation28_spill] sm:$0xff] (%p1204_p4)  ;;  %v1241_v45 = vmul.f32 (%p1204_p4), %v3497_v24, %v1800_v15  ;;  %v1257_v0 = vmul.f32 (%p1204_p4), %v3497_v24, %v1828_v30  ;;  %v3498_v9 = vld [vmem:[#allocation29_spill] sm:$0xff] (%p1204_p4)  ;;  %v3500_v2 = vld [vmem:[#allocation30_spill] sm:$0xff] (%p1204_p4) }
 0x19b   : > { %1684 = vlog2.f32 (%p1204_p4), %v3496_v52  ;;  %v1242_v31 = vmul.f32 (%p1204_p4), %v3499_v40, %v1802_v16  ;;  %v1258_v12 = vmul.f32 (%p1204_p4), %v3499_v40, %v1839_v35  ;;  %v3501_v42 = vld [vmem:[#allocation2_spill] sm:$0xff] (%p1204_p4)  ;;  %v3502_v7 = vld [vmem:[#allocation37_spill] sm:$0xff] (%p1204_p4)  ;;  %v3503_v53 = vld [vmem:[#allocation15_spill] sm:$0xff] (%p1204_p4)  ;;  %vm1416_vm0 = vcmp.gt.f32.partialorder (%p1204_p4), %v3496_v52, 1e+18 }
 0x19c   : > { %1686 = vlog2.f32 (%p1204_p4), %v3498_v9  ;;  %v1304_v47 = vmul.f32 (%p1204_p4), %v1240_v19, %v1240_v19  ;;  %v1320_v61 = vmul.f32 (%p1204_p4), %v1256_v57, %v1256_v57  ;;  %v1305_v49 = vmul.f32 (%p1204_p4), %v1241_v45, %v1241_v45  ;;  %v3504_v34 = vld [vmem:[#allocation31_spill] sm:$0xff] (%p1204_p4)  ;;  %v3506_v33 = vld [vmem:[#allocation41_spill] sm:$0xff] (%p1204_p4)  ;;  %v3507_v46 = vld [vmem:[#allocation16_spill] sm:$0xff] (%p1204_p4) }
 0x19d   : > { %v1321_v25 = vmul.f32 (%p1204_p4), %v1257_v0, %v1257_v0  ;;  %1688 = vlog2.f32 (%p1204_p4), %v3500_v2  ;;  %v1306_v36 = vmul.f32 (%p1204_p4), %v1242_v31, %v1242_v31  ;;  %v1322_v15 = vmul.f32 (%p1204_p4), %v1258_v12, %v1258_v12  ;;  %v3505_v35 = vld [vmem:[#allocation3_spill] sm:$0xff] (%p1204_p4)  ;;  %v3508_v39 = vld [vmem:[#allocation4_spill] sm:$0xff] (%p1204_p4)  ;;  %v3509_v54 = vld [vmem:[#allocation46_spill] sm:$0xff] (%p1204_p4) }
 0x19e   : > { %v1336_v5 = vadd.f32 (%p1204_p4), %v1320_v61, %v1304_v47  ;;  %v1243_v30 = vmul.f32 (%p1204_p4), %v3502_v7, %v3501_v42  ;;  %v1259_v17 = vmul.f32 (%p1204_p4), %v3502_v7, %v3503_v53  ;;  %1690 = vlog2.f32 (%p1204_p4), %v3504_v34  ;;  %v3510_v13 = vld [vmem:[#allocation17_spill] sm:$0xff] (%p1204_p4)  ;;  %v3511_v10 = vld [vmem:[#allocation35_spill] sm:$0xff] (%p1204_p4)  ;;  %v3512_v4 = vld [vmem:[#allocation40_spill] sm:$0xff] (%p1204_p4) }
 0x19f   : > { %v1337_v44 = vadd.f32 (%p1204_p4), %v1321_v25, %v1305_v49  ;;  %v1338_v16 = vadd.f32 (%p1204_p4), %v1322_v15, %v1306_v36  ;;  %v1244_v20 = vmul.f32 (%p1204_p4), %v3506_v33, %v3505_v35  ;;  %v1260_v56 = vmul.f32 (%p1204_p4), %v3506_v33, %v3507_v46  ;;  %v3513_v6 = vld [vmem:[#allocation5_spill] sm:$0xff] (%p1204_p4)  ;;  %v3514_v55 = vld [vmem:[#allocation48_spill] sm:$0xff] (%p1204_p4)  ;;  %v3515_v14 = vld [vmem:[#allocation18_spill] sm:$0xff] (%p1204_p4) }
 0x1a0   : > { %1692 = vlog2.f32 (%p1204_p4), %v1336_v5  ;;  %v1307_v58 = vmul.f32 (%p1204_p4), %v1243_v30, %v1243_v30  ;;  %v1323_v28 = vmul.f32 (%p1204_p4), %v1259_v17, %v1259_v17  ;;  %v1245_v27 = vmul.f32 (%p1204_p4), %v3509_v54, %v3508_v39  ;;  %v3516_v11 = vld [vmem:[#allocation45_spill] sm:$0xff] (%p1204_p4)  ;;  %v3517_v57 = vld [vmem:[#allocation6_spill] sm:$0xff] (%p1204_p4)  ;;  %v3518_v24 = vld [vmem:[#allocation51_spill] sm:$0xff] (%p1204_p4) }
 0x1a1   : > { %1694 = vlog2.f32 %v1337_v44  ;;  %v1308_v41 = vmul.f32 %v1244_v20, %v1244_v20  ;;  %v1261_v21 = vmul.f32 %v3509_v54, %v3510_v13  ;;  %v1324_v32 = vmul.f32 %v1260_v56, %v1260_v56  ;;  %v3519_v0 = vld [vmem:[#allocation19_spill] sm:$0xff]  ;;  %v3521_v25 = vld [vmem:[#allocation38_spill] sm:$0xff]  ;;  %v3523_v30 = vld [vmem:[#allocation20_spill] sm:$0xff] }
 0x1a2   : > { %1696 = vlog2.f32 %v1338_v16  ;;  %v1339_v48 = vadd.f32 %v1323_v28, %v1307_v58  ;;  %v1309_v43 = vmul.f32 %v1245_v27, %v1245_v27  ;;  %v1246_v29 = vmul.f32 %v3514_v55, %v3513_v6  ;;  %v3520_v49 = vld [vmem:[#allocation7_spill] sm:$0xff]  ;;  %v3522_v42 = vld [vmem:[#allocation50_spill] sm:$0xff]  ;;  %v3524_v46 = vld [vmem:[#allocation8_spill] sm:$0xff] }
 0x1a3   : > { %1698 = vlog2.f32 %v3511_v10  ;;  %v1325_v59 = vmul.f32 %v1261_v21, %v1261_v21  ;;  %v1340_v62 = vadd.f32 %v1324_v32, %v1308_v41  ;;  %v1262_v60 = vmul.f32 %v3514_v55, %v3515_v14  ;;  %v3525_v56 = vld [vmem:[#allocation49_spill] sm:$0xff]  ;;  %v3526_v13 = vld [vmem:[#allocation47_spill] sm:$0xff]  ;;  %v3528_v14 = vld [vmem:[#allocation36_spill] sm:$0xff] }
 0x1a4   : > { %1700 = vlog2.f32 %v3512_v4  ;;  %v1310_v8 = vmul.f32 %v1246_v29, %v1246_v29  ;;  %v1247_v45 = vmul.f32 %v3518_v24, %v3517_v57  ;;  %vm1417_vm3 = vcmp.gt.f32.partialorder %v3498_v9, 1e+18  ;;  %v3527_v21 = vld [vmem:[#allocation21_spill] sm:$0xff] }
 0x1a5   : > { %v1685_v22 = vpop.eup %1684  ;;  %1702 = vlog2.f32 %v1339_v48  ;;  %v1341_v51 = vadd.f32 %v1325_v59, %v1309_v43  ;;  %v1326_v19 = vmul.f32 %v1262_v60, %v1262_v60  ;;  %vm1418_vm10 = vcmp.gt.f32.partialorder %v3500_v2, 1e+18  ;;  %v1436_v2 = vld [vmem:[%s1990_s23 + $0x20] sm:$0xff] }
 0x1a6   : > { %v1687_v26 = vpop.eup %1686  ;;  %1704 = vlog2.f32 %v3516_v11  ;;  %v1263_v47 = vmul.f32 %v3518_v24, %v3519_v0  ;;  %v1273_v40 = vmul.f32 0.6931472, %v1685_v22  ;;  %v1311_v12 = vmul.f32 %v1247_v45, %v1247_v45  ;;  %v1432_v22 = vld [vmem:[%s1990_s23] sm:$0xff] }
 0x1a7   : > { %v1689_v50 = vpop.eup %1688  ;;  %1706 = vlog2.f32 %v1340_v62  ;;  %v1342_v31 = vadd.f32 %v1326_v19, %v1310_v8  ;;  %v1248_v5 = vmul.f32 %v3521_v25, %v3520_v49  ;;  %v1275_v15 = vmul.f32 0.6931472, %v1687_v26  ;;  %v1433_v26 = vld [vmem:[%s1990_s23 + $0x8] sm:$0xff] }
 0x1a8   : > { %1708 = vlog2.f32 %v1341_v51  ;;  %v1691_v61 = vpop.eup %1690  ;;  %v1327_v7 = vmul.f32 %v1263_v47, %v1263_v47  ;;  %v1264_v44 = vmul.f32 %v3521_v25, %v3523_v30  ;;  %v1277_v16 = vmul.f32 0.6931472, %v1689_v50  ;;  %v1434_v50 = vld [vmem:[%s1990_s23 + $0x10] sm:$0xff] }
 0x1a9   : > { %1710 = vlog2.f32 %v3522_v42  ;;  %vm1419_vm11 = vcmp.gt.f32.partialorder %v3504_v34, 1e+18  ;;  %v1312_v58 = vmul.f32 %v1248_v5, %v1248_v5  ;;  %v1249_v41 = vmul.f32 %v3525_v56, %v3524_v46 }
 0x1aa   : > { %v1693_v36 = vpop.eup %1692  ;;  %1712 = vlog2.f32 %v1342_v31  ;;  %v1343_v20 = vadd.f32 %v1327_v7, %v1311_v12  ;;  %v1328_v28 = vmul.f32 %v1264_v44, %v1264_v44  ;;  %vm1420_vm4 = vcmp.gt.f32.partialorder %v3511_v10, 1e+18  ;;  %v3530_v7 = vld [vmem:[#allocation42_spill] sm:$0xff] }
 0x1ab   : > { %v1695_v53 = vpop.eup %1694  ;;  %v1353_v17 = vmul.f32 0.6931472, %v1693_v36  ;;  %1714 = vlog2.f32 %v3526_v13  ;;  %v1265_v48 = vmul.f32 %v3525_v56, %v3527_v21  ;;  %v1279_v59 = vmul.f32 0.6931472, %v1691_v61  ;;  %v1435_v36 = vld [vmem:[%s1990_s23 + $0x18] sm:$0xff]  ;;  %v3531_v44 = vld [vmem:[#allocation22_spill] sm:$0xff] }
 0x1ac   : > { %v1697_v35 = vpop.eup %1696  ;;  %v1355_v33 = vmul.f32 0.6931472, %v1695_v53  ;;  %vm1421_vm1 = vcmp.gt.f32.partialorder %v3512_v4, 1e+18  ;;  %1716 = vlog2.f32 %v1343_v20  ;;  %v1344_v6 = vadd.f32 %v1328_v28, %v1312_v58  ;;  %v1437_v56 = vld [vmem:[%s1990_s23 + $0x28] sm:$0xff] }
 0x1ad   : > { %v1699_v39 = vpop.eup %1698  ;;  %v1384_v54 = vmul.f32 0.5, %v1353_v17  ;;  %v1357_v27 = vmul.f32 0.6931472, %v1697_v35  ;;  %1718 = vlog2.f32 %v3528_v14  ;;  %v1313_v60 = vmul.f32 %v1249_v41, %v1249_v41 }
 0x1ae   : > { %v1701_v32 = vpop.eup %1700  ;;  %v1385_v43 = vmul.f32 0.5, %v1355_v33  ;;  %1720 = vlog2.f32 %v1344_v6  ;;  %v1329_v57 = vmul.f32 %v1265_v48, %v1265_v48  ;;  %v1281_v47 = vmul.f32 0.6931472, %v1699_v39  ;;  %v3532_v48 = vld [vmem:[#allocation10_spill] sm:$0xff] }
 0x1af   : > { %v1703_v55 = vpop.eup %1702  ;;  %v1400_v29 = vadd.f32 %v1384_v54, %v1273_v40  ;;  %v1386_v62 = vmul.f32 0.5, %v1357_v27  ;;  %v1283_v61 = vmul.f32 0.6931472, %v1701_v32  ;;  %v1266_v53 = vmul.f32 %v3530_v7, %v3531_v44  ;;  %v3533_v32 = vld [vmem:[#allocation43_spill] sm:$0xff] }
 0x1b0   : > { %v1705_v51 = vpop.eup %1704  ;;  %v1401_v8 = vadd.f32 %v1385_v43, %v1275_v15  ;;  %v1359_v19 = vmul.f32 0.6931472, %v1703_v55  ;;  %v1345_v25 = vadd.f32 %v1329_v57, %v1313_v60  ;;  %v3529_v15 = vld [vmem:[#allocation9_spill] sm:$0xff]  ;;  %vm1422_vm7 = vcmp.gt.f32.partialorder %v3516_v11, 1e+18  ;;  %v3534_v43 = vld [vmem:[#allocation23_spill] sm:$0xff] }
 0x1b1   : > { %v1707_v24 = vpop.eup %1706  ;;  %v1448_v45 = vsel %vm1416_vm0, %v1400_v29, %v1432_v22  ;;  %v1402_v0 = vadd.f32 %v1386_v62, %v1277_v16  ;;  %v1250_v30 = vmul.f32 %v3530_v7, %v3529_v15  ;;  %v1285_v33 = vmul.f32 0.6931472, %v1705_v51  ;;  %v3535_v29 = vld [vmem:[#allocation39_spill] sm:$0xff]  ;;  %v1438_v51 = vld [vmem:[%s1990_s23 + $0x30] sm:$0xff] }
 0x1b2   : > { %v1709_v40 = vpop.eup %1708  ;;  %1464 = vst [vmem:[%s1990_s23] sm:$0xff] %v1448_v45  ;;  %v1449_v31 = vsel %vm1417_vm3, %v1401_v8, %v1433_v26  ;;  %v1387_v12 = vmul.f32 0.5, %v1359_v19  ;;  %v1361_v49 = vmul.f32 0.6931472, %v1707_v24  ;;  %1722 = vlog2.f32 %v1345_v25  ;;  %v3540_v11 = vld [vmem:[#allocation52_spill] sm:$0xff] }
 0x1b3   : > { %1465 = vst [vmem:[%s1990_s23 + $0x8] sm:$0xff] %v1449_v31  ;;  %v1450_v5 = vsel %vm1418_vm10, %v1402_v0, %v1434_v50  ;;  %v1363_v52 = vmul.f32 0.6931472, %v1709_v40  ;;  %v1711_v17 = vpop.eup %1710  ;;  %vm1423_vm2 = vcmp.gt.f32.partialorder %v3522_v42, 1e+18  ;;  %v1314_v20 = vmul.f32 %v1250_v30, %v1250_v30  ;;  %v3538_v40 = vld [vmem:[#allocation24_spill] sm:$0xff] }
 0x1b4   : > { %1466 = vst [vmem:[%s1990_s23 + $0x10] sm:$0xff] %v1450_v5  ;;  %v1403_v9 = vadd.f32 %v1387_v12, %v1279_v59  ;;  %v1388_v16 = vmul.f32 0.5, %v1361_v49  ;;  %v1713_v58 = vpop.eup %1712  ;;  %v1330_v39 = vmul.f32 %v1266_v53, %v1266_v53  ;;  %v1287_v21 = vmul.f32 0.6931472, %v1711_v17  ;;  %v1439_v49 = vld [vmem:[%s1990_s23 + $0x38] sm:$0xff]  ;;  %v1440_v30 = vld [vmem:[%s1990_s23 + $0x40] sm:$0xff] }
 0x1b5   : > { %v1389_v35 = vmul.f32 0.5, %v1363_v52  ;;  %v1365_v41 = vmul.f32 0.6931472, %v1713_v58  ;;  %v1715_v54 = vpop.eup %1714  ;;  %v1251_v22 = vmul.f32 %v3533_v32, %v3532_v48  ;;  %v1267_v59 = vmul.f32 %v3533_v32, %v3534_v43  ;;  %v3539_v53 = vld [vmem:[#allocation12_spill] sm:$0xff]  ;;  %v1441_v42 = vld [vmem:[%s1990_s23 + $0x48] sm:$0xff]  ;;  %v3544_v43 = vld [vmem:[#allocation14_spill] sm:$0xff] }
 0x1b6   : > { %v1451_v28 = vsel %vm1419_vm11, %v1403_v9, %v1435_v36  ;;  %v1404_v46 = vadd.f32 %v1388_v16, %v1281_v47  ;;  %v1717_v6 = vpop.eup %1716  ;;  %1724 = vlog2.f32 %v3535_v29  ;;  %v1346_v26 = vadd.f32 %v1330_v39, %v1314_v20  ;;  %v3536_v47 = vld [vmem:[#allocation11_spill] sm:$0xff]  ;;  %v3541_v9 = vld [vmem:[#allocation25_spill] sm:$0xff] }
 0x1b7   : > { %1467 = vst [vmem:[%s1990_s23 + $0x18] sm:$0xff] %v1451_v28  ;;  %v1405_v27 = vadd.f32 %v1389_v35, %v1283_v61  ;;  %v1390_v55 = vmul.f32 0.5, %v1365_v41  ;;  %v1719_v62 = vpop.eup %1718  ;;  %v1367_v8 = vmul.f32 0.6931472, %v1717_v6  ;;  %1726 = vlog2.f32 %v2562_v38  ;;  %v3537_v61 = vld [vmem:[#allocation44_spill] sm:$0xff]  ;;  %v3542_v41 = vld [vmem:[#allocation13_spill] sm:$0xff] }
 0x1b8   : > { %v1452_v34 = vsel %vm1420_vm4, %v1404_v46, %v1436_v2  ;;  %v1315_v50 = vmul.f32 %v1251_v22, %v1251_v22  ;;  %v1721_v19 = vpop.eup %1720  ;;  %v1289_v57 = vmul.f32 0.6931472, %v1715_v54  ;;  %1728 = vlog2.f32 %v1346_v26  ;;  %v3545_v6 = vld [vmem:[#allocation27_spill] sm:$0xff] }
 0x1b9   : > { %1468 = vst [vmem:[%s1990_s23 + $0x20] sm:$0xff] %v1452_v34  ;;  %v1453_v60 = vsel %vm1421_vm1, %v1405_v27, %v1437_v56  ;;  %v1406_v10 = vadd.f32 %v1390_v55, %v1285_v33  ;;  %v1331_v24 = vmul.f32 %v1267_v59, %v1267_v59  ;;  %v1391_v45 = vmul.f32 0.5, %v1367_v8 }
 0x1ba   : > { %1469 = vst [vmem:[%s1990_s23 + $0x28] sm:$0xff] %v1453_v60  ;;  %v1369_v0 = vmul.f32 0.6931472, %v1721_v19  ;;  %v1252_v4 = vmul.f32 %v3537_v61, %v3536_v47  ;;  %v1268_v31 = vmul.f32 %v3537_v61, %v3538_v40  ;;  %vm1424_vm5 = vcmp.gt.f32.partialorder %v3526_v13, 1e+18  ;;  %v1443_v40 = vld [vmem:[%s1990_s23 + $0x58] sm:$0xff] }
 0x1bb   : > { %v1454_v12 = vsel %vm1422_vm7, %v1406_v10, %v1438_v51  ;;  %v1347_v25 = vadd.f32 %v1331_v24, %v1315_v50  ;;  %1730 = vlog2.f32 %v2608_v23  ;;  %v1407_v5 = vadd.f32 %v1391_v45, %v1287_v21  ;;  %v3543_v21 = vld [vmem:[#allocation26_spill] sm:$0xff]  ;;  %v1442_v10 = vld [vmem:[%s1990_s23 + $0x50] sm:$0xff] }
 0x1bc   : > { %1470 = vst [vmem:[%s1990_s23 + $0x30] sm:$0xff] %v1454_v12  ;;  %v1392_v36 = vmul.f32 0.5, %v1369_v0  ;;  %v1316_v52 = vmul.f32 %v1252_v4, %v1252_v4  ;;  %v1332_v15 = vmul.f32 %v1268_v31, %v1268_v31  ;;  %v1723_v7 = vpop.eup %1722  ;;  %v1291_v44 = vmul.f32 0.6931472, %v1719_v62 }
 0x1bd   : > { %1732 = vlog2.f32 %v1347_v25  ;;  %v1253_v17 = vmul.f32 %v3540_v11, %v3539_v53  ;;  %v1269_v16 = vmul.f32 %v3540_v11, %v3541_v9  ;;  %v1455_v58 = vsel %vm1423_vm2, %v1407_v5, %v1439_v49  ;;  %v1445_v9 = vld [vmem:[%s1990_s23 + $0x68] sm:$0xff] }
 0x1be   : > { %v1408_v2 = vadd.f32 %v1392_v36, %v1289_v57  ;;  %v1371_v35 = vmul.f32 0.6931472, %v1723_v7  ;;  %v1348_v33 = vadd.f32 %v1332_v15, %v1316_v52  ;;  %1471 = vst [vmem:[%s1990_s23 + $0x38] sm:$0xff] %v1455_v58  ;;  %v1254_v39 = vmul.f32 %v2935_v3, %v3542_v41  ;;  %v1444_v36 = vld [vmem:[%s1990_s23 + $0x60] sm:$0xff] }
 0x1bf   : > { %v1317_v20 = vmul.f32 %v1253_v17, %v1253_v17  ;;  %v1333_v28 = vmul.f32 %v1269_v16, %v1269_v16  ;;  %vm1425_vm8 = vcmp.gt.f32.partialorder %v3528_v14, 1e+18  ;;  %v1270_v48 = vmul.f32 %v2935_v3, %v3543_v21 }
 0x1c0   : > { %v1456_v46 = vsel %vm1424_vm5, %v1408_v2, %v1440_v30  ;;  %v1393_v56 = vmul.f32 0.5, %v1371_v35  ;;  %1734 = vlog2.f32 %v1348_v33  ;;  %v1725_v54 = vpop.eup %1724  ;;  %v1318_v22 = vmul.f32 %v1254_v39, %v1254_v39 }
 0x1c1   : > { %1472 = vst [vmem:[%s1990_s23 + $0x40] sm:$0xff] %v1456_v46  ;;  %1736 = vlog2.f32 %v2668_v18  ;;  %v1349_v27 = vadd.f32 %v1333_v28, %v1317_v20  ;;  %v1727_v32 = vpop.eup %1726  ;;  %v1255_v59 = vmul.f32 %v3009_v63, %v3544_v43  ;;  %v1271_v34 = vmul.f32 %v3009_v63, %v3545_v6  ;;  %v1446_v46 = vld [vmem:[%s1990_s23 + $0x70] sm:$0xff] }
 0x1c2   : > { %v1409_v13 = vadd.f32 %v1393_v56, %v1291_v44  ;;  %v1729_v55 = vpop.eup %1728  ;;  %v1334_v14 = vmul.f32 %v1270_v48, %v1270_v48  ;;  %v1293_v62 = vmul.f32 0.6931472, %v1725_v54  ;;  %vm1426_vm9 = vcmp.gt.f32.partialorder %v3535_v29, 1e+18 }
 0x1c3   : > { %1738 = vlog2.f32 %v1349_v27  ;;  %v1373_v60 = vmul.f32 0.6931472, %v1729_v55  ;;  %v1319_v51 = vmul.f32 %v1255_v59, %v1255_v59  ;;  %v1335_v50 = vmul.f32 %v1271_v34, %v1271_v34 }
 0x1c4   : > { %v1457_v26 = vsel %vm1425_vm8, %v1409_v13, %v1441_v42  ;;  %1740 = vlog2.f32 %v2844_v37  ;;  %v1350_v3 = vadd.f32 %v1334_v14, %v1318_v22  ;;  %v1295_v45 = vmul.f32 0.6931472, %v1727_v32 }
 0x1c5   : > { %v1731_v8 = vpop.eup %1730  ;;  %1473 = vst [vmem:[%s1990_s23 + $0x48] sm:$0xff] %v1457_v26  ;;  %v1394_v19 = vmul.f32 0.5, %v1373_v60  ;;  %1742 = vlog2.f32 %v2956_v1  ;;  %v1351_v57 = vadd.f32 %v1335_v50, %v1319_v51  ;;  %vm1428_vm14 = vcmp.gt.f32.partialorder %v2608_v23, 1e+18 }
 0x1c6   : > { %1744 = vlog2.f32 %v1350_v3  ;;  %v1297_v12 = vmul.f32 0.6931472, %v1731_v8  ;;  %vm1429_vm6 = vcmp.gt.f32.partialorder %v2668_v18, 1e+18  ;;  %vm1430_vm12 = vcmp.gt.f32.partialorder %v2844_v37, 1e+18 }
 0x1c7   : > { %v1733_v63 = vpop.eup %1732  ;;  %v1410_v24 = vadd.f32 %v1394_v19, %v1293_v62  ;;  %1746 = vlog2.f32 %v1351_v57  ;;  %vm1431_vm15 = vcmp.gt.f32.partialorder %v2956_v1, 1e+18  ;;  %v1447_v18 = vld [vmem:[%s1990_s23 + $0x78] sm:$0xff] }
 0x1c8   : > { %v1375_v0 = vmul.f32 0.6931472, %v1733_v63 }
 0x1c9   : > { %v1458_v61 = vsel %vm1426_vm9, %v1410_v24, %v1442_v10 }
 0x1ca   : > { %v1735_v47 = vpop.eup %1734  ;;  %v1395_v4 = vmul.f32 0.5, %v1375_v0  ;;  %1474 = vst [vmem:[%s1990_s23 + $0x50] sm:$0xff] %v1458_v61 }
 0x1cb   : > { %v1737_v31 = vpop.eup %1736  ;;  %v1377_v49 = vmul.f32 0.6931472, %v1735_v47 }
 0x1cc   : > { %v1411_v29 = vadd.f32 %v1395_v4, %v1295_v45  ;;  %v1299_v15 = vmul.f32 0.6931472, %v1737_v31 }
 0x1cd   : > { %v1739_v25 = vpop.eup %1738  ;;  %v1396_v5 = vmul.f32 0.5, %v1377_v49 }
 0x1ce   : > { %v1459_v52 = vsel %vm1427_vm13, %v1411_v29, %v1443_v40  ;;  %v1379_v7 = vmul.f32 0.6931472, %v1739_v25  ;;  %v1741_v30 = vpop.eup %1740 }
 0x1cf   : > { %1475 = vst [vmem:[%s1990_s23 + $0x58] sm:$0xff] %v1459_v52  ;;  %v1412_v44 = vadd.f32 %v1396_v5, %v1297_v12  ;;  %v1743_v53 = vpop.eup %1742  ;;  %v1301_v58 = vmul.f32 0.6931472, %v1741_v30 }
 0x1d0   : > { %v1397_v11 = vmul.f32 0.5, %v1379_v7  ;;  %v1745_v38 = vpop.eup %1744  ;;  %v1303_v20 = vmul.f32 0.6931472, %v1743_v53 }
 0x1d1   : > { %v1460_v17 = vsel %vm1428_vm14, %v1412_v44, %v1444_v36  ;;  %v1381_v23 = vmul.f32 0.6931472, %v1745_v38  ;;  %v1747_v2 = vpop.eup %1746 }
 0x1d2   : > { %1476 = vst [vmem:[%s1990_s23 + $0x60] sm:$0xff] %v1460_v17  ;;  %v1413_v16 = vadd.f32 %v1397_v11, %v1299_v15  ;;  %v1383_v28 = vmul.f32 0.6931472, %v1747_v2 }
 0x1d3   : > { %v1398_v33 = vmul.f32 0.5, %v1381_v23 }
 0x1d4   : > { %v1461_v35 = vsel %vm1429_vm6, %v1413_v16, %v1445_v9  ;;  %v1399_v41 = vmul.f32 0.5, %v1383_v28 }
 0x1d5   : > { %1477 = vst [vmem:[%s1990_s23 + $0x68] sm:$0xff] %v1461_v35  ;;  %v1414_v56 = vadd.f32 %v1398_v33, %v1301_v58 }
 0x1d6   : > { %v1415_v54 = vadd.f32 %v1399_v41, %v1303_v20 }
 0x1d7   : > { %v1462_v39 = vsel %vm1430_vm12, %v1414_v56, %v1446_v46 }
 0x1d8   : > { %1478 = vst [vmem:[%s1990_s23 + $0x70] sm:$0xff] %v1462_v39  ;;  %v1463_v42 = vsel %vm1431_vm15, %v1415_v54, %v1447_v18 }
 0x1d9   : > { %1479 = vst [vmem:[%s1990_s23 + $0x78] sm:$0xff] %v1463_v42 }
 0x1da PF: > { %s14_s12 = sadd.s32 1, %s1754_s12  }
 0x1db   : > { %p11_p5 = scmp.ge.s32.totalorder %s14_s12, 4  }
 0x1dd   :  { %13 = sbr.rel (!%p11_p5) target bundleno = 1 (0x1), region = 77 }

// kernel: custom-call.1
= control target key start
LH: loop header
LB: loop body
LE: loop exit
PB: predicated region body
PF: predicated region fallthrough
CT: control target
= control target key end

     0   :  { %s59_s0 = inlined_call_operand.hbm [shape: c64[2,4,16,16], index: 0, kind: input, shape index: {}]   ;;  %s60_s1 = inlined_call_operand.vmem [shape: f32[2,4,16,16], index: 1, kind: output, shape index: {}]  }
   0x1   :  { %s2_s8 = scalar_lea.hbm %s59_s0, 2048 }
   0x2   :  { %3 = vsyncpa [#allocation0], 0  ;;  %s4_s11 = sshll.u32 %s60_s1, 4  ;;  %s34_s14 = scalar_lea.hbm %s59_s0, 4096  ;;  %s5_s11 = int_to_ptr.vmem [resolvable:$true] %s4_s11 }
   0x3   :  { %p11_p0 = scmp.ne.s32.totalorder %s2_s8, %s34_s14  ;;  %p13_p1 = scmp.lt.u32.totalorder %s2_s8, %s59_s0 }
   0x4   :  { %p14_p2 = scmp.lt.u32.totalorder %s34_s14, %s34_s14  ;;  %p16_p4 = scmp.lt.u32.totalorder %s34_s14, %s2_s8 }
   0x6   :  { %p15_p3 = por %p14_p2, %p13_p1 }
   0x8   :  { %p17_p5 = por %p16_p4, %p15_p3 }
   0xa   :  { %p18_p6 = pnand %p17_p5, %p11_p0 }
   0xc   :  { %21 = shalt.err (!%p18_p6)  }
   0xd   :  { %s22_s17 = scalar_lea.vmem %s5_s11, 2048  ;;  %p27_p8 = scmp.lt.s32.totalorder %s5_s11, %s5_s11 }
   0xe   :  { %p23_p7 = scmp.ne.s32.totalorder %s5_s11, %s22_s17  ;;  %p28_p9 = scmp.lt.s32.totalorder %s22_s17, %s22_s17 }
  0x10   :  { %p29_p10 = por %p28_p9, %p27_p8 }
  0x12   :  { %p30_p11 = pnand %p29_p10, %p23_p7 }
  0x14   :  { %33 = shalt.err (!%p30_p11)  }
  0x15   :  { %7 = dma.hbm_to_vmem [thread:$0]  %s2_s8, 2048, %s5_s11, [#allocation0] }
  0x16   :  { %35 = dma.done.wait [#allocation0], 2048  }
  0x17   :  { %36 = vsyncadd [#allocation0], 4294965248 }
  0x18   :  { %9 = vsyncpa [#allocation0], 1 }

// kernel: custom-call
= control target key start
LH: loop header
LB: loop body
LE: loop exit
PB: predicated region body
PF: predicated region fallthrough
CT: control target
= control target key end

     0   :  { %2 = vsyncpa [#allocation0], 0  ;;  %s61_s0 = inlined_call_operand.hbm [shape: c64[2,4,16,16], index: 0, kind: input, shape index: {}]   ;;  %s62_s1 = inlined_call_operand.vmem [shape: f32[2,4,16,16], index: 1, kind: output, shape index: {}]  }
   0x1   :  { %s3_s8 = sshll.u32 %s62_s1, 4  ;;  %s9_s11 = scalar_lea.hbm %s61_s0, 2048  ;;  %s4_s8 = int_to_ptr.vmem [resolvable:$true] %s3_s8 }
   0x2   :  { %p10_p0 = scmp.ne.s32.totalorder %s61_s0, %s9_s11  ;;  %s11_s16 = scalar_lea.hbm %s61_s0, 4096 }
   0x3   :  { %p12_p1 = scmp.lt.u32.totalorder %s11_s16, %s9_s11  ;;  %p13_p2 = scmp.lt.u32.totalorder %s9_s11, %s61_s0 }
   0x5   :  { %p14_p3 = por %p13_p2, %p12_p1 }
   0x7   :  { %p15_p4 = pnand %p14_p3, %p10_p0 }
   0x9   :  { %18 = shalt.err (!%p15_p4)  }
   0xa   :  { %s19_s1 = scalar_lea.vmem %s4_s8, 2048  ;;  %p24_p6 = scmp.lt.s32.totalorder %s4_s8, %s4_s8 }
   0xb   :  { %p20_p5 = scmp.ne.s32.totalorder %s4_s8, %s19_s1  ;;  %p25_p7 = scmp.lt.s32.totalorder %s19_s1, %s19_s1 }
   0xd   :  { %p26_p8 = por %p25_p7, %p24_p6 }
   0xf   :  { %p27_p9 = pnand %p26_p8, %p20_p5 }
  0x11   :  { %30 = shalt.err (!%p27_p9)  }
  0x12   :  { %6 = dma.hbm_to_vmem [thread:$0]  %s61_s0, 2048, %s4_s8, [#allocation0] }
  0x13   :  { %31 = dma.done.wait [#allocation0], 2048  }
  0x14   :  { %32 = vsyncadd [#allocation0], 4294965248 }
  0x15   :  { %8 = vsyncpa [#allocation0], 1 }

// kernel: custom-call.2
= control target key start
LH: loop header
LB: loop body
LE: loop exit
PB: predicated region body
PF: predicated region fallthrough
CT: control target
= control target key end

     0   :  { %s126_s0 = inlined_call_operand.vmem [shape: f32[2,4,16,16], index: 0, kind: input, shape index: {}]   ;;  %s127_s1 = inlined_call_operand.vmem [shape: f32[2,4,16,16], index: 1, kind: input, shape index: {}]   ;;  %s128_s2 = inlined_call_operand.hbm [shape: c64[2,4,16,16], index: 2, kind: output, shape index: {}]  }
   0x1   :  { %s87_s11 = scalar_lea.hbm %s128_s2, 2048 }
   0x2   :  { %4 = vsyncpa [#allocation0], 0  ;;  %s5_s14 = sshll.u32 %s126_s0, 4  ;;  %s6_s14 = int_to_ptr.vmem [resolvable:$true] %s5_s14 }
   0x3   :  { %s18_s15 = scalar_lea.vmem %s6_s14, 2048  ;;  %p23_p1 = scmp.lt.s32.totalorder %s6_s14, %s6_s14 }
   0x4   :  { %p19_p0 = scmp.ne.s32.totalorder %s6_s14, %s18_s15  ;;  %p24_p2 = scmp.lt.s32.totalorder %s18_s15, %s18_s15 }
   0x6   :  { %p25_p3 = por %p24_p2, %p23_p1 }
   0x8   :  { %p26_p4 = pnand %p25_p3, %p19_p0 }
   0xa   :  { %29 = shalt.err (!%p26_p4)  }
   0xb   :  { %p31_p5 = scmp.ne.s32.totalorder %s128_s2, %s87_s11  ;;  %s32_s0 = scalar_lea.hbm %s128_s2, 4096 }
   0xc   :  { %p33_p6 = scmp.lt.u32.totalorder %s32_s0, %s87_s11  ;;  %p34_p7 = scmp.lt.u32.totalorder %s87_s11, %s128_s2 }
   0xe   :  { %p35_p8 = por %p34_p7, %p33_p6 }
  0x10   :  { %p36_p9 = pnand %p35_p8, %p31_p5 }
  0x12   :  { %39 = shalt.err (!%p36_p9)  }
  0x13   :  { %8 = dma.vmem_to_hbm [thread:$0]  %s6_s14, 2048, %s128_s2, [#allocation0] }
  0x14   :  { %65 = dma.done.wait [#allocation0], 2048  }
  0x15   :  { %66 = vsyncadd [#allocation0], 4294965248 }
  0x16   :  { %10 = vsyncpa [#allocation0], 1 }
  0x17   :  { %11 = vsyncpa [#allocation1], 0  ;;  %s12_s28 = sshll.u32 %s127_s1, 4  ;;  %s13_s28 = int_to_ptr.vmem [resolvable:$true] %s12_s28 }
  0x18   :  { %s40_s29 = scalar_lea.vmem %s13_s28, 2048  ;;  %p45_p11 = scmp.lt.s32.totalorder %s13_s28, %s13_s28 }
  0x19   :  { %p41_p10 = scmp.ne.s32.totalorder %s13_s28, %s40_s29  ;;  %p46_p12 = scmp.lt.s32.totalorder %s40_s29, %s40_s29 }
  0x1b   :  { %p47_p13 = por %p46_p12, %p45_p11 }
  0x1d   :  { %p48_p0 = pnand %p47_p13, %p41_p10 }
  0x1f   :  { %51 = shalt.err (!%p48_p0)  }
  0x20   :  { %p53_p1 = scmp.ne.s32.totalorder %s87_s11, %s32_s0  ;;  %p56_p2 = scmp.lt.u32.totalorder %s32_s0, %s32_s0 }
  0x22   :  { %p57_p3 = por %p56_p2, %p34_p7 }
  0x24   :  { %p59_p4 = por %p57_p3, %p33_p6 }
  0x26   :  { %p60_p5 = pnand %p59_p4, %p53_p1 }
  0x28   :  { %63 = shalt.err (!%p60_p5)  }
  0x29   :  { %15 = dma.vmem_to_hbm [thread:$0]  %s13_s28, 2048, %s87_s11, [#allocation1] }
  0x2a   :  { %67 = dma.done.wait [#allocation1], 2048  }
  0x2b   :  { %68 = vsyncadd [#allocation1], 4294965248 }
  0x2c   :  { %17 = vsyncpa [#allocation1], 1 }

// kernel: _complex_forward_planar.1
= control target key start
LH: loop header
LB: loop body
LE: loop exit
PB: predicated region body
PF: predicated region fallthrough
CT: control target
= control target key end

     0   :  { %s3121_s0 = inlined_call_operand.vmem [shape: f32[8,2048], index: 0, kind: input, shape index: {}]   ;;  %s3122_s1 = inlined_call_operand.vmem [shape: f32[8,2048], index: 1, kind: input, shape index: {}]   ;;  %s3123_s2 = inlined_call_operand.vmem [shape: f32[8,2048], index: 2, kind: output, shape index: {0}]   ;;  %s3124_s3 = inlined_call_operand.vmem [shape: f32[8,2048], index: 3, kind: output, shape index: {1}]  }
   0x1   :  { %v13_v0 = vld [vmem:[%s3121_s0] sm:$0xff]  ;;  %v14_v1 = vld [vmem:[%s3121_s0 + $0x8] sm:$0xff]  ;;  %v15_v2 = vld [vmem:[%s3121_s0 + $0x10] sm:$0xff] }
   0x2   :  { %v16_v3 = vld [vmem:[%s3121_s0 + $0x18] sm:$0xff]  ;;  %v17_v4 = vld [vmem:[%s3121_s0 + $0x20] sm:$0xff]  ;;  %v18_v5 = vld [vmem:[%s3121_s0 + $0x28] sm:$0xff]  ;;  %v1496_v12 = vadd.f32 1.0, %v13_v0  ;;  %v1504_v15 = vadd.f32 1.0, %v14_v1  ;;  %v1506_v16 = vadd.f32 1.0, %v15_v2 }
   0x3   :  { %v19_v6 = vld [vmem:[%s3121_s0 + $0x30] sm:$0xff]  ;;  %v20_v7 = vld [vmem:[%s3121_s0 + $0x38] sm:$0xff]  ;;  %v21_v8 = vld [vmem:[%s3121_s0 + $0x40] sm:$0xff]  ;;  %v1508_v17 = vadd.f32 1.0, %v16_v3  ;;  %v1510_v18 = vadd.f32 1.0, %v17_v4  ;;  %v1518_v21 = vadd.f32 1.0, %v18_v5 }
   0x4   :  { %v22_v9 = vld [vmem:[%s3121_s0 + $0x48] sm:$0xff]  ;;  %v23_v10 = vld [vmem:[%s3121_s0 + $0x50] sm:$0xff]  ;;  %v24_v11 = vld [vmem:[%s3121_s0 + $0x58] sm:$0xff]  ;;  %v1520_v22 = vadd.f32 1.0, %v19_v6  ;;  %v1522_v23 = vadd.f32 1.0, %v20_v7  ;;  %v1524_v24 = vadd.f32 1.0, %v21_v8  ;;  %v61_v29 = vmul.f32 %v1496_v12, %v1496_v12 }
   0x5   :  { %v25_v13 = vld [vmem:[%s3121_s0 + $0x60] sm:$0xff]  ;;  %v26_v14 = vld [vmem:[%s3121_s0 + $0x68] sm:$0xff]  ;;  %3233 = vst [vmem:[#allocation2_spill] sm:$0xff] %v1508_v17  ;;  %3234 = vst [vmem:[#allocation3_spill] sm:$0xff] %v1510_v18  ;;  %v1531_v26 = vadd.f32 1.0, %v22_v9  ;;  %v1533_v27 = vadd.f32 1.0, %v23_v10  ;;  %v62_v33 = vmul.f32 %v1504_v15, %v1504_v15  ;;  %v63_v38 = vmul.f32 %v1506_v16, %v1506_v16 }
   0x6   :  { %v27_v19 = vld [vmem:[%s3121_s0 + $0x70] sm:$0xff]  ;;  %v28_v20 = vld [vmem:[%s3121_s0 + $0x78] sm:$0xff]  ;;  %3235 = vst [vmem:[#allocation4_spill] sm:$0xff] %v1518_v21  ;;  %3236 = vst [vmem:[#allocation5_spill] sm:$0xff] %v1520_v22  ;;  %v1535_v28 = vadd.f32 1.0, %v24_v11  ;;  %v1544_v31 = vadd.f32 1.0, %v25_v13  ;;  %v64_v41 = vmul.f32 %v1508_v17, %v1508_v17  ;;  %v65_v42 = vmul.f32 %v1510_v18, %v1510_v18 }
   0x7   :  { %3237 = vst [vmem:[#allocation6_spill] sm:$0xff] %v1522_v23  ;;  %3238 = vst [vmem:[#allocation7_spill] sm:$0xff] %v1524_v24  ;;  %v1529_v25 = vld [vmem:[%s3122_s1] sm:$0xff]  ;;  %v1542_v30 = vld [vmem:[%s3122_s1 + $0x8] sm:$0xff]  ;;  %v1546_v32 = vadd.f32 1.0, %v26_v14  ;;  %v1557_v36 = vadd.f32 1.0, %v27_v19  ;;  %v66_v43 = vmul.f32 %v1518_v21, %v1518_v21  ;;  %v67_v46 = vmul.f32 %v1520_v22, %v1520_v22 }
   0x8   :  { %3239 = vst [vmem:[#allocation8_spill] sm:$0xff] %v1531_v26  ;;  %3240 = vst [vmem:[#allocation9_spill] sm:$0xff] %v1533_v27  ;;  %v77_v34 = vmul.f32 %v1529_v25, %v1529_v25  ;;  %v1555_v35 = vld [vmem:[%s3122_s1 + $0x10] sm:$0xff]  ;;  %v1559_v37 = vadd.f32 1.0, %v28_v20  ;;  %v78_v39 = vmul.f32 %v1542_v30, %v1542_v30  ;;  %v1568_v40 = vld [vmem:[%s3122_s1 + $0x18] sm:$0xff]  ;;  %v68_v47 = vmul.f32 %v1522_v23, %v1522_v23 }
   0x9   :  { %3241 = vst [vmem:[#allocation10_spill] sm:$0xff] %v1535_v28  ;;  %3242 = vst [vmem:[#allocation11_spill] sm:$0xff] %v1544_v31  ;;  %v79_v44 = vmul.f32 %v1555_v35, %v1555_v35  ;;  %v1581_v45 = vld [vmem:[%s3122_s1 + $0x20] sm:$0xff]  ;;  %v69_v48 = vmul.f32 %v1524_v24, %v1524_v24  ;;  %v80_v49 = vmul.f32 %v1568_v40, %v1568_v40  ;;  %v1594_v50 = vld [vmem:[%s3122_s1 + $0x28] sm:$0xff]  ;;  %vm203_vm15 = vcmp.lt.s32.totalorder %v1496_v12, 0 }
   0xa   :  { %3243 = vst [vmem:[#allocation12_spill] sm:$0xff] %v1546_v32  ;;  %3244 = vst [vmem:[#allocation13_spill] sm:$0xff] %v1557_v36  ;;  %v1599_v51 = vld [vmem:[%s3122_s1 + $0x30] sm:$0xff]  ;;  %v70_v52 = vmul.f32 %v1531_v26, %v1531_v26  ;;  %v71_v53 = vmul.f32 %v1533_v27, %v1533_v27  ;;  %v81_v54 = vmul.f32 %v1581_v45, %v1581_v45  ;;  %v1616_v60 = vld [vmem:[%s3122_s1 + $0x38] sm:$0xff] }
   0xb   :  { %3245 = vst [vmem:[#allocation14_spill] sm:$0xff] %v1559_v37  ;;  %3246 = vst [vmem:[#allocation15_spill] sm:$0xff] %v1568_v40  ;;  %v93_v55 = vadd.f32 %v77_v34, %v61_v29  ;;  %v72_v56 = vmul.f32 %v1535_v28, %v1535_v28  ;;  %v82_v57 = vmul.f32 %v1594_v50, %v1594_v50  ;;  %v1621_v61 = vld [vmem:[%s3122_s1 + $0x40] sm:$0xff]  ;;  %v1632_v2 = vld [vmem:[%s3122_s1 + $0x48] sm:$0xff]  ;;  %v1670_v34 = vand.u32 2147483647, %v1529_v25 }
   0xc   :  { %3247 = vst [vmem:[#allocation16_spill] sm:$0xff] %v1581_v45  ;;  %3248 = vst [vmem:[#allocation17_spill] sm:$0xff] %v1594_v50  ;;  %v83_v58 = vmul.f32 %v1599_v51, %v1599_v51  ;;  %v94_v59 = vadd.f32 %v78_v39, %v62_v33  ;;  %v73_v62 = vmul.f32 %v1544_v31, %v1544_v31  ;;  %v1637_v3 = vld [vmem:[%s3122_s1 + $0x50] sm:$0xff]  ;;  %v1648_v8 = vld [vmem:[%s3122_s1 + $0x58] sm:$0xff]  ;;  %v1667_v33 = vand.u32 2147483647, %v1496_v12 }
   0xd   :  { %3249 = vst [vmem:[#allocation18_spill] sm:$0xff] %v1599_v51  ;;  %3250 = vst [vmem:[#allocation19_spill] sm:$0xff] %v1616_v60  ;;  %v74_v63 = vmul.f32 %v1546_v32, %v1546_v32  ;;  %v75_v0 = vmul.f32 %v1557_v36, %v1557_v36  ;;  %v95_v1 = vadd.f32 %v79_v44, %v63_v38  ;;  %1301 = vlog2.f32 %v93_v55  ;;  %v1659_v20 = vld [vmem:[%s3122_s1 + $0x60] sm:$0xff]  ;;  %v1664_v29 = vld [vmem:[%s3122_s1 + $0x68] sm:$0xff] }
   0xe   :  { %3251 = vst [vmem:[#allocation20_spill] sm:$0xff] %v1621_v61  ;;  %3252 = vst [vmem:[#allocation21_spill] sm:$0xff] %v1632_v2  ;;  %v76_v4 = vmul.f32 %v1559_v37, %v1559_v37  ;;  %v84_v5 = vmul.f32 %v1616_v60, %v1616_v60  ;;  %v85_v6 = vmul.f32 %v1621_v61, %v1621_v61  ;;  %1303 = vlog2.f32 %v94_v59  ;;  %v1677_v38 = vld [vmem:[%s3122_s1 + $0x70] sm:$0xff] }
   0xf   :  { %3253 = vst [vmem:[#allocation22_spill] sm:$0xff] %v1637_v3  ;;  %v96_v7 = vadd.f32 %v80_v49, %v64_v41  ;;  %3254 = vst [vmem:[#allocation23_spill] sm:$0xff] %v1648_v8  ;;  %v86_v9 = vmul.f32 %v1632_v2, %v1632_v2  ;;  %v87_v10 = vmul.f32 %v1637_v3, %v1637_v3  ;;  %1305 = vlog2.f32 %v95_v1 }
  0x10   :  { %v97_v11 = vadd.f32 %v81_v54, %v65_v42  ;;  %v88_v13 = vmul.f32 %v1648_v8, %v1648_v8  ;;  %v98_v14 = vadd.f32 %v82_v57, %v66_v43  ;;  %v99_v19 = vadd.f32 %v83_v58, %v67_v46  ;;  %3255 = vst [vmem:[#allocation24_spill] sm:$0xff] %v1659_v20  ;;  %v1686_v43 = vld [vmem:[%s3122_s1 + $0x78] sm:$0xff] }
  0x11   :  { %3256 = vst [vmem:[#allocation25_spill] sm:$0xff] %v1664_v29  ;;  %vm207_vm0 = vcmp.ne.f32.partialorder %v1496_v12, %v1496_v12  ;;  %3257 = vst [vmem:[#allocation26_spill] sm:$0xff] %v1677_v38  ;;  %v89_v39 = vmul.f32 %v1659_v20, %v1659_v20  ;;  %v90_v41 = vmul.f32 %v1664_v29, %v1664_v29  ;;  %1307 = vlog2.f32 %v96_v7 }
  0x12   :  { %v100_v42 = vadd.f32 %v84_v5, %v68_v47  ;;  %3258 = vst [vmem:[#allocation27_spill] sm:$0xff] %v1686_v43  ;;  %v91_v44 = vmul.f32 %v1677_v38, %v1677_v38  ;;  %v101_v46 = vadd.f32 %v85_v6, %v69_v48  ;;  %1309 = vlog2.f32 %v97_v11 }
  0x13   :  { %vm208_vm1 = vcmp.ne.f32.partialorder %v1529_v25, %v1529_v25  ;;  %v92_v49 = vmul.f32 %v1686_v43, %v1686_v43  ;;  %v102_v54 = vadd.f32 %v86_v9, %v70_v52  ;;  %1311 = vlog2.f32 %v98_v14 }
  0x14   :  { %vm1694_vm2 = vmor %vm207_vm0, %vm208_vm1  ;;  %v1699_v55 = vand.u32 2147483647, %v1504_v15  ;;  %v103_v57 = vadd.f32 %v87_v10, %v71_v53  ;;  %1313 = vlog2.f32 %v99_v19  ;;  %v1703_v48 = vmax.f32 %v1667_v33, %v1670_v34 }
  0x15   :  { %v1706_v58 = vand.u32 2147483647, %v1542_v30  ;;  %v104_v59 = vadd.f32 %v88_v13, %v72_v56  ;;  %1315 = vlog2.f32 %v100_v42  ;;  %vm254_vm3 = vcmp.ne.f32.partialorder %v1504_v15, %v1504_v15 }
  0x16   :  { %3261 = vst [vmem:[#allocation28_spill] sm:$0xff] %v1703_v48  ;;  %v105_v52 = vadd.f32 %v89_v39, %v73_v62  ;;  %1317 = vlog2.f32 %v101_v46  ;;  %v106_v53 = vadd.f32 %v90_v41, %v74_v63  ;;  %vm255_vm4 = vcmp.ne.f32.partialorder %v1542_v30, %v1542_v30 }
  0x17   :  { %v1712_v1 = vmax.f32 %v1699_v55, %v1706_v58  ;;  %1319 = vlog2.f32 %v102_v54  ;;  %v1302_v5 = vpop.eup %1301  ;;  %v107_v6 = vadd.f32 %v91_v44, %v75_v0  ;;  %v108_v7 = vadd.f32 %v92_v49, %v76_v4  ;;  %vm1718_vm5 = vmor %vm254_vm3, %vm255_vm4 }
  0x18   :  { %1321 = vlog2.f32 %v103_v57  ;;  %v1304_v62 = vpop.eup %1303  ;;  %v110_v10 = vmul.f32 0.6931472, %v1302_v5  ;;  %v1723_v63 = vand.u32 2147483647, %v1506_v16  ;;  %v1726_v11 = vand.u32 2147483647, %v1555_v35 }
  0x19   :  { %3262 = vst [vmem:[#allocation29_spill] sm:$0xff] %v1712_v1  ;;  %v989_v56 = vmax.f32 %v1703_v48, %v1712_v1  ;;  %1323 = vlog2.f32 %v104_v59  ;;  %v1306_v13 = vpop.eup %1305  ;;  %v112_v0 = vmul.f32 0.6931472, %v1304_v62  ;;  %vm301_vm6 = vcmp.ne.f32.partialorder %v1506_v16, %v1506_v16 }
  0x1a   :  { %1325 = vlog2.f32 %v105_v52  ;;  %v114_v14 = vmul.f32 0.6931472, %v1306_v13  ;;  %v141_v19 = vmul.f32 0.5, %v110_v10  ;;  %v1730_v44 = vmax.f32 %v1723_v63, %v1726_v11 }
  0x1b   :  { %v1308_v4 = vpop.eup %1307  ;;  %1327 = vlog2.f32 %v106_v53  ;;  %v142_v42 = vmul.f32 0.5, %v112_v0  ;;  %vm302_vm7 = vcmp.ne.f32.partialorder %v1555_v35, %v1555_v35  ;;  %vm348_vm9 = vcmp.ne.f32.partialorder %v1508_v17, %v1508_v17 }
  0x1c   :  { %v1310_v39 = vpop.eup %1309  ;;  %v116_v41 = vmul.f32 0.6931472, %v1308_v4  ;;  %1329 = vlog2.f32 %v107_v6  ;;  %3265 = vst [vmem:[#allocation30_spill] sm:$0xff] %v1730_v44  ;;  %v143_v54 = vmul.f32 0.5, %v114_v14  ;;  %157 = vst [vmem:[%s3123_s2] sm:$0xff] %v141_v19  ;;  %v1740_v53 = vmax.f32 %v1730_v44, %v989_v56 }
  0x1d   :  { %v1312_v46 = vpop.eup %1311  ;;  %v118_v49 = vmul.f32 0.6931472, %v1310_v39  ;;  %1331 = vlog2.f32 %v108_v7  ;;  %158 = vst [vmem:[%s3123_s2 + $0x8] sm:$0xff] %v142_v42  ;;  %vm1760_vm8 = vmor %vm301_vm6, %vm302_vm7  ;;  %vm349_vm10 = vcmp.ne.f32.partialorder %v1568_v40, %v1568_v40  ;;  %vm395_vm12 = vcmp.ne.f32.partialorder %v1510_v18, %v1510_v18 }
  0x1e   :  { %v1314_v57 = vpop.eup %1313  ;;  %v120_v59 = vmul.f32 0.6931472, %v1312_v46  ;;  %v144_v52 = vmul.f32 0.5, %v116_v41  ;;  %1333 = vrcp.f32 %v1703_v48  ;;  %159 = vst [vmem:[%s3123_s2 + $0x10] sm:$0xff] %v143_v54  ;;  %vm1836_vm11 = vmor %vm348_vm9, %vm349_vm10  ;;  %vm396_vm13 = vcmp.ne.f32.partialorder %v1581_v45, %v1581_v45 }
  0x1f   :  { %v1316_v5 = vpop.eup %1315  ;;  %v122_v6 = vmul.f32 0.6931472, %v1314_v57  ;;  %v145_v7 = vmul.f32 0.5, %v118_v49  ;;  %1335 = vrcp.f32 %v1712_v1  ;;  %vm1876_vm14 = vmor %vm395_vm12, %vm396_vm13  ;;  %v3275_v1 = vmov 0 }
  0x20   :  { %v1318_v62 = vpop.eup %1317  ;;  %v124_v10 = vmul.f32 0.6931472, %v1316_v5  ;;  %v146_v13 = vmul.f32 0.5, %v120_v59  ;;  %160 = vst [vmem:[%s3123_s2 + $0x18] sm:$0xff] %v144_v52  ;;  %1337 = vrcp.f32 %v1730_v44  ;;  %v1771_v52 = vand.u32 2147483647, %v1508_v17 }
  0x21   :  { %v1320_v56 = vpop.eup %1319  ;;  %v126_v0 = vmul.f32 0.6931472, %v1318_v62  ;;  %v147_v4 = vmul.f32 0.5, %v122_v6  ;;  %161 = vst [vmem:[%s3123_s2 + $0x20] sm:$0xff] %v145_v7  ;;  %v175_v62 = vmin.f32 %v1667_v33, %v1670_v34  ;;  %v3276_v1 = vsel %vm1876_vm14, 4294967295, %v3275_v1 }
  0x22   :  { %v1322_v14 = vpop.eup %1321  ;;  %v128_v19 = vmul.f32 0.6931472, %v1320_v56  ;;  %v148_v39 = vmul.f32 0.5, %v124_v10  ;;  %162 = vst [vmem:[%s3123_s2 + $0x28] sm:$0xff] %v146_v13  ;;  %v1779_v10 = vand.u32 2147483647, %v1568_v40  ;;  %vm442_vm1 = vcmp.ne.f32.partialorder %v1518_v21, %v1518_v21 }
  0x23   :  { %v1324_v42 = vpop.eup %1323  ;;  %v130_v46 = vmul.f32 0.6931472, %v1322_v14  ;;  %v149_v49 = vmul.f32 0.5, %v126_v0  ;;  %163 = vst [vmem:[%s3123_s2 + $0x30] sm:$0xff] %v147_v4  ;;  %v222_v4 = vmin.f32 %v1699_v55, %v1706_v58  ;;  %3277 = vst [vmem:[#allocation36_spill] sm:$0xff] %v3276_v1  ;;  %vm200_vm0 = vcmp.lt.f32.partialorder %v1496_v12, 0.0 }
  0x24   :  { %v1326_v54 = vpop.eup %1325  ;;  %v132_v57 = vmul.f32 0.6931472, %v1324_v42  ;;  %v150_v59 = vmul.f32 0.5, %v128_v19  ;;  %164 = vst [vmem:[%s3123_s2 + $0x38] sm:$0xff] %v148_v39  ;;  %v269_v42 = vmin.f32 %v1723_v63, %v1726_v11  ;;  %v316_v29 = vmin.f32 %v1771_v52, %v1779_v10 }
  0x25   :  { %v1328_v5 = vpop.eup %1327  ;;  %v134_v6 = vmul.f32 0.6931472, %v1326_v54  ;;  %v151_v7 = vmul.f32 0.5, %v130_v46  ;;  %165 = vst [vmem:[%s3123_s2 + $0x40] sm:$0xff] %v149_v49  ;;  %v1793_v46 = vmax.f32 %v1771_v52, %v1779_v10  ;;  %v1884_v48 = vand.u32 2147483647, %v1518_v21 }
  0x26   :  { %v1330_v13 = vpop.eup %1329  ;;  %v136_v56 = vmul.f32 0.6931472, %v1328_v5  ;;  %v152_v0 = vmul.f32 0.5, %v132_v57  ;;  %166 = vst [vmem:[%s3123_s2 + $0x48] sm:$0xff] %v150_v59  ;;  %v3157_v32 = vmov 0.0   ;;  %vm443_vm3 = vcmp.ne.f32.partialorder %v1594_v50, %v1594_v50 }
  0x27   :  { %v1332_v14 = vpop.eup %1331  ;;  %v138_v19 = vmul.f32 0.6931472, %v1330_v13  ;;  %v153_v39 = vmul.f32 0.5, %v134_v6  ;;  %167 = vst [vmem:[%s3123_s2 + $0x50] sm:$0xff] %v151_v7  ;;  %3268 = vst [vmem:[#allocation31_spill] sm:$0xff] %v1793_v46  ;;  %v991_v7 = vmax.f32 %v1793_v46, %v1740_v53  ;;  %1339 = vrcp.f32 %v1793_v46 }
  0x28   :  { %v1795_v49 = vpop.eup %1333  ;;  %v140_v54 = vmul.f32 0.6931472, %v1332_v14  ;;  %v154_v57 = vmul.f32 0.5, %v136_v56  ;;  %168 = vst [vmem:[%s3123_s2 + $0x58] sm:$0xff] %v152_v0  ;;  %3279 = vst [vmem:[#allocation38_spill] sm:$0xff] %v1884_v48  ;;  %vm250_vm6 = vcmp.lt.s32.totalorder %v1504_v15, 0  ;;  %vm197_vm12 = vcmp.gt.f32.partialorder %v1670_v34, %v1667_v33 }
  0x29   :  { %3269 = vst [vmem:[#allocation32_spill] sm:$0xff] %v1795_v49  ;;  %v1802_v59 = vpop.eup %1335  ;;  %v155_v5 = vmul.f32 0.5, %v138_v19  ;;  %169 = vst [vmem:[%s3123_s2 + $0x60] sm:$0xff] %v153_v39  ;;  %v1808_v6 = vmul.f32 %v1795_v49, %v175_v62  ;;  %v1848_v19 = vand.u32 2147483647, %v1510_v18  ;;  %vm3195_vm7 = vcmp.lt.f32.partialorder %v1504_v15, 0.0 }
  0x2a   :  { %3270 = vst [vmem:[#allocation33_spill] sm:$0xff] %v1802_v59  ;;  %v1813_v13 = vpop.eup %1337  ;;  %v156_v56 = vmul.f32 0.5, %v140_v54  ;;  %170 = vst [vmem:[%s3123_s2 + $0x68] sm:$0xff] %v154_v57  ;;  %v1819_v0 = vmul.f32 %v1802_v59, %v222_v4  ;;  %v1851_v39 = vand.u32 2147483647, %v1581_v45  ;;  %vm297_vm9 = vcmp.lt.s32.totalorder %v1506_v16, 0 }
  0x2b   :  { %3271 = vst [vmem:[#allocation34_spill] sm:$0xff] %v1813_v13  ;;  %171 = vst [vmem:[%s3123_s2 + $0x70] sm:$0xff] %v155_v5  ;;  %v1828_v53 = vmul.f32 %v1808_v6, %v1808_v6  ;;  %v1831_v62 = vmul.f32 %v1813_v13, %v269_v42  ;;  %v1939_v20 = vand.u32 2147483647, %v1520_v22  ;;  %vm3194_vm10 = vcmp.lt.f32.partialorder %v1506_v16, 0.0 }
  0x2c   :  { %172 = vst [vmem:[%s3123_s2 + $0x78] sm:$0xff] %v156_v56  ;;  %v1845_v14 = vmul.f32 %v1819_v0, %v1819_v0  ;;  %v1861_v5 = vmax.f32 %v1848_v19, %v1851_v39  ;;  %vm1928_vm4 = vmor %vm442_vm1, %vm443_vm3  ;;  %vm244_vm13 = vcmp.gt.f32.partialorder %v1706_v58, %v1699_v55  ;;  %vm3301_vm3 = vcmp.lt.f32.partialorder %v1504_v15, 0.0 }
  0x2d   :  { %v180_v42 = vmul.f32 0.002785687, %v1828_v53  ;;  %v1856_v54 = vmul.f32 %v1831_v62, %v1831_v62  ;;  %3286 = vst [vmem:[#allocation43_spill] sm:$0xff] %v1939_v20  ;;  %vm346_vm1 = vcmp.eq.f32.partialorder %v1568_v40, 0.0 }
  0x2e   :  { %v227_v57 = vmul.f32 0.002785687, %v1845_v14  ;;  %3274 = vst [vmem:[#allocation35_spill] sm:$0xff] %v1861_v5  ;;  %v1869_v46 = vmax.f32 %v1861_v5, %v991_v7  ;;  %1341 = vrcp.f32 %v1861_v5 }
  0x2f   :  { %v181_v56 = vadd.f32 -0.015866, %v180_v42  ;;  %v274_v43 = vmul.f32 0.002785687, %v1856_v54 }
  0x30   :  { %v228_v38 = vadd.f32 -0.015866, %v227_v57 }
  0x31   :  { %v182_v44 = vmul.f32 %v181_v56, %v1828_v53  ;;  %v275_v13 = vadd.f32 -0.015866, %v274_v43  ;;  %v1880_v57 = vpop.eup %1339  ;;  %v1887_v56 = vand.u32 2147483647, %v1594_v50  ;;  %v3291_v50 = vmov 0.7853982  }
  0x32   :  { %v229_v42 = vmul.f32 %v228_v38, %v1845_v14  ;;  %3278 = vst [vmem:[#allocation37_spill] sm:$0xff] %v1880_v57  ;;  %v1890_v5 = vmul.f32 %v1880_v57, %v316_v29  ;;  %v1975_v26 = vsel %vm3195_vm7, 2.3561945, %v3291_v50  ;;  %vm261_vm7 = vcmp.eq.s32.totalorder %v1706_v58, inf }
  0x33   :  { %v183_v59 = vadd.f32 0.04247222, %v182_v44  ;;  %v276_v7 = vmul.f32 %v275_v13, %v1856_v54  ;;  %3280 = vst [vmem:[#allocation39_spill] sm:$0xff] %v1887_v56  ;;  %v1895_v37 = vmax.f32 %v1884_v48, %v1887_v56 }
  0x34   :  { %v230_v43 = vadd.f32 0.04247222, %v229_v42  ;;  %v1901_v13 = vmul.f32 %v1890_v5, %v1890_v5  ;;  %v363_v42 = vmin.f32 %v1848_v19, %v1851_v39 }
  0x35   :  { %v184_v38 = vmul.f32 %v183_v59, %v1828_v53  ;;  %v277_v49 = vadd.f32 0.04247222, %v276_v7  ;;  %3281 = vst [vmem:[#allocation40_spill] sm:$0xff] %v1895_v37  ;;  %v993_v59 = vmax.f32 %v1895_v37, %v1869_v46  ;;  %1343 = vrcp.f32 %v1895_v37 }
  0x36   :  { %v231_v44 = vmul.f32 %v230_v43, %v1845_v14  ;;  %v321_v43 = vmul.f32 0.002785687, %v1901_v13  ;;  %v3163_v37 = vmov 0.7853982  }
  0x37   :  { %v185_v29 = vadd.f32 -0.074975304, %v184_v38  ;;  %v278_v57 = vmul.f32 %v277_v49, %v1856_v54  ;;  %v1915_v38 = vsel %vm203_vm15, 3.1415927, %v3157_v32  ;;  %v3283_v32 = vmov 0 }
  0x38   :  { %v232_v7 = vadd.f32 -0.074975304, %v231_v44  ;;  %v1919_v46 = vpop.eup %1341  ;;  %v1924_v44 = vsel %vm200_vm0, 2.3561945, %v3163_v37  ;;  %v322_v31 = vadd.f32 -0.015866, %v321_v43  ;;  %vm291_vm15 = vcmp.gt.f32.partialorder %v1726_v11, %v1723_v63 }
  0x39   :  { %v186_v36 = vmul.f32 %v185_v29, %v1828_v53  ;;  %v279_v49 = vadd.f32 -0.074975304, %v278_v57  ;;  %3282 = vst [vmem:[#allocation41_spill] sm:$0xff] %v1919_v46  ;;  %v3284_v32 = vsel %vm1928_vm4, 4294967295, %v3283_v32  ;;  %v1935_v28 = vmul.f32 %v1919_v46, %v363_v42 }
  0x3a   :  { %v233_v29 = vmul.f32 %v232_v7, %v1845_v14  ;;  %3285 = vst [vmem:[#allocation42_spill] sm:$0xff] %v3284_v32  ;;  %v323_v37 = vmul.f32 %v322_v31, %v1901_v13  ;;  %v1942_v7 = vand.u32 2147483647, %v1599_v51  ;;  %v410_v31 = vmin.f32 %v1884_v48, %v1887_v56 }
  0x3b   :  { %v187_v57 = vadd.f32 0.1064488, %v186_v36  ;;  %v280_v8 = vmul.f32 %v279_v49, %v1856_v54  ;;  %v1948_v49 = vmul.f32 %v1935_v28, %v1935_v28  ;;  %v3289_v51 = vmov 0.0  }
  0x3c   :  { %v234_v3 = vadd.f32 0.1064488, %v233_v29  ;;  %3287 = vst [vmem:[#allocation44_spill] sm:$0xff] %v1942_v7  ;;  %v324_v29 = vadd.f32 0.04247222, %v323_v37  ;;  %v1955_v46 = vmax.f32 %v1939_v20, %v1942_v7 }
  0x3d   :  { %v188_v43 = vmul.f32 %v187_v57, %v1828_v53  ;;  %v281_v36 = vadd.f32 0.1064488, %v280_v8  ;;  %v1960_v57 = vsel %vm250_vm6, 3.1415927, %v3289_v51  ;;  %v368_v32 = vmul.f32 0.002785687, %v1948_v49 }
  0x3e   :  { %v235_v42 = vmul.f32 %v234_v3, %v1845_v14  ;;  %3288 = vst [vmem:[#allocation45_spill] sm:$0xff] %v1955_v46  ;;  %v325_v37 = vmul.f32 %v324_v29, %v1901_v13  ;;  %v1966_v3 = vmax.f32 %v1955_v46, %v993_v59  ;;  %1345 = vrcp.f32 %v1955_v46 }
  0x3f   :  { %v189_v27 = vadd.f32 -0.14207031, %v188_v43  ;;  %v282_v8 = vmul.f32 %v281_v36, %v1856_v54  ;;  %v1969_v2 = vpop.eup %1343  ;;  %v369_v56 = vadd.f32 -0.015866, %v368_v32  ;;  %vm344_vm6 = vcmp.lt.s32.totalorder %v1508_v17, 0 }
  0x40   :  { %v236_v22 = vadd.f32 -0.14207031, %v235_v42  ;;  %3290 = vst [vmem:[#allocation46_spill] sm:$0xff] %v1969_v2  ;;  %v326_v29 = vadd.f32 -0.074975304, %v325_v37  ;;  %v1980_v59 = vmul.f32 %v1969_v2, %v410_v31 }
  0x41   :  { %v190_v43 = vmul.f32 %v189_v27, %v1828_v53  ;;  %v283_v36 = vadd.f32 -0.14207031, %v282_v8  ;;  %v370_v21 = vmul.f32 %v369_v56, %v1948_v49  ;;  %v1993_v37 = vsel %vm297_vm9, 3.1415927, %v3289_v51 }
  0x42   :  { %v237_v42 = vmul.f32 %v236_v22, %v1845_v14  ;;  %3292 = vst [vmem:[#allocation47_spill] sm:$0xff] %v1980_v59  ;;  %v327_v32 = vmul.f32 %v326_v29, %v1901_v13  ;;  %v1989_v22 = vmul.f32 %v1980_v59, %v1980_v59  ;;  %vm3306_vm9 = vcmp.eq.s32.totalorder %v1723_v63, inf }
  0x43   :  { %v191_v46 = vadd.f32 0.19993454, %v190_v43  ;;  %v284_v27 = vmul.f32 %v283_v36, %v1856_v54  ;;  %v371_v43 = vadd.f32 0.04247222, %v370_v21  ;;  %v2001_v36 = vsel %vm3194_vm10, 2.3561945, %v3291_v50 }
  0x44   :  { %v238_v1 = vadd.f32 0.19993454, %v237_v42  ;;  %v328_v42 = vadd.f32 0.1064488, %v327_v32  ;;  %v415_v29 = vmul.f32 0.002785687, %v1989_v22 }
  0x45   :  { %v192_v8 = vmul.f32 %v191_v46, %v1828_v53  ;;  %v285_v31 = vadd.f32 0.19993454, %v284_v27  ;;  %v372_v21 = vmul.f32 %v371_v43, %v1948_v49  ;;  %v457_v27 = vmin.f32 %v1939_v20, %v1942_v7 }
  0x46   :  { %v239_v56 = vmul.f32 %v238_v1, %v1845_v14  ;;  %v329_v32 = vmul.f32 %v328_v42, %v1901_v13  ;;  %v416_v59 = vadd.f32 -0.015866, %v415_v29  ;;  %vm3303_vm10 = vcmp.eq.f32.partialorder %v1542_v30, 0.0 }
  0x47   :  { %v193_v48 = vadd.f32 -0.33333147, %v192_v8  ;;  %v286_v46 = vmul.f32 %v285_v31, %v1856_v54  ;;  %v373_v43 = vadd.f32 -0.074975304, %v372_v21 }
  0x48   :  { %v240_v1 = vadd.f32 -0.33333147, %v239_v56  ;;  %v2018_v7 = vpop.eup %1345  ;;  %v330_v42 = vadd.f32 -0.14207031, %v329_v32 }
  0x49   :  { %v194_v8 = vmul.f32 %v193_v48, %v1828_v53  ;;  %v287_v31 = vadd.f32 -0.33333147, %v286_v46  ;;  %3293 = vst [vmem:[#allocation48_spill] sm:$0xff] %v2018_v7  ;;  %v417_v48 = vmul.f32 %v416_v59, %v1989_v22  ;;  %v2026_v53 = vand.u32 2147483647, %v1522_v23 }
  0x4a   :  { %v241_v56 = vmul.f32 %v240_v1, %v1845_v14  ;;  %v374_v14 = vmul.f32 %v373_v43, %v1948_v49  ;;  %v2035_v21 = vmul.f32 %v2018_v7, %v457_v27  ;;  %v331_v1 = vmul.f32 %v330_v42, %v1901_v13 }
  0x4b   :  { %v195_v29 = vmul.f32 %v194_v8, %v1808_v6  ;;  %v288_v46 = vmul.f32 %v287_v31, %v1856_v54  ;;  %v418_v32 = vadd.f32 0.04247222, %v417_v48  ;;  %v2041_v8 = vand.u32 2147483647, %v1616_v60 }
  0x4c   :  { %3294 = vst [vmem:[#allocation49_spill] sm:$0xff] %v2035_v21  ;;  %v242_v59 = vmul.f32 %v241_v56, %v1819_v0  ;;  %v375_v2 = vadd.f32 0.1064488, %v374_v14  ;;  %v2047_v43 = vmul.f32 %v2035_v21, %v2035_v21  ;;  %v332_v56 = vadd.f32 0.19993454, %v331_v1 }
  0x4d   :  { %v196_v54 = vadd.f32 %v195_v29, %v1808_v6  ;;  %v289_v31 = vmul.f32 %v288_v46, %v1831_v62  ;;  %v2053_v42 = vsel %vm344_vm6, 3.1415927, %v3289_v51  ;;  %v419_v48 = vmul.f32 %v418_v32, %v1989_v22 }
  0x4e   :  { %v243_v27 = vadd.f32 %v242_v59, %v1819_v0  ;;  %v376_v29 = vmul.f32 %v375_v2, %v1948_v49  ;;  %v462_v46 = vmul.f32 0.002785687, %v2047_v43  ;;  %v333_v7 = vmul.f32 %v332_v56, %v1901_v13 }
  0x4f   :  { %v198_v60 = vsub.f32 1.5707964, %v196_v54  ;;  %v290_v6 = vadd.f32 %v289_v31, %v1831_v62  ;;  %v420_v23 = vadd.f32 -0.074975304, %v419_v48  ;;  %v2062_v0 = vmax.f32 %v2026_v53, %v2041_v8 }
  0x50   :  { %v245_v14 = vsub.f32 1.5707964, %v243_v27  ;;  %v377_v62 = vadd.f32 -0.14207031, %v376_v29  ;;  %v463_v2 = vadd.f32 -0.015866, %v462_v46 }
  0x51   :  { %3295 = vst [vmem:[#allocation50_spill] sm:$0xff] %v2062_v0  ;;  %v199_v59 = vsel %vm197_vm12, %v198_v60, %v196_v54  ;;  %v292_v1 = vsub.f32 1.5707964, %v290_v6  ;;  %v334_v56 = vadd.f32 -0.33333147, %v333_v7  ;;  %v421_v48 = vmul.f32 %v420_v23, %v1989_v22 }
  0x52   :  { %v201_v32 = vsub.f32 3.1415927, %v199_v59  ;;  %v246_v31 = vsel %vm244_vm13, %v245_v14, %v243_v27  ;;  %v378_v60 = vmul.f32 %v377_v62, %v1948_v49  ;;  %v464_v54 = vmul.f32 %v463_v2, %v2047_v43 }
  0x53   :  { %v248_v20 = vsub.f32 3.1415927, %v246_v31  ;;  %v293_v21 = vsel %vm291_vm15, %v292_v1, %v290_v6  ;;  %vm3296_vm12 = vcmp.eq.s32.totalorder %v1670_v34, inf  ;;  %vm3297_vm6 = vcmp.eq.s32.totalorder %v1667_v33, inf }
  0x54   :  { %v202_v29 = vsel %vm200_vm0, %v201_v32, %v199_v59  ;;  %vm2084_vm13 = vmand %vm3297_vm6, %vm3296_vm12  ;;  %v295_v23 = vsub.f32 3.1415927, %v293_v21  ;;  %v335_v27 = vmul.f32 %v334_v56, %v1901_v13  ;;  %v422_v6 = vadd.f32 0.1064488, %v421_v48 }
  0x55   :  { %vm3300_vm0 = vcmp.eq.f32.partialorder %v1529_v25, 0.0  ;;  %v249_v33 = vsel %vm3301_vm3, %v248_v20, %v246_v31  ;;  %vm3302_vm6 = vcmp.eq.s32.totalorder %v1699_v55, inf  ;;  %v379_v13 = vadd.f32 0.19993454, %v378_v60 }
  0x56   :  { %v206_v34 = vsel %vm3300_vm0, %v1915_v38, %v202_v29  ;;  %vm262_vm12 = vmand %vm3302_vm6, %vm261_vm7  ;;  %v465_v46 = vadd.f32 0.04247222, %v464_v54  ;;  %v253_v59 = vsel %vm3303_vm10, %v1960_v57, %v249_v33  ;;  %vm3304_vm0 = vcmp.lt.f32.partialorder %v1506_v16, 0.0 }
  0x57   :  { %v210_v14 = vsel %vm1694_vm2, nan, %v206_v34  ;;  %v296_v38 = vsel %vm3304_vm0, %v295_v23, %v293_v21  ;;  %vm3305_vm3 = vcmp.eq.s32.totalorder %v1726_v11, inf  ;;  %v336_v20 = vmul.f32 %v335_v27, %v1890_v5 }
  0x58   :  { %vm309_vm15 = vmand %vm3306_vm9, %vm3305_vm3  ;;  %v216_v55 = vsel %vm2084_vm13, %v1924_v44, %v210_v14  ;;  %v257_v47 = vsel %vm1718_vm5, nan, %v253_v59  ;;  %vm3307_vm2 = vcmp.eq.f32.partialorder %v1555_v35, 0.0  ;;  %v380_v57 = vmul.f32 %v379_v13, %v1948_v49 }
  0x59   :  { %v300_v58 = vsel %vm3307_vm2, %v1993_v37, %v296_v38  ;;  %v217_v21 = vand.u32 2147483647, %v216_v55  ;;  %v263_v11 = vsel %vm262_vm12, %v1975_v26, %v257_v47  ;;  %v337_v1 = vadd.f32 %v336_v20, %v1890_v5 }
  0x5a   :  { %v304_v63 = vsel %vm1760_vm8, nan, %v300_v58  ;;  %v264_v62 = vand.u32 2147483647, %v263_v11  ;;  %v381_v2 = vadd.f32 -0.33333147, %v380_v57  ;;  %v423_v9 = vmul.f32 %v422_v6, %v1989_v22 }
  0x5b   :  { %v310_v44 = vsel %vm309_vm15, %v2001_v36, %v304_v63  ;;  %v3308_v32 = vand.u32 2147483648, %v1529_v25  ;;  %v339_v56 = vsub.f32 1.5707964, %v337_v1  ;;  %v466_v48 = vmul.f32 %v465_v46, %v2047_v43 }
  0x5c   :  { %v311_v37 = vand.u32 2147483647, %v310_v44  ;;  %v3309_v26 = vand.u32 2147483648, %v1542_v30  ;;  %v382_v41 = vmul.f32 %v381_v2, %v1948_v49  ;;  %v424_v54 = vadd.f32 -0.14207031, %v423_v9 }
  0x5d   :  { %v219_v31 = vor.u32 %v3308_v32, %v217_v21  ;;  %v3310_v36 = vand.u32 2147483648, %v1555_v35  ;;  %vm3311_vm5 = vcmp.gt.f32.partialorder %v1779_v10, %v1771_v52  ;;  %v467_v23 = vadd.f32 -0.074975304, %v466_v48 }
  0x5e   :  { %v266_v60 = vor.u32 %v3309_v26, %v264_v62  ;;  %v340_v7 = vsel %vm3311_vm5, %v339_v56, %v337_v1  ;;  %1347 = vrcp.f32 %v2062_v0  ;;  %v383_v49 = vmul.f32 %v382_v41, %v1935_v28  ;;  %v3317_v56 = vld [vmem:[#allocation47_spill] sm:$0xff] }
  0x5f   :  { %v313_v29 = vor.u32 %v3310_v36, %v311_v37  ;;  %925 = vst [vmem:[%s3124_s3] sm:$0xff] %v219_v31  ;;  %v342_v27 = vsub.f32 3.1415927, %v340_v7  ;;  %vm391_vm8 = vcmp.lt.s32.totalorder %v1510_v18, 0  ;;  %v425_v6 = vmul.f32 %v424_v54, %v1989_v22 }
  0x60   :  { %926 = vst [vmem:[%s3124_s3 + $0x8] sm:$0xff] %v266_v60  ;;  %vm3312_vm7 = vcmp.lt.f32.partialorder %v1508_v17, 0.0  ;;  %v359_v33 = vand.u32 2147483648, %v1568_v40  ;;  %v468_v13 = vmul.f32 %v467_v23, %v2047_v43  ;;  %vm3314_vm9 = vcmp.eq.s32.totalorder %v1779_v10, inf }
  0x61   :  { %v353_v34 = vsel %vm3312_vm7, 2.3561945, %v3291_v50  ;;  %927 = vst [vmem:[%s3124_s3 + $0x10] sm:$0xff] %v313_v29  ;;  %vm3313_vm10 = vmmov %vm3312_vm7  ;;  %vm3315_vm13 = vcmp.eq.s32.totalorder %v1771_v52, inf  ;;  %v384_v14 = vadd.f32 %v383_v49, %v1935_v28  ;;  %vm388_vm6 = vcmp.lt.f32.partialorder %v1510_v18, 0.0  ;;  %v3321_v49 = vld [vmem:[#allocation38_spill] sm:$0xff] }
  0x62   :  { %v343_v46 = vsel %vm3313_vm10, %v342_v27, %v340_v7  ;;  %vm356_vm15 = vmand %vm3315_vm13, %vm3314_vm9  ;;  %v426_v59 = vadd.f32 0.19993454, %v425_v6  ;;  %vm385_vm12 = vcmp.gt.f32.partialorder %v1851_v39, %v1848_v19  ;;  %v392_v20 = vsel %vm391_vm8, 3.1415927, %v3289_v51  ;;  %v3320_v7 = vld [vmem:[#allocation4_spill] sm:$0xff]  ;;  %v3322_v6 = vld [vmem:[#allocation39_spill] sm:$0xff] }
  0x63   :  { %v347_v38 = vsel %vm346_vm1, %v2053_v42, %v343_v46  ;;  %v469_v55 = vadd.f32 0.1064488, %v468_v13  ;;  %v386_v52 = vsub.f32 1.5707964, %v384_v14  ;;  %vm393_vm0 = vcmp.eq.f32.partialorder %v1581_v45, 0.0 }
  0x64   :  { %v351_v10 = vsel %vm1836_vm11, nan, %v347_v38  ;;  %v427_v28 = vmul.f32 %v426_v59, %v1989_v22  ;;  %vm401_vm3 = vcmp.eq.s32.totalorder %v1848_v19, inf  ;;  %vm402_vm2 = vcmp.eq.s32.totalorder %v1851_v39, inf }
  0x65   :  { %v357_v47 = vsel %vm356_vm15, %v353_v34, %v351_v10  ;;  %v470_v42 = vmul.f32 %v469_v55, %v2047_v43  ;;  %v387_v57 = vsel %vm385_vm12, %v386_v52, %v384_v14  ;;  %v504_v11 = vmin.f32 %v2026_v53, %v2041_v8  ;;  %vm403_vm11 = vmand %vm401_vm3, %vm402_vm2  ;;  %v3323_v55 = vld [vmem:[#allocation8_spill] sm:$0xff] }
  0x66   :  { %v358_v58 = vand.u32 2147483647, %v357_v47  ;;  %v428_v21 = vadd.f32 -0.33333147, %v427_v28  ;;  %v389_v4 = vsub.f32 3.1415927, %v387_v57 }
  0x67   :  { %v471_v63 = vadd.f32 -0.14207031, %v470_v42  ;;  %v2184_v1 = vand.u32 2147483647, %v1524_v24  ;;  %v2188_v2 = vand.u32 2147483647, %v1621_v61 }
  0x68   :  { %v360_v62 = vor.u32 %v359_v33, %v358_v58  ;;  %v429_v44 = vmul.f32 %v428_v21, %v1989_v22  ;;  %v2190_v9 = vpop.eup %1347  ;;  %v390_v32 = vsel %vm388_vm6, %v389_v4, %v387_v57  ;;  %v400_v31 = vsel %vm388_vm6, 2.3561945, %v3291_v50  ;;  %v3324_v28 = vld [vmem:[#allocation17_spill] sm:$0xff]  ;;  %v2430_v61 = vld [vmem:[%s3122_s1 + $0x68] sm:$0xff] }
  0x69   :  { %3316 = vst [vmem:[#allocation51_spill] sm:$0xff] %v2190_v9  ;;  %v472_v37 = vmul.f32 %v471_v63, %v2047_v43  ;;  %v394_v22 = vsel %vm393_vm0, %v392_v20, %v390_v32  ;;  %v2206_v26 = vmul.f32 %v2190_v9, %v504_v11  ;;  %v406_v19 = vand.u32 2147483648, %v1581_v45  ;;  %v3325_v42 = vld [vmem:[#allocation21_spill] sm:$0xff] }
  0x6a   :  { %v430_v48 = vmul.f32 %v429_v44, %v3317_v56  ;;  %928 = vst [vmem:[%s3124_s3 + $0x18] sm:$0xff] %v360_v62  ;;  %v398_v39 = vsel %vm1876_vm14, nan, %v394_v22  ;;  %v2216_v54 = vmax.f32 %v2184_v1, %v2188_v2  ;;  %vm438_vm1 = vcmp.lt.s32.totalorder %v3320_v7, 0  ;;  %v3326_v4 = vld [vmem:[#allocation49_spill] sm:$0xff] }
  0x6b   :  { %v473_v41 = vadd.f32 0.19993454, %v472_v37  ;;  %v404_v36 = vsel %vm403_vm11, %v400_v31, %v398_v39  ;;  %v2222_v23 = vmul.f32 %v2206_v26, %v2206_v26  ;;  %vm432_vm14 = vcmp.gt.f32.partialorder %v3322_v6, %v3321_v49  ;;  %v3330_v39 = vld [vmem:[#allocation43_spill] sm:$0xff] }
  0x6c   :  { %3319 = vst [vmem:[#allocation47_spill] sm:$0xff] %v2216_v54  ;;  %v431_v29 = vadd.f32 %v430_v48, %v3317_v56  ;;  %v405_v27 = vand.u32 2147483647, %v404_v36  ;;  %1349 = vrcp.f32 %v2216_v54  ;;  %vm435_vm5 = vcmp.lt.f32.partialorder %v3320_v7, 0.0 }
  0x6d   :  { %v474_v34 = vmul.f32 %v473_v41, %v2047_v43  ;;  %v509_v13 = vmul.f32 0.002785687, %v2222_v23  ;;  %v439_v14 = vsel %vm438_vm1, 3.1415927, %v3289_v51  ;;  %vm448_vm8 = vcmp.eq.s32.totalorder %v3321_v49, inf  ;;  %v3333_v49 = vld [vmem:[#allocation18_spill] sm:$0xff] }
  0x6e   :  { %v433_v33 = vsub.f32 1.5707964, %v431_v29  ;;  %v407_v46 = vor.u32 %v406_v19, %v405_v27  ;;  %vm449_vm7 = vcmp.eq.s32.totalorder %v3322_v6, inf  ;;  %v2234_v10 = vand.u32 2147483647, %v3323_v55  ;;  %v3331_v19 = vld [vmem:[#allocation44_spill] sm:$0xff] }
  0x6f   :  { %v475_v59 = vadd.f32 -0.33333147, %v474_v34  ;;  %v510_v20 = vadd.f32 -0.015866, %v509_v13  ;;  %vm440_vm10 = vcmp.eq.f32.partialorder %v3324_v28, 0.0  ;;  %vm450_vm9 = vmand %vm448_vm8, %vm449_vm7  ;;  %v453_v32 = vand.u32 2147483648, %v3324_v28 }
  0x70   :  { %v434_v38 = vsel %vm432_vm14, %v433_v33, %v431_v29  ;;  %v2239_v58 = vand.u32 2147483647, %v3325_v42  ;;  %929 = vst [vmem:[%s3124_s3 + $0x20] sm:$0xff] %v407_v46  ;;  %v447_v57 = vsel %vm435_vm5, 2.3561945, %v3291_v50  ;;  %v551_v37 = vmin.f32 %v2184_v1, %v2188_v2  ;;  %v3334_v33 = vld [vmem:[#allocation9_spill] sm:$0xff] }
  0x71   :  { %v436_v52 = vsub.f32 3.1415927, %v434_v38  ;;  %v476_v47 = vmul.f32 %v475_v59, %v2047_v43  ;;  %v511_v21 = vmul.f32 %v510_v20, %v2222_v23  ;;  %v3327_v43 = vld [vmem:[#allocation5_spill] sm:$0xff]  ;;  %vm479_vm6 = vcmp.gt.f32.partialorder %v3331_v19, %v3330_v39  ;;  %v3335_v59 = vld [vmem:[#allocation22_spill] sm:$0xff] }
  0x72   :  { %vm485_vm13 = vcmp.lt.s32.totalorder %v3327_v43, 0  ;;  %v2254_v62 = vmax.f32 %v2234_v10, %v2239_v58  ;;  %vm482_vm15 = vcmp.lt.f32.partialorder %v3327_v43, 0.0  ;;  %vm490_vm12 = vcmp.ne.f32.partialorder %v3333_v49, %v3333_v49 }
  0x73   :  { %v437_v11 = vsel %vm435_vm5, %v436_v52, %v434_v38  ;;  %v477_v63 = vmul.f32 %v476_v47, %v3326_v4  ;;  %v512_v31 = vadd.f32 0.04247222, %v511_v21  ;;  %v486_v41 = vsel %vm485_vm13, 3.1415927, %v3289_v51 }
  0x74   :  { %3328 = vst [vmem:[#allocation36_spill] sm:$0xff] %v2254_v62  ;;  %v441_v44 = vsel %vm440_vm10, %v439_v14, %v437_v11  ;;  %1351 = vrcp.f32 %v2254_v62  ;;  %vm495_vm0 = vcmp.eq.s32.totalorder %v3330_v39, inf  ;;  %v2279_v13 = vand.u32 2147483647, %v3334_v33 }
  0x75   :  { %v445_v56 = vsel %vm1928_vm4, nan, %v441_v44  ;;  %v478_v48 = vadd.f32 %v477_v63, %v3326_v4  ;;  %v513_v36 = vmul.f32 %v512_v31, %v2222_v23  ;;  %vm489_vm4 = vcmp.ne.f32.partialorder %v3327_v43, %v3327_v43 }
  0x76   :  { %v451_v60 = vsel %vm450_vm9, %v447_v57, %v445_v56  ;;  %v2268_v29 = vpop.eup %1349  ;;  %vm496_vm3 = vcmp.eq.s32.totalorder %v3331_v19, inf  ;;  %v2283_v38 = vand.u32 2147483647, %v3335_v59  ;;  %vm487_vm2 = vcmp.eq.f32.partialorder %v3333_v49, 0.0  ;;  %vm2291_vm11 = vmor %vm489_vm4, %vm490_vm12 }
  0x77   :  { %3332 = vst [vmem:[#allocation38_spill] sm:$0xff] %v2268_v29  ;;  %v452_v7 = vand.u32 2147483647, %v451_v60  ;;  %v480_v27 = vsub.f32 1.5707964, %v478_v48  ;;  %v2276_v34 = vmul.f32 %v2268_v29, %v551_v37  ;;  %vm497_vm1 = vmand %vm495_vm0, %vm496_vm3  ;;  %v598_v63 = vmin.f32 %v2234_v10, %v2239_v58 }
  0x78   :  { %v514_v6 = vadd.f32 -0.074975304, %v513_v36  ;;  %v494_v42 = vsel %vm482_vm15, 2.3561945, %v3291_v50  ;;  %v2300_v57 = vmax.f32 %v2279_v13, %v2283_v38  ;;  %v500_v31 = vand.u32 2147483648, %v3333_v49 }
  0x79   :  { %v454_v46 = vor.u32 %v453_v32, %v452_v7  ;;  %v481_v14 = vsel %vm479_vm6, %v480_v27, %v478_v48  ;;  %v2289_v28 = vmul.f32 %v2276_v34, %v2276_v34  ;;  %v3341_v7 = vld [vmem:[#allocation23_spill] sm:$0xff]  ;;  %vm526_vm5 = vcmp.gt.f32.partialorder %v2041_v8, %v2026_v53 }
  0x7a   :  { %v483_v20 = vsub.f32 3.1415927, %v481_v14  ;;  %v515_v52 = vmul.f32 %v514_v6, %v2222_v23  ;;  %3338 = vst [vmem:[#allocation39_spill] sm:$0xff] %v2300_v57  ;;  %1353 = vrcp.f32 %v2300_v57  ;;  %v2327_v27 = vand.u32 2147483647, %v3341_v7 }
  0x7b   :  { %930 = vst [vmem:[%s3124_s3 + $0x28] sm:$0xff] %v454_v46  ;;  %v556_v4 = vmul.f32 0.002785687, %v2289_v28  ;;  %vm579_vm13 = vcmp.lt.s32.totalorder %v1524_v24, 0  ;;  %vm543_vm6 = vcmp.eq.s32.totalorder %v2041_v8, inf  ;;  %vm576_vm4 = vcmp.lt.f32.partialorder %v1524_v24, 0.0 }
  0x7c   :  { %v484_v21 = vsel %vm482_vm15, %v483_v20, %v481_v14  ;;  %v516_v11 = vadd.f32 0.1064488, %v515_v52  ;;  %vm542_vm15 = vcmp.eq.s32.totalorder %v2026_v53, inf  ;;  %vm626_vm0 = vcmp.lt.s32.totalorder %v3323_v55, 0 }
  0x7d   :  { %v488_v44 = vsel %vm487_vm2, %v486_v41, %v484_v21  ;;  %v557_v37 = vadd.f32 -0.015866, %v556_v4  ;;  %v3340_v41 = vld [vmem:[#allocation10_spill] sm:$0xff]  ;;  %vm2472_vm3 = vmand %vm542_vm15, %vm543_vm6  ;;  %vm573_vm2 = vcmp.gt.f32.partialorder %v2188_v2, %v2184_v1  ;;  %vm630_vm15 = vcmp.ne.f32.partialorder %v3323_v55, %v3323_v55 }
  0x7e   :  { %v492_v32 = vsel %vm2291_vm11, nan, %v488_v44  ;;  %v517_v43 = vmul.f32 %v516_v11, %v2222_v23  ;;  %v2317_v22 = vpop.eup %1351  ;;  %v2324_v36 = vand.u32 2147483647, %v3340_v41  ;;  %v3342_v11 = vld [vmem:[#allocation6_spill] sm:$0xff]  ;;  %vm583_vm11 = vcmp.ne.f32.partialorder %v1524_v24, %v1524_v24 }
  0x7f   :  { %3339 = vst [vmem:[#allocation49_spill] sm:$0xff] %v2317_v22  ;;  %v498_v56 = vsel %vm497_vm1, %v494_v42, %v492_v32  ;;  %v558_v39 = vmul.f32 %v557_v37, %v2289_v28  ;;  %v2321_v19 = vmul.f32 %v2317_v22, %v598_v63  ;;  %v645_v42 = vmin.f32 %v2279_v13, %v2283_v38 }
  0x80   :  { %v499_v48 = vand.u32 2147483647, %v498_v56  ;;  %v518_v60 = vadd.f32 -0.14207031, %v517_v43  ;;  %v2336_v59 = vmax.f32 %v2324_v36, %v2327_v27  ;;  %vm532_vm14 = vcmp.lt.s32.totalorder %v3342_v11, 0 }
  0x81   :  { %v559_v46 = vadd.f32 0.04247222, %v558_v39  ;;  %v2332_v14 = vmul.f32 %v2321_v19, %v2321_v19  ;;  %vm529_vm8 = vcmp.lt.f32.partialorder %v3342_v11, 0.0  ;;  %v533_v56 = vsel %vm532_vm14, 3.1415927, %v3289_v51  ;;  %v3345_v39 = vld [vmem:[#allocation24_spill] sm:$0xff] }
  0x82   :  { %v501_v49 = vor.u32 %v500_v31, %v499_v48  ;;  %v519_v6 = vmul.f32 %v518_v60, %v2222_v23  ;;  %1355 = vrcp.f32 %v2336_v59  ;;  %vm536_vm7 = vcmp.ne.f32.partialorder %v3342_v11, %v3342_v11  ;;  %v3344_v48 = vld [vmem:[#allocation11_spill] sm:$0xff] }
  0x83   :  { %v560_v52 = vmul.f32 %v559_v46, %v2289_v28  ;;  %v603_v47 = vmul.f32 0.002785687, %v2332_v14  ;;  %v2362_v60 = vand.u32 2147483647, %v3344_v48  ;;  %v2365_v7 = vand.u32 2147483647, %v3345_v39 }
  0x84   :  { %v520_v20 = vadd.f32 0.19993454, %v519_v6  ;;  %931 = vst [vmem:[%s3124_s3 + $0x30] sm:$0xff] %v501_v49  ;;  %v2348_v44 = vpop.eup %1353  ;;  %v2411_v22 = vsel %vm579_vm13, 3.1415927, %v3289_v51  ;;  %vm623_vm14 = vcmp.lt.f32.partialorder %v3323_v55, 0.0  ;;  %vm620_vm13 = vcmp.gt.f32.partialorder %v2239_v58, %v2234_v10 }
  0x85   :  { %v561_v4 = vadd.f32 -0.074975304, %v560_v52  ;;  %v604_v63 = vadd.f32 -0.015866, %v603_v47  ;;  %3343 = vst [vmem:[#allocation42_spill] sm:$0xff] %v2348_v44  ;;  %v2356_v37 = vmul.f32 %v2348_v44, %v645_v42  ;;  %v2375_v52 = vld [vmem:[%s3122_s1 + $0x38] sm:$0xff]  ;;  %v2386_v47 = vmax.f32 %v2362_v60, %v2365_v7 }
  0x86   :  { %v521_v21 = vmul.f32 %v520_v20, %v2222_v23  ;;  %vm534_vm10 = vcmp.eq.f32.partialorder %v2375_v52, 0.0  ;;  %vm537_vm9 = vcmp.ne.f32.partialorder %v2375_v52, %v2375_v52 }
  0x87   :  { %v562_v31 = vmul.f32 %v561_v4, %v2289_v28  ;;  %v605_v43 = vmul.f32 %v604_v63, %v2332_v14  ;;  %v2370_v20 = vmul.f32 %v2356_v37, %v2356_v37  ;;  %1357 = vrcp.f32 %v2386_v47  ;;  %vm2458_vm12 = vmor %vm536_vm7, %vm537_vm9 }
  0x88   :  { %v522_v32 = vadd.f32 -0.33333147, %v521_v21  ;;  %vm670_vm9 = vcmp.lt.f32.partialorder %v3334_v33, 0.0 }
  0x89   :  { %v563_v6 = vadd.f32 0.1064488, %v562_v31  ;;  %v606_v46 = vadd.f32 0.04247222, %v605_v43  ;;  %v650_v63 = vmul.f32 0.002785687, %v2370_v20 }
  0x8a   :  { %v523_v49 = vmul.f32 %v522_v32, %v2222_v23  ;;  %v541_v23 = vsel %vm529_vm8, 2.3561945, %v3291_v50  ;;  %v692_v32 = vmin.f32 %v2324_v36, %v2327_v27 }
  0x8b   :  { %v564_v21 = vmul.f32 %v563_v6, %v2289_v28  ;;  %v607_v4 = vmul.f32 %v606_v46, %v2332_v14  ;;  %v547_v6 = vand.u32 2147483648, %v2375_v52  ;;  %v3347_v46 = vmax.f32 %v2062_v0, %v1966_v3 }
  0x8c   :  { %v524_v42 = vmul.f32 %v523_v49, %v2206_v26  ;;  %v651_v49 = vadd.f32 -0.015866, %v650_v63  ;;  %v2398_v5 = vpop.eup %1355  ;;  %v2419_v3 = vsel %vm576_vm4, 2.3561945, %v3291_v50 }
  0x8d   :  { %v565_v43 = vadd.f32 -0.14207031, %v564_v21  ;;  %v608_v39 = vadd.f32 -0.074975304, %v607_v4  ;;  %3346 = vst [vmem:[#allocation43_spill] sm:$0xff] %v2398_v5  ;;  %v2405_v44 = vmax.f32 %v2216_v54, %v3347_v46  ;;  %v2422_v63 = vmul.f32 %v2398_v5, %v692_v32  ;;  %v3348_v46 = vld [vmem:[#allocation12_spill] sm:$0xff] }
  0x8e   :  { %v525_v31 = vadd.f32 %v524_v42, %v2206_v26  ;;  %v652_v4 = vmul.f32 %v651_v49, %v2370_v20  ;;  %v2425_v54 = vand.u32 2147483647, %v3348_v46  ;;  %v2441_v5 = vld [vmem:[%s3122_s1 + $0x40] sm:$0xff] }
  0x8f   :  { %v566_v42 = vmul.f32 %v565_v43, %v2289_v28  ;;  %v609_v21 = vmul.f32 %v608_v39, %v2332_v14  ;;  %v2433_v43 = vand.u32 2147483647, %v2430_v61  ;;  %v2446_v45 = vmul.f32 %v2422_v63, %v2422_v63 }
  0x90   :  { %v527_v26 = vsub.f32 1.5707964, %v525_v31  ;;  %v653_v29 = vadd.f32 0.04247222, %v652_v4  ;;  %vm584_vm1 = vcmp.ne.f32.partialorder %v2441_v5, %v2441_v5  ;;  %vm581_vm7 = vcmp.eq.f32.partialorder %v2441_v5, 0.0 }
  0x91   :  { %v567_v49 = vadd.f32 0.19993454, %v566_v42  ;;  %v610_v0 = vadd.f32 0.1064488, %v609_v21  ;;  %v2450_v18 = vmax.f32 %v2425_v54, %v2433_v43 }
  0x92   :  { %v528_v39 = vsel %vm526_vm5, %v527_v26, %v525_v31  ;;  %v654_v21 = vmul.f32 %v653_v29, %v2370_v20  ;;  %vm589_vm5 = vcmp.eq.s32.totalorder %v2184_v1, inf }
  0x93   :  { %v530_v32 = vsub.f32 3.1415927, %v528_v39  ;;  %v568_v26 = vmul.f32 %v567_v49, %v2289_v28  ;;  %v611_v42 = vmul.f32 %v610_v0, %v2332_v14  ;;  %v697_v0 = vmul.f32 0.002785687, %v2446_v45 }
  0x94   :  { %v739_v49 = vmin.f32 %v2362_v60, %v2365_v7  ;;  %1359 = vrcp.f32 %v2450_v18  ;;  %v655_v53 = vadd.f32 -0.074975304, %v654_v21 }
  0x95   :  { %v531_v4 = vsel %vm529_vm8, %v530_v32, %v528_v39  ;;  %v569_v8 = vadd.f32 -0.33333147, %v568_v26  ;;  %v612_v11 = vadd.f32 -0.14207031, %v611_v42  ;;  %v2484_v39 = vpop.eup %1357  ;;  %v698_v52 = vadd.f32 -0.015866, %v697_v0 }
  0x96   :  { %v535_v29 = vsel %vm534_vm10, %v533_v56, %v531_v4  ;;  %3353 = vst [vmem:[#allocation44_spill] sm:$0xff] %v2484_v39  ;;  %v2496_v56 = vsel %vm626_vm0, 3.1415927, %v3289_v51  ;;  %vm590_vm8 = vcmp.eq.s32.totalorder %v2188_v2, inf  ;;  %v656_v21 = vmul.f32 %v655_v53, %v2370_v20 }
  0x97   :  { %v539_v32 = vsel %vm2458_vm12, nan, %v535_v29  ;;  %v570_v31 = vmul.f32 %v569_v8, %v2289_v28  ;;  %v613_v42 = vmul.f32 %v612_v11, %v2332_v14  ;;  %v997_v29 = vmax.f32 %v2254_v62, %v2405_v44 }
  0x98   :  { %v545_v26 = vsel %vm2472_vm3, %v541_v23, %v539_v32  ;;  %v699_v0 = vmul.f32 %v698_v52, %v2446_v45  ;;  %v2510_v9 = vmul.f32 %v2484_v39, %v739_v49  ;;  %v2516_v8 = vsel %vm623_vm14, 2.3561945, %v3291_v50 }
  0x99   :  { %v546_v4 = vand.u32 2147483647, %v545_v26  ;;  %v571_v28 = vmul.f32 %v570_v31, %v2276_v34  ;;  %v614_v23 = vadd.f32 0.19993454, %v613_v42  ;;  %v657_v11 = vadd.f32 0.1064488, %v656_v21 }
  0x9a   :  { %vm673_vm10 = vcmp.lt.s32.totalorder %v3334_v33, 0  ;;  %v700_v32 = vadd.f32 0.04247222, %v699_v0  ;;  %v2521_v44 = vmul.f32 %v2510_v9, %v2510_v9  ;;  %v786_v31 = vmin.f32 %v2425_v54, %v2433_v43 }
  0x9b   :  { %v548_v53 = vor.u32 %v547_v6, %v546_v4  ;;  %v572_v49 = vadd.f32 %v571_v28, %v2276_v34  ;;  %v615_v52 = vmul.f32 %v614_v23, %v2332_v14  ;;  %v658_v26 = vmul.f32 %v657_v11, %v2370_v20  ;;  %v2531_v6 = vld [vmem:[%s3122_s1 + $0x48] sm:$0xff] }
  0x9c   :  { %v701_v21 = vmul.f32 %v700_v32, %v2446_v45  ;;  %v744_v34 = vmul.f32 0.002785687, %v2521_v44  ;;  %vm631_vm6 = vcmp.ne.f32.partialorder %v2531_v6, %v2531_v6  ;;  %v2551_v11 = vsel %vm673_vm10, 3.1415927, %v3289_v51 }
  0x9d   :  { %932 = vst [vmem:[%s3124_s3 + $0x38] sm:$0xff] %v548_v53  ;;  %v574_v4 = vsub.f32 1.5707964, %v572_v49  ;;  %v616_v0 = vadd.f32 -0.33333147, %v615_v52  ;;  %vm636_vm12 = vcmp.eq.s32.totalorder %v2234_v10, inf }
  0x9e   :  { %v659_v28 = vadd.f32 -0.14207031, %v658_v26  ;;  %v2542_v23 = vpop.eup %1359  ;;  %v702_v53 = vadd.f32 -0.074975304, %v701_v21  ;;  %v745_v32 = vadd.f32 -0.015866, %v744_v34  ;;  %v998_v21 = vmax.f32 %v2300_v57, %v997_v29 }
  0x9f   :  { %3354 = vst [vmem:[#allocation52_spill] sm:$0xff] %v2542_v23  ;;  %v575_v52 = vsel %vm573_vm2, %v574_v4, %v572_v49  ;;  %v617_v26 = vmul.f32 %v616_v0, %v2332_v14  ;;  %vm637_vm0 = vcmp.eq.s32.totalorder %v2239_v58, inf  ;;  %v2561_v39 = vmul.f32 %v2542_v23, %v786_v31  ;;  %vm2573_vm2 = vmor %vm583_vm11, %vm584_vm1  ;;  %v3357_v0 = vld [vmem:[#allocation13_spill] sm:$0xff] }
  0xa0   :  { %v660_v42 = vmul.f32 %v659_v28, %v2370_v20  ;;  %v577_v62 = vsub.f32 3.1415927, %v575_v52  ;;  %vm628_vm3 = vcmp.eq.f32.partialorder %v2531_v6, 0.0  ;;  %v703_v34 = vmul.f32 %v702_v53, %v2446_v45  ;;  %vm591_vm11 = vmand %vm589_vm5, %vm590_vm8 }
  0xa1   :  { %v746_v49 = vmul.f32 %v745_v32, %v2521_v44  ;;  %v618_v31 = vmul.f32 %v617_v26, %v2321_v19  ;;  %v2580_v29 = vmul.f32 %v2561_v39, %v2561_v39  ;;  %v2583_v28 = vand.u32 2147483647, %v3357_v0 }
  0xa2   :  { %v661_v4 = vadd.f32 0.19993454, %v660_v42  ;;  %v578_v53 = vsel %vm576_vm4, %v577_v62, %v575_v52  ;;  %v704_v32 = vadd.f32 0.1064488, %v703_v34  ;;  %v2594_v42 = vld [vmem:[%s3122_s1 + $0x70] sm:$0xff]  ;;  %vm667_vm4 = vcmp.gt.f32.partialorder %v2283_v38, %v2279_v13 }
  0xa3   :  { %v747_v23 = vadd.f32 0.04247222, %v746_v49  ;;  %v2597_v26 = vand.u32 2147483647, %v2594_v42  ;;  %v582_v57 = vsel %vm581_vm7, %v2411_v22, %v578_v53  ;;  %v619_v62 = vadd.f32 %v618_v31, %v2321_v19  ;;  %vm2647_vm7 = vmor %vm630_vm15, %vm631_vm6 }
  0xa4   :  { %v662_v2 = vmul.f32 %v661_v4, %v2370_v20  ;;  %v791_v1 = vmul.f32 0.002785687, %v2580_v29  ;;  %v586_v52 = vsel %vm2573_vm2, nan, %v582_v57  ;;  %v2612_v34 = vsel %vm670_vm9, 2.3561945, %v3291_v50  ;;  %v2622_v57 = vld [vmem:[%s3122_s1 + $0x50] sm:$0xff] }
  0xa5   :  { %v705_v49 = vmul.f32 %v704_v32, %v2446_v45  ;;  %v748_v22 = vmul.f32 %v747_v23, %v2521_v44  ;;  %v592_v19 = vsel %vm591_vm11, %v2419_v3, %v586_v52  ;;  %v621_v31 = vsub.f32 1.5707964, %v619_v62 }
  0xa6   :  { %v663_v4 = vadd.f32 -0.33333147, %v662_v2  ;;  %v792_v53 = vadd.f32 -0.015866, %v791_v1  ;;  %v593_v24 = vand.u32 2147483647, %v592_v19  ;;  %vm677_vm1 = vcmp.ne.f32.partialorder %v3334_v33, %v3334_v33 }
  0xa7   :  { %vm678_vm5 = vcmp.ne.f32.partialorder %v2622_v57, %v2622_v57  ;;  %v999_v14 = vmax.f32 %v2336_v59, %v998_v21  ;;  %v706_v23 = vadd.f32 -0.14207031, %v705_v49  ;;  %v749_v32 = vadd.f32 -0.074975304, %v748_v22 }
  0xa8   :  { %v622_v3 = vsel %vm620_vm13, %v621_v31, %v619_v62  ;;  %v664_v2 = vmul.f32 %v663_v4, %v2370_v20  ;;  %v793_v1 = vmul.f32 %v792_v53, %v2580_v29  ;;  %v2634_v52 = vmax.f32 %v2583_v28, %v2597_v26  ;;  %vm638_vm13 = vmand %vm636_vm12, %vm637_vm0 }
  0xa9   :  { %v3358_v19 = vand.u32 2147483648, %v2441_v5  ;;  %v624_v17 = vsub.f32 3.1415927, %v622_v3  ;;  %vm675_vm8 = vcmp.eq.f32.partialorder %v2622_v57, 0.0  ;;  %v707_v21 = vmul.f32 %v706_v23, %v2446_v45  ;;  %vm2697_vm0 = vmor %vm677_vm1, %vm678_vm5 }
  0xaa   :  { %v750_v49 = vmul.f32 %v749_v32, %v2521_v44  ;;  %v665_v5 = vmul.f32 %v664_v2, %v2356_v37  ;;  %vm683_vm10 = vcmp.eq.s32.totalorder %v2279_v13, inf  ;;  %1361 = vrcp.f32 %v2634_v52 }
  0xab   :  { %v595_v40 = vor.u32 %v3358_v19, %v593_v24  ;;  %v794_v24 = vadd.f32 0.04247222, %v793_v1  ;;  %v625_v62 = vsel %vm623_vm14, %v624_v17, %v622_v3  ;;  %vm684_vm15 = vcmp.eq.s32.totalorder %v2283_v38, inf  ;;  %v1372_v38 = vld [vmem:[%s3122_s1 + $0x58] sm:$0xff] }
  0xac   :  { %v708_v22 = vadd.f32 0.19993454, %v707_v21  ;;  %v751_v31 = vadd.f32 0.1064488, %v750_v49  ;;  %v629_v4 = vsel %vm628_vm3, %v2496_v56, %v625_v62  ;;  %v666_v55 = vadd.f32 %v665_v5, %v2356_v37  ;;  %vm2715_vm2 = vmand %vm683_vm10, %vm684_vm15 }
  0xad   :  { %933 = vst [vmem:[%s3124_s3 + $0x40] sm:$0xff] %v595_v40  ;;  %v1000_v17 = vmax.f32 %v2386_v47, %v999_v14  ;;  %v795_v58 = vmul.f32 %v794_v24, %v2580_v29  ;;  %v633_v10 = vsel %vm2647_vm7, nan, %v629_v4  ;;  %v688_v53 = vand.u32 2147483648, %v2622_v57 }
  0xae   :  { %v709_v23 = vmul.f32 %v708_v22, %v2446_v45  ;;  %v752_v32 = vmul.f32 %v751_v31, %v2521_v44  ;;  %v639_v40 = vsel %vm638_vm13, %v2516_v8, %v633_v10  ;;  %v668_v3 = vsub.f32 1.5707964, %v666_v55  ;;  %v3364_v31 = vld [vmem:[#allocation14_spill] sm:$0xff] }
  0xaf   :  { %vm720_vm14 = vcmp.lt.s32.totalorder %v3340_v41, 0  ;;  %v796_v56 = vadd.f32 -0.074975304, %v795_v58  ;;  %v640_v37 = vand.u32 2147483647, %v639_v40  ;;  %vm714_vm6 = vcmp.gt.f32.partialorder %v2327_v27, %v2324_v36 }
  0xb0   :  { %v710_v2 = vadd.f32 -0.33333147, %v709_v23  ;;  %v753_v14 = vadd.f32 -0.14207031, %v752_v32  ;;  %v669_v1 = vsel %vm667_vm4, %v668_v3, %v666_v55  ;;  %v1001_v19 = vmax.f32 %v2450_v18, %v1000_v17  ;;  %v2723_v23 = vld [vmem:[%s3122_s1 + $0x78] sm:$0xff] }
  0xb1   :  { %v797_v21 = vmul.f32 %v796_v56, %v2580_v29  ;;  %v833_v8 = vmin.f32 %v2583_v28, %v2597_v26  ;;  %v3361_v49 = vand.u32 2147483648, %v2531_v6  ;;  %v671_v5 = vsub.f32 3.1415927, %v669_v1 }
  0xb2   :  { %v711_v24 = vmul.f32 %v710_v2, %v2446_v45  ;;  %vm717_vm12 = vcmp.lt.f32.partialorder %v3340_v41, 0.0  ;;  %v754_v62 = vmul.f32 %v753_v14, %v2521_v44  ;;  %v721_v6 = vsel %vm720_vm14, 3.1415927, %v3289_v51 }
  0xb3   :  { %v642_v20 = vor.u32 %v3361_v49, %v640_v37  ;;  %vm724_vm3 = vcmp.ne.f32.partialorder %v3340_v41, %v3340_v41  ;;  %v798_v45 = vadd.f32 0.1064488, %v797_v21  ;;  %v2707_v4 = vand.u32 2147483647, %v3364_v31 }
  0xb4   :  { %v672_v55 = vsel %vm670_vm9, %v671_v5, %v669_v1  ;;  %v712_v58 = vmul.f32 %v711_v24, %v2422_v63  ;;  %v755_v10 = vadd.f32 0.19993454, %v754_v62  ;;  %v2726_v32 = vand.u32 2147483647, %v2723_v23  ;;  %v2731_v33 = vpop.eup %1361 }
  0xb5   :  { %934 = vst [vmem:[%s3124_s3 + $0x48] sm:$0xff] %v642_v20  ;;  %v676_v13 = vsel %vm675_vm8, %v2551_v11, %v672_v55  ;;  %vm725_vm9 = vcmp.ne.f32.partialorder %v1372_v38, %v1372_v38  ;;  %v799_v40 = vmul.f32 %v798_v45, %v2580_v29  ;;  %v1002_v3 = vmax.f32 %v2634_v52, %v1001_v19 }
  0xb6   :  { %v680_v56 = vsel %vm2697_vm0, nan, %v676_v13  ;;  %v713_v37 = vadd.f32 %v712_v58, %v2422_v63  ;;  %v756_v2 = vmul.f32 %v755_v10, %v2521_v44  ;;  %v2746_v14 = vmul.f32 %v2731_v33, %v833_v8  ;;  %vm2773_vm5 = vmor %vm724_vm3, %vm725_vm9 }
  0xb7   :  { %v686_v11 = vsel %vm2715_vm2, %v2612_v34, %v680_v56  ;;  %vm730_vm11 = vcmp.eq.s32.totalorder %v2324_v36, inf  ;;  %v800_v57 = vadd.f32 -0.14207031, %v799_v40  ;;  %v2754_v1 = vmax.f32 %v2707_v4, %v2726_v32 }
  0xb8   :  { %v687_v19 = vand.u32 2147483647, %v686_v11  ;;  %v715_v21 = vsub.f32 1.5707964, %v713_v37  ;;  %v757_v49 = vadd.f32 -0.33333147, %v756_v2  ;;  %v2758_v63 = vmul.f32 %v2746_v14, %v2746_v14 }
  0xb9   :  { %vm731_vm4 = vcmp.eq.s32.totalorder %v2327_v27, inf  ;;  %v801_v8 = vmul.f32 %v800_v57, %v2580_v29  ;;  %v1003_v34 = vmax.f32 %v2754_v1, %v1002_v3  ;;  %1363 = vrcp.f32 %v2754_v1  ;;  %v1373_v11 = vld [vmem:[%s3122_s1 + $0x60] sm:$0xff] }
  0xba   :  { %v689_v20 = vor.u32 %v688_v53, %v687_v19  ;;  %v716_v5 = vsel %vm714_vm6, %v715_v21, %v713_v37  ;;  %v758_v24 = vmul.f32 %v757_v49, %v2521_v44  ;;  %v838_v62 = vmul.f32 0.002785687, %v2758_v63  ;;  %vm732_vm7 = vmand %vm730_vm11, %vm731_vm4 }
  0xbb   :  { %v718_v22 = vsub.f32 3.1415927, %v716_v5  ;;  %vm722_vm1 = vcmp.eq.f32.partialorder %v1372_v38, 0.0  ;;  %v802_v45 = vadd.f32 0.19993454, %v801_v8  ;;  %1004 = vmax.xlane.f32.xlu0 %v1003_v34  ;;  %vm767_vm8 = vcmp.lt.s32.totalorder %v3344_v48, 0 }
  0xbc   :  { %v759_v53 = vmul.f32 %v758_v24, %v2510_v9  ;;  %v839_v17 = vadd.f32 -0.015866, %v838_v62  ;;  %935 = vst [vmem:[%s3124_s3 + $0x50] sm:$0xff] %v689_v20  ;;  %v729_v58 = vsel %vm717_vm12, 2.3561945, %v3291_v50  ;;  %v735_v10 = vand.u32 2147483648, %v1372_v38 }
  0xbd   :  { %v719_v44 = vsel %vm717_vm12, %v718_v22, %v716_v5  ;;  %v803_v13 = vmul.f32 %v802_v45, %v2580_v29  ;;  %vm764_vm10 = vcmp.lt.f32.partialorder %v3344_v48, 0.0  ;;  %vm761_vm13 = vcmp.gt.f32.partialorder %v2365_v7, %v2362_v60 }
  0xbe   :  { %v723_v40 = vsel %vm722_vm1, %v721_v6, %v719_v44  ;;  %v760_v3 = vadd.f32 %v759_v53, %v2510_v9  ;;  %v840_v56 = vmul.f32 %v839_v17, %v2758_v63  ;;  %v768_v41 = vsel %vm767_vm8, 3.1415927, %v3289_v51 }
  0xbf   :  { %v727_v37 = vsel %vm2773_vm5, nan, %v723_v40  ;;  %v804_v36 = vadd.f32 -0.33333147, %v803_v13  ;;  %v880_v6 = vmin.f32 %v2707_v4, %v2726_v32  ;;  %vm771_vm15 = vcmp.ne.f32.partialorder %v3344_v48, %v3344_v48 }
  0xc0   :  { %v733_v27 = vsel %vm732_vm7, %v729_v58, %v727_v37  ;;  %v762_v38 = vsub.f32 1.5707964, %v760_v3  ;;  %v841_v2 = vadd.f32 0.04247222, %v840_v56  ;;  %vm772_vm14 = vcmp.ne.f32.partialorder %v1373_v11, %v1373_v11 }
  0xc1   :  { %v734_v9 = vand.u32 2147483647, %v733_v27  ;;  %v805_v57 = vmul.f32 %v804_v36, %v2580_v29  ;;  %vm777_vm6 = vcmp.eq.s32.totalorder %v2362_v60, inf  ;;  %vm778_vm12 = vcmp.eq.s32.totalorder %v2365_v7, inf  ;;  %vm2814_vm3 = vmor %vm771_vm15, %vm772_vm14 }
  0xc2   :  { %v763_v19 = vsel %vm761_vm13, %v762_v38, %v760_v3  ;;  %v842_v21 = vmul.f32 %v841_v2, %v2758_v63  ;;  %vm769_vm0 = vcmp.eq.f32.partialorder %v1373_v11, 0.0  ;;  %v776_v29 = vsel %vm764_vm10, 2.3561945, %v3291_v50  ;;  %vm779_vm9 = vmand %vm777_vm6, %vm778_vm12 }
  0xc3   :  { %v2811_v49 = vpop.eup %1363  ;;  %v736_v8 = vor.u32 %v735_v10, %v734_v9  ;;  %v765_v34 = vsub.f32 3.1415927, %v763_v19  ;;  %v806_v20 = vmul.f32 %v805_v57, %v2561_v39  ;;  %vm814_vm2 = vcmp.lt.s32.totalorder %v3348_v46, 0 }
  0xc4   :  { %v843_v60 = vadd.f32 -0.074975304, %v842_v21  ;;  %v2823_v7 = vmul.f32 %v2811_v49, %v880_v6  ;;  %v782_v62 = vand.u32 2147483648, %v1373_v11  ;;  %vm808_vm11 = vcmp.gt.f32.partialorder %v2433_v43, %v2425_v54 }
  0xc5   :  { %v766_v24 = vsel %vm764_vm10, %v765_v34, %v763_v19  ;;  %v807_v22 = vadd.f32 %v806_v20, %v2561_v39  ;;  %936 = vst [vmem:[%s3124_s3 + $0x58] sm:$0xff] %v736_v8  ;;  %vm811_vm4 = vcmp.lt.f32.partialorder %v3348_v46, 0.0  ;;  %v815_v17 = vsel %vm814_vm2, 3.1415927, %v3289_v51 }
  0xc6   :  { %v770_v45 = vsel %vm769_vm0, %v768_v41, %v766_v24  ;;  %v844_v55 = vmul.f32 %v843_v60, %v2758_v63  ;;  %v2837_v48 = vmul.f32 %v2823_v7, %v2823_v7  ;;  %vm818_vm1 = vcmp.ne.f32.partialorder %v3348_v46, %v3348_v46 }
  0xc7   :  { %v774_v53 = vsel %vm2814_vm3, nan, %v770_v45  ;;  %v809_v39 = vsub.f32 1.5707964, %v807_v22  ;;  %vm819_vm5 = vcmp.ne.f32.partialorder %v2430_v61, %v2430_v61  ;;  %vm824_vm8 = vcmp.eq.s32.totalorder %v2425_v54, inf }
  0xc8   :  { %v780_v44 = vsel %vm779_vm9, %v776_v29, %v774_v53  ;;  %v845_v58 = vadd.f32 0.1064488, %v844_v55  ;;  %v885_v10 = vmul.f32 0.002785687, %v2837_v48  ;;  %vm825_vm7 = vcmp.eq.s32.totalorder %v2433_v43, inf  ;;  %vm820_vm13 = vmor %vm818_vm1, %vm819_vm5 }
  0xc9   :  { %v781_v13 = vand.u32 2147483647, %v780_v44  ;;  %v810_v40 = vsel %vm808_vm11, %v809_v39, %v807_v22  ;;  %vm816_vm10 = vcmp.eq.f32.partialorder %v2430_v61, 0.0  ;;  %v823_v27 = vsel %vm811_vm4, 2.3561945, %v3291_v50  ;;  %vm826_vm15 = vmand %vm824_vm8, %vm825_vm7 }
  0xca   :  { %v812_v3 = vsub.f32 3.1415927, %v810_v40  ;;  %v846_v56 = vmul.f32 %v845_v58, %v2758_v63  ;;  %v886_v37 = vadd.f32 -0.015866, %v885_v10  ;;  %v829_v6 = vand.u32 2147483648, %v2430_v61 }
  0xcb   :  { %v783_v41 = vor.u32 %v782_v62, %v781_v13  ;;  %vm855_vm14 = vcmp.gt.f32.partialorder %v2597_v26, %v2583_v28  ;;  %vm861_vm6 = vcmp.lt.s32.totalorder %v3357_v0, 0  ;;  %vm858_vm12 = vcmp.lt.f32.partialorder %v3357_v0, 0.0 }
  0xcc   :  { %v813_v36 = vsel %vm811_vm4, %v812_v3, %v810_v40  ;;  %v847_v38 = vadd.f32 -0.14207031, %v846_v56  ;;  %v887_v54 = vmul.f32 %v886_v37, %v2837_v48  ;;  %vm865_vm0 = vcmp.ne.f32.partialorder %v3357_v0, %v3357_v0 }
  0xcd   :  { %v817_v43 = vsel %vm816_vm10, %v815_v17, %v813_v36  ;;  %937 = vst [vmem:[%s3124_s3 + $0x60] sm:$0xff] %v783_v41  ;;  %vm866_vm3 = vcmp.ne.f32.partialorder %v2594_v42, %v2594_v42  ;;  %vm871_vm2 = vcmp.eq.s32.totalorder %v2583_v28, inf  ;;  %vm872_vm9 = vcmp.eq.s32.totalorder %v2597_v26, inf }
  0xce   :  { %v821_v2 = vsel %vm820_vm13, nan, %v817_v43  ;;  %v848_v9 = vmul.f32 %v847_v38, %v2758_v63  ;;  %v888_v11 = vadd.f32 0.04247222, %v887_v54  ;;  %v862_v17 = vsel %vm861_vm6, 3.1415927, %v3289_v51  ;;  %vm867_vm4 = vmor %vm865_vm0, %vm866_vm3 }
  0xcf   :  { %v827_v57 = vsel %vm826_vm15, %v823_v27, %v821_v2  ;;  %vm863_vm11 = vcmp.eq.f32.partialorder %v2594_v42, 0.0  ;;  %v870_v0 = vsel %vm858_vm12, 2.3561945, %v3291_v50  ;;  %vm873_vm1 = vmand %vm871_vm2, %vm872_vm9  ;;  %v876_v28 = vand.u32 2147483648, %v2594_v42 }
  0xd0   :  { %v828_v19 = vand.u32 2147483647, %v827_v57  ;;  %v849_v21 = vadd.f32 0.19993454, %v848_v9  ;;  %v889_v46 = vmul.f32 %v888_v11, %v2837_v48  ;;  %vm902_vm5 = vcmp.gt.f32.partialorder %v2726_v32, %v2707_v4 }
  0xd1   :  { %vm908_vm8 = vcmp.lt.s32.totalorder %v3364_v31, 0  ;;  %vm912_vm7 = vcmp.ne.f32.partialorder %v3364_v31, %v3364_v31  ;;  %vm913_vm10 = vcmp.ne.f32.partialorder %v2723_v23, %v2723_v23  ;;  %vm905_vm13 = vcmp.lt.f32.partialorder %v3364_v31, 0.0 }
  0xd2   :  { %v830_v8 = vor.u32 %v829_v6, %v828_v19  ;;  %v850_v34 = vmul.f32 %v849_v21, %v2758_v63  ;;  %v890_v20 = vadd.f32 -0.074975304, %v889_v46  ;;  %vm918_vm15 = vcmp.eq.s32.totalorder %v2707_v4, inf }
  0xd3   :  { %vm910_vm6 = vcmp.eq.f32.partialorder %v2723_v23, 0.0  ;;  %v917_v54 = vsel %vm905_vm13, 2.3561945, %v3291_v50  ;;  %v923_v6 = vand.u32 2147483648, %v2723_v23 }
  0xd4   :  { %v851_v5 = vadd.f32 -0.33333147, %v850_v34  ;;  %v891_v29 = vmul.f32 %v890_v20, %v2837_v48  ;;  %938 = vst [vmem:[%s3124_s3 + $0x68] sm:$0xff] %v830_v8 }
  0xd6   :  { %v852_v61 = vmul.f32 %v851_v5, %v2758_v63  ;;  %v892_v60 = vadd.f32 0.1064488, %v891_v29 }
  0xd8   :  { %v853_v24 = vmul.f32 %v852_v61, %v2746_v14  ;;  %v893_v62 = vmul.f32 %v892_v60, %v2837_v48 }
  0xda   :  { %v854_v22 = vadd.f32 %v853_v24, %v2746_v14  ;;  %v894_v45 = vadd.f32 -0.14207031, %v893_v62 }
  0xdc   :  { %v856_v55 = vsub.f32 1.5707964, %v854_v22  ;;  %v895_v53 = vmul.f32 %v894_v45, %v2837_v48 }
  0xde   :  { %v857_v63 = vsel %vm855_vm14, %v856_v55, %v854_v22  ;;  %v896_v14 = vadd.f32 0.19993454, %v895_v53  ;;  %vm919_vm14 = vcmp.eq.s32.totalorder %v2726_v32, inf }
  0xdf   :  { %v859_v39 = vsub.f32 3.1415927, %v857_v63  ;;  %vm920_vm0 = vmand %vm918_vm15, %vm919_vm14 }
  0xe0   :  { %v897_v44 = vmul.f32 %v896_v14, %v2837_v48 }
  0xe1   :  { %v860_v58 = vsel %vm858_vm12, %v859_v39, %v857_v63  ;;  %vm914_vm12 = vmor %vm912_vm7, %vm913_vm10 }
  0xe2   :  { %v864_v10 = vsel %vm863_vm11, %v862_v17, %v860_v58  ;;  %v898_v13 = vadd.f32 -0.33333147, %v897_v44 }
  0xe3   :  { %v868_v40 = vsel %vm867_vm4, nan, %v864_v10 }
  0xe4   :  { %v874_v3 = vsel %vm873_vm1, %v870_v0, %v868_v40  ;;  %v899_v26 = vmul.f32 %v898_v13, %v2837_v48  ;;  %v909_v48 = vsel %vm908_vm8, 3.1415927, %v3289_v51 }
  0xe5   :  { %v875_v56 = vand.u32 2147483647, %v874_v3 }
  0xe6   :  { %v900_v37 = vmul.f32 %v899_v26, %v2823_v7 }
  0xe7   :  { %v877_v41 = vor.u32 %v876_v28, %v875_v56 }
  0xe8   :  { %v901_v36 = vadd.f32 %v900_v37, %v2823_v7 }
  0xe9   :  { %939 = vst [vmem:[%s3124_s3 + $0x70] sm:$0xff] %v877_v41 }
  0xea   :  { %v903_v27 = vsub.f32 1.5707964, %v901_v36 }
  0xec   :  { %v904_v42 = vsel %vm902_vm5, %v903_v27, %v901_v36 }
  0xed   :  { %v906_v7 = vsub.f32 3.1415927, %v904_v42 }
  0xef   :  { %v907_v38 = vsel %vm905_vm13, %v906_v7, %v904_v42 }
  0xf0   :  { %v911_v43 = vsel %vm910_vm6, %v909_v48, %v907_v38 }
  0xf1   :  { %v915_v2 = vsel %vm914_vm12, nan, %v911_v43 }
  0xf2   :  { %v921_v9 = vsel %vm920_vm0, %v917_v54, %v915_v2 }
  0xf3   :  { %v922_v31 = vand.u32 2147483647, %v921_v9 }
  0xf5   :  { %v924_v11 = vor.u32 %v923_v6, %v922_v31 }
  0xf7   :  { %940 = vst [vmem:[%s3124_s3 + $0x78] sm:$0xff] %v924_v11 }
 0x148   :  { %v1005_v4 = vpop.xlane.xlu0 %1004 }
 0x149   :  { %v1006_v51 = vrot.slane %v1005_v4, 4 }
 0x14b   :  { %v1007_v32 = vmax.f32 %v1005_v4, %v1006_v51 }
 0x14d   :  { %v1008_v57 = vrot.slane %v1007_v32, 2 }
 0x14f   :  { %v1009_v19 = vmax.f32 %v1007_v32, %v1008_v57 }
 0x151   :  { %v1010_v21 = vrot.slane %v1009_v19, 1 }
 0x153   :  { %v1011_v46 = vmax.f32 %v1009_v19, %v1010_v21 }
 0x155   :  { %1297 = vpush %v1011_v46 }
 0x186   :  { %s1298_s18 = spop %1297 }
 0x187   :  { %p1013_p0 = scmp.gt.f32.partialorder %s1298_s18, 1e+18 }
 0x188   :  { %v3371_v50 = vld [vmem:[#allocation32_spill] sm:$0xff] (%p1013_p0)  ;;  %v3373_v20 = vld [vmem:[#allocation33_spill] sm:$0xff] (%p1013_p0)  ;;  %v3375_v62 = vld [vmem:[#allocation34_spill] sm:$0xff] (%p1013_p0)  ;;  %vm1236_vm15 = vcmp.gt.f32.partialorder (%p1013_p0), %v2336_v59, 1e+18 }
 0x189   :  { %1016 = sbr.rel (!%p1013_p0) target bundleno = 457 (0x1c9), region = 13  ;;  %v1049_v23 = vmul.f32 (%p1013_p0), %v3371_v50, %v1496_v12  ;;  %v1065_v8 = vmul.f32 (%p1013_p0), %v3371_v50, %v1529_v25  ;;  %v3372_v34 = vld [vmem:[#allocation28_spill] sm:$0xff] (%p1013_p0)  ;;  %v1050_v5 = vmul.f32 (%p1013_p0), %v3373_v20, %v1504_v15  ;;  %v1066_v29 = vmul.f32 (%p1013_p0), %v3373_v20, %v1542_v30  ;;  %v3374_v61 = vld [vmem:[#allocation29_spill] sm:$0xff] (%p1013_p0)  ;;  %v3376_v55 = vld [vmem:[#allocation30_spill] sm:$0xff] (%p1013_p0) }
 0x18a   :  { %1374 = vlog2.f32 (%p1013_p0), %v3372_v34  ;;  %v1051_v22 = vmul.f32 (%p1013_p0), %v3375_v62, %v1506_v16  ;;  %v1067_v12 = vmul.f32 (%p1013_p0), %v3375_v62, %v1555_v35  ;;  %v3377_v14 = vld [vmem:[#allocation2_spill] sm:$0xff] (%p1013_p0)  ;;  %v3378_v39 = vld [vmem:[#allocation37_spill] sm:$0xff] (%p1013_p0)  ;;  %v3379_v44 = vld [vmem:[#allocation15_spill] sm:$0xff] (%p1013_p0)  ;;  %vm1225_vm3 = vcmp.gt.f32.partialorder (%p1013_p0), %v3372_v34, 1e+18 }
 0x18b   :  { %1376 = vlog2.f32 (%p1013_p0), %v3374_v61  ;;  %v1113_v60 = vmul.f32 (%p1013_p0), %v1049_v23, %v1049_v23  ;;  %v1129_v24 = vmul.f32 (%p1013_p0), %v1065_v8, %v1065_v8  ;;  %v1114_v45 = vmul.f32 (%p1013_p0), %v1050_v5, %v1050_v5  ;;  %v3380_v0 = vld [vmem:[#allocation31_spill] sm:$0xff] (%p1013_p0)  ;;  %v3382_v13 = vld [vmem:[#allocation41_spill] sm:$0xff] (%p1013_p0)  ;;  %v3383_v3 = vld [vmem:[#allocation16_spill] sm:$0xff] (%p1013_p0) }
 0x18c   :  { %v1130_v25 = vmul.f32 (%p1013_p0), %v1066_v29, %v1066_v29  ;;  %1378 = vlog2.f32 (%p1013_p0), %v3376_v55  ;;  %v1115_v63 = vmul.f32 (%p1013_p0), %v1051_v22, %v1051_v22  ;;  %v1131_v15 = vmul.f32 (%p1013_p0), %v1067_v12, %v1067_v12  ;;  %v3381_v35 = vld [vmem:[#allocation3_spill] sm:$0xff] (%p1013_p0)  ;;  %v3384_v37 = vld [vmem:[#allocation4_spill] sm:$0xff] (%p1013_p0)  ;;  %v3385_v41 = vld [vmem:[#allocation46_spill] sm:$0xff] (%p1013_p0) }
 0x18d   :  { %v1145_v53 = vadd.f32 (%p1013_p0), %v1129_v24, %v1113_v60  ;;  %v1052_v30 = vmul.f32 (%p1013_p0), %v3378_v39, %v3377_v14  ;;  %v1068_v58 = vmul.f32 (%p1013_p0), %v3378_v39, %v3379_v44  ;;  %1380 = vlog2.f32 (%p1013_p0), %v3380_v0  ;;  %v3386_v27 = vld [vmem:[#allocation17_spill] sm:$0xff] (%p1013_p0)  ;;  %v3387_v48 = vld [vmem:[#allocation35_spill] sm:$0xff] (%p1013_p0)  ;;  %v3388_v43 = vld [vmem:[#allocation40_spill] sm:$0xff] (%p1013_p0) }
 0x18e   :  { %v1146_v17 = vadd.f32 (%p1013_p0), %v1130_v25, %v1114_v45  ;;  %v1147_v16 = vadd.f32 (%p1013_p0), %v1131_v15, %v1115_v63  ;;  %v1053_v40 = vmul.f32 (%p1013_p0), %v3382_v13, %v3381_v35  ;;  %v1069_v26 = vmul.f32 (%p1013_p0), %v3382_v13, %v3383_v3  ;;  %v3389_v9 = vld [vmem:[#allocation5_spill] sm:$0xff] (%p1013_p0)  ;;  %v3390_v31 = vld [vmem:[#allocation48_spill] sm:$0xff] (%p1013_p0)  ;;  %v3391_v32 = vld [vmem:[#allocation18_spill] sm:$0xff] (%p1013_p0) }
 0x18f   :  { %1382 = vlog2.f32 (%p1013_p0), %v1145_v53  ;;  %v1116_v10 = vmul.f32 (%p1013_p0), %v1052_v30, %v1052_v30  ;;  %v1132_v28 = vmul.f32 (%p1013_p0), %v1068_v58, %v1068_v58  ;;  %v1054_v36 = vmul.f32 (%p1013_p0), %v3385_v41, %v3384_v37  ;;  %v3392_v21 = vld [vmem:[#allocation45_spill] sm:$0xff] (%p1013_p0)  ;;  %v3393_v8 = vld [vmem:[#allocation6_spill] sm:$0xff] (%p1013_p0)  ;;  %v3394_v20 = vld [vmem:[#allocation51_spill] sm:$0xff] (%p1013_p0) }
 0x190   :  { %1384 = vlog2.f32 %v1146_v17  ;;  %v1117_v56 = vmul.f32 %v1053_v40, %v1053_v40  ;;  %v1070_v42 = vmul.f32 %v3385_v41, %v3386_v27  ;;  %v1133_v38 = vmul.f32 %v1069_v26, %v1069_v26  ;;  %v3395_v29 = vld [vmem:[#allocation19_spill] sm:$0xff]  ;;  %v3397_v25 = vld [vmem:[#allocation38_spill] sm:$0xff]  ;;  %v3399_v30 = vld [vmem:[#allocation20_spill] sm:$0xff] }
 0x191   :  { %1386 = vlog2.f32 %v1147_v16  ;;  %v1148_v7 = vadd.f32 %v1132_v28, %v1116_v10  ;;  %v1118_v2 = vmul.f32 %v1054_v36, %v1054_v36  ;;  %v1055_v11 = vmul.f32 %v3390_v31, %v3389_v9  ;;  %v3396_v45 = vld [vmem:[#allocation7_spill] sm:$0xff]  ;;  %v3398_v14 = vld [vmem:[#allocation50_spill] sm:$0xff]  ;;  %v3400_v3 = vld [vmem:[#allocation8_spill] sm:$0xff] }
 0x192   :  { %1388 = vlog2.f32 %v3387_v48  ;;  %v1134_v6 = vmul.f32 %v1070_v42, %v1070_v42  ;;  %v1149_v51 = vadd.f32 %v1133_v38, %v1117_v56  ;;  %v1071_v57 = vmul.f32 %v3390_v31, %v3391_v32  ;;  %v3401_v26 = vld [vmem:[#allocation49_spill] sm:$0xff]  ;;  %v3402_v27 = vld [vmem:[#allocation47_spill] sm:$0xff]  ;;  %v3404_v32 = vld [vmem:[#allocation36_spill] sm:$0xff] }
 0x193   :  { %1390 = vlog2.f32 %v3388_v43  ;;  %v1119_v46 = vmul.f32 %v1055_v11, %v1055_v11  ;;  %v1056_v5 = vmul.f32 %v3394_v20, %v3393_v8  ;;  %vm1226_vm2 = vcmp.gt.f32.partialorder %v3374_v61, 1e+18  ;;  %v3403_v42 = vld [vmem:[#allocation21_spill] sm:$0xff]  ;;  %v3407_v61 = vld [vmem:[#allocation22_spill] sm:$0xff] }
 0x194   :  { %v1375_v54 = vpop.eup %1374  ;;  %1392 = vlog2.f32 %v1148_v7  ;;  %v1150_v19 = vadd.f32 %v1134_v6, %v1118_v2  ;;  %v1135_v23 = vmul.f32 %v1071_v57, %v1071_v57  ;;  %vm1227_vm9 = vcmp.gt.f32.partialorder %v3376_v55, 1e+18 }
 0x195   :  { %v1377_v4 = vpop.eup %1376  ;;  %1394 = vlog2.f32 %v3392_v21  ;;  %v1072_v60 = vmul.f32 %v3394_v20, %v3395_v29  ;;  %v1082_v62 = vmul.f32 0.6931472, %v1375_v54  ;;  %v1120_v12 = vmul.f32 %v1056_v5, %v1056_v5  ;;  %v1241_v54 = vld [vmem:[%s3123_s2] sm:$0xff] }
 0x196   :  { %v1379_v50 = vpop.eup %1378  ;;  %1396 = vlog2.f32 %v1149_v51  ;;  %v1151_v22 = vadd.f32 %v1135_v23, %v1119_v46  ;;  %v1057_v53 = vmul.f32 %v3397_v25, %v3396_v45  ;;  %v1084_v15 = vmul.f32 0.6931472, %v1377_v4  ;;  %v1242_v4 = vld [vmem:[%s3123_s2 + $0x8] sm:$0xff] }
 0x197   :  { %1398 = vlog2.f32 %v1150_v19  ;;  %v1381_v24 = vpop.eup %1380  ;;  %v1136_v39 = vmul.f32 %v1072_v60, %v1072_v60  ;;  %v1073_v17 = vmul.f32 %v3397_v25, %v3399_v30  ;;  %v1086_v16 = vmul.f32 0.6931472, %v1379_v50  ;;  %v1243_v50 = vld [vmem:[%s3123_s2 + $0x10] sm:$0xff] }
 0x198   :  { %1400 = vlog2.f32 %v3398_v14  ;;  %vm1228_vm11 = vcmp.gt.f32.partialorder %v3380_v0, 1e+18  ;;  %v1121_v10 = vmul.f32 %v1057_v53, %v1057_v53  ;;  %v1058_v56 = vmul.f32 %v3401_v26, %v3400_v3  ;;  %v1244_v53 = vld [vmem:[%s3123_s2 + $0x18] sm:$0xff] }
 0x199   :  { %v1383_v63 = vpop.eup %1382  ;;  %1402 = vlog2.f32 %v1151_v22  ;;  %v1152_v40 = vadd.f32 %v1136_v39, %v1120_v12  ;;  %v1137_v28 = vmul.f32 %v1073_v17, %v1073_v17  ;;  %vm1229_vm4 = vcmp.gt.f32.partialorder %v3387_v48, 1e+18  ;;  %v3406_v39 = vld [vmem:[#allocation42_spill] sm:$0xff] }
 0x19a   :  { %v1385_v44 = vpop.eup %1384  ;;  %v1162_v58 = vmul.f32 0.6931472, %v1383_v63  ;;  %1404 = vlog2.f32 %v3402_v27  ;;  %v1074_v7 = vmul.f32 %v3401_v26, %v3403_v42  ;;  %v1088_v6 = vmul.f32 0.6931472, %v1381_v24  ;;  %v1246_v26 = vld [vmem:[%s3123_s2 + $0x28] sm:$0xff] }
 0x19b   :  { %v1387_v35 = vpop.eup %1386  ;;  %v1164_v13 = vmul.f32 0.6931472, %v1385_v44  ;;  %vm1230_vm1 = vcmp.gt.f32.partialorder %v3388_v43, 1e+18  ;;  %1406 = vlog2.f32 %v1152_v40  ;;  %v1153_v9 = vadd.f32 %v1137_v28, %v1121_v10  ;;  %v1245_v10 = vld [vmem:[%s3123_s2 + $0x20] sm:$0xff] }
 0x19c   :  { %v1389_v37 = vpop.eup %1388  ;;  %v1193_v41 = vmul.f32 0.5, %v1162_v58  ;;  %v1166_v36 = vmul.f32 0.6931472, %v1387_v35  ;;  %1408 = vlog2.f32 %v3404_v32  ;;  %v1122_v57 = vmul.f32 %v1058_v56, %v1058_v56 }
 0x19d   :  { %v1391_v38 = vpop.eup %1390  ;;  %v1194_v2 = vmul.f32 0.5, %v1164_v13  ;;  %1410 = vlog2.f32 %v1153_v9  ;;  %v1138_v8 = vmul.f32 %v1074_v7, %v1074_v7  ;;  %v1090_v60 = vmul.f32 0.6931472, %v1389_v37  ;;  %v3408_v7 = vld [vmem:[#allocation10_spill] sm:$0xff] }
 0x19e   :  { %v1393_v31 = vpop.eup %1392  ;;  %v1209_v11 = vadd.f32 %v1193_v41, %v1082_v62  ;;  %v1195_v51 = vmul.f32 0.5, %v1166_v36  ;;  %v1092_v24 = vmul.f32 0.6931472, %v1391_v38  ;;  %v1075_v17 = vmul.f32 %v3406_v39, %v3407_v61  ;;  %v3409_v38 = vld [vmem:[#allocation43_spill] sm:$0xff]  ;;  %v3415_v61 = vld [vmem:[#allocation12_spill] sm:$0xff] }
 0x19f   :  { %v1395_v19 = vpop.eup %1394  ;;  %v1210_v46 = vadd.f32 %v1194_v2, %v1084_v15  ;;  %v1168_v23 = vmul.f32 0.6931472, %v1393_v31  ;;  %v1154_v25 = vadd.f32 %v1138_v8, %v1122_v57  ;;  %v3405_v15 = vld [vmem:[#allocation9_spill] sm:$0xff]  ;;  %vm1231_vm5 = vcmp.gt.f32.partialorder %v3392_v21, 1e+18  ;;  %v3410_v2 = vld [vmem:[#allocation23_spill] sm:$0xff] }
 0x1a0   :  { %v1397_v20 = vpop.eup %1396  ;;  %v1257_v5 = vsel %vm1225_vm3, %v1209_v11, %v1241_v54  ;;  %v1211_v29 = vadd.f32 %v1195_v51, %v1086_v16  ;;  %v1059_v30 = vmul.f32 %v3406_v39, %v3405_v15  ;;  %v1094_v13 = vmul.f32 0.6931472, %v1395_v19  ;;  %v3411_v11 = vld [vmem:[#allocation39_spill] sm:$0xff]  ;;  %v1247_v19 = vld [vmem:[%s3123_s2 + $0x30] sm:$0xff]  ;;  %v1249_v21 = vld [vmem:[%s3123_s2 + $0x40] sm:$0xff] }
 0x1a1   :  { %v1399_v62 = vpop.eup %1398  ;;  %1273 = vst [vmem:[%s3123_s2] sm:$0xff] %v1257_v5  ;;  %v1258_v22 = vsel %vm1226_vm2, %v1210_v46, %v1242_v4  ;;  %v1196_v12 = vmul.f32 0.5, %v1168_v23  ;;  %v1170_v45 = vmul.f32 0.6931472, %v1397_v20  ;;  %1412 = vlog2.f32 %v1154_v25 }
 0x1a2   :  { %1274 = vst [vmem:[%s3123_s2 + $0x8] sm:$0xff] %v1258_v22  ;;  %v1259_v34 = vsel %vm1227_vm9, %v1211_v29, %v1243_v50  ;;  %v1172_v63 = vmul.f32 0.6931472, %v1399_v62  ;;  %v1401_v44 = vpop.eup %1400  ;;  %vm1232_vm8 = vcmp.gt.f32.partialorder %v3398_v14, 1e+18  ;;  %v1123_v40 = vmul.f32 %v1059_v30, %v1059_v30  ;;  %v3412_v29 = vld [vmem:[#allocation11_spill] sm:$0xff] }
 0x1a3   :  { %1275 = vst [vmem:[%s3123_s2 + $0x10] sm:$0xff] %v1259_v34  ;;  %v1212_v58 = vadd.f32 %v1196_v12, %v1088_v6  ;;  %v1197_v16 = vmul.f32 0.5, %v1170_v45  ;;  %v1403_v55 = vpop.eup %1402  ;;  %v1139_v37 = vmul.f32 %v1075_v17, %v1075_v17  ;;  %v1096_v42 = vmul.f32 0.6931472, %v1401_v44  ;;  %v3414_v62 = vld [vmem:[#allocation24_spill] sm:$0xff]  ;;  %v1248_v45 = vld [vmem:[%s3123_s2 + $0x38] sm:$0xff] }
 0x1a4   :  { %v1198_v35 = vmul.f32 0.5, %v1172_v63  ;;  %v1174_v56 = vmul.f32 0.6931472, %v1403_v55  ;;  %v1405_v41 = vpop.eup %1404  ;;  %v1060_v54 = vmul.f32 %v3409_v38, %v3408_v7  ;;  %v1076_v0 = vmul.f32 %v3409_v38, %v3410_v2  ;;  %v3416_v17 = vld [vmem:[#allocation52_spill] sm:$0xff]  ;;  %v1250_v14 = vld [vmem:[%s3123_s2 + $0x48] sm:$0xff]  ;;  %v3420_v2 = vld [vmem:[#allocation14_spill] sm:$0xff] }
 0x1a5   :  { %v1260_v28 = vsel %vm1228_vm11, %v1212_v58, %v1244_v53  ;;  %v1213_v3 = vadd.f32 %v1197_v16, %v1090_v60  ;;  %v1407_v6 = vpop.eup %1406  ;;  %1414 = vlog2.f32 %v3411_v11  ;;  %v1155_v4 = vadd.f32 %v1139_v37, %v1123_v40  ;;  %v3413_v60 = vld [vmem:[#allocation44_spill] sm:$0xff]  ;;  %v3417_v58 = vld [vmem:[#allocation25_spill] sm:$0xff] }
 0x1a6   :  { %1276 = vst [vmem:[%s3123_s2 + $0x18] sm:$0xff] %v1260_v28  ;;  %v1214_v36 = vadd.f32 %v1198_v35, %v1092_v24  ;;  %v1199_v31 = vmul.f32 0.5, %v1174_v56  ;;  %v1409_v51 = vpop.eup %1408  ;;  %v1176_v46 = vmul.f32 0.6931472, %v1407_v6  ;;  %1416 = vlog2.f32 %v2336_v59  ;;  %v3418_v56 = vld [vmem:[#allocation13_spill] sm:$0xff]  ;;  %v3421_v6 = vld [vmem:[#allocation27_spill] sm:$0xff] }
 0x1a7   :  { %v1261_v9 = vsel %vm1229_vm4, %v1213_v3, %v1245_v10  ;;  %v1124_v48 = vmul.f32 %v1060_v54, %v1060_v54  ;;  %v1411_v50 = vpop.eup %1410  ;;  %v1098_v8 = vmul.f32 0.6931472, %v1405_v41  ;;  %1418 = vlog2.f32 %v1155_v4 }
 0x1a8   :  { %1277 = vst [vmem:[%s3123_s2 + $0x20] sm:$0xff] %v1261_v9  ;;  %v1262_v57 = vsel %vm1230_vm1, %v1214_v36, %v1246_v26  ;;  %v1215_v23 = vadd.f32 %v1199_v31, %v1094_v13  ;;  %v1140_v20 = vmul.f32 %v1076_v0, %v1076_v0  ;;  %v1200_v5 = vmul.f32 0.5, %v1176_v46  ;;  %v3419_v36 = vld [vmem:[#allocation26_spill] sm:$0xff] }
 0x1a9   :  { %1278 = vst [vmem:[%s3123_s2 + $0x28] sm:$0xff] %v1262_v57  ;;  %v1178_v43 = vmul.f32 0.6931472, %v1411_v50  ;;  %v1061_v24 = vmul.f32 %v3413_v60, %v3412_v29  ;;  %v1077_v22 = vmul.f32 %v3413_v60, %v3414_v62  ;;  %vm1233_vm7 = vcmp.gt.f32.partialorder %v3402_v27, 1e+18  ;;  %v1252_v62 = vld [vmem:[%s3123_s2 + $0x58] sm:$0xff] }
 0x1aa   :  { %v1263_v12 = vsel %vm1231_vm5, %v1215_v23, %v1247_v19  ;;  %v1156_v25 = vadd.f32 %v1140_v20, %v1124_v48  ;;  %1420 = vlog2.f32 %v2386_v47  ;;  %v1216_v34 = vadd.f32 %v1200_v5, %v1096_v42  ;;  %v1251_v23 = vld [vmem:[%s3123_s2 + $0x50] sm:$0xff] }
 0x1ab   :  { %1279 = vst [vmem:[%s3123_s2 + $0x30] sm:$0xff] %v1263_v12  ;;  %v1201_v53 = vmul.f32 0.5, %v1178_v43  ;;  %v1125_v63 = vmul.f32 %v1061_v24, %v1061_v24  ;;  %v1141_v15 = vmul.f32 %v1077_v22, %v1077_v22  ;;  %v1413_v39 = vpop.eup %1412  ;;  %v1100_v30 = vmul.f32 0.6931472, %v1409_v51 }
 0x1ac   :  { %1422 = vlog2.f32 %v1156_v25  ;;  %v1062_v44 = vmul.f32 %v3416_v17, %v3415_v61  ;;  %v1078_v16 = vmul.f32 %v3416_v17, %v3417_v58  ;;  %v1264_v55 = vsel %vm1232_vm8, %v1216_v34, %v1248_v45  ;;  %v1254_v58 = vld [vmem:[%s3123_s2 + $0x68] sm:$0xff] }
 0x1ad   :  { %v1217_v10 = vadd.f32 %v1201_v53, %v1098_v8  ;;  %v1180_v35 = vmul.f32 0.6931472, %v1413_v39  ;;  %v1157_v13 = vadd.f32 %v1141_v15, %v1125_v63  ;;  %1280 = vst [vmem:[%s3123_s2 + $0x38] sm:$0xff] %v1264_v55  ;;  %v1063_v37 = vmul.f32 %v2731_v33, %v3418_v56  ;;  %v1253_v53 = vld [vmem:[%s3123_s2 + $0x60] sm:$0xff]  ;;  %v1256_v56 = vld [vmem:[%s3123_s2 + $0x78] sm:$0xff] }
 0x1ae   :  { %v1126_v40 = vmul.f32 %v1062_v44, %v1062_v44  ;;  %v1142_v28 = vmul.f32 %v1078_v16, %v1078_v16  ;;  %vm1234_vm10 = vcmp.gt.f32.partialorder %v3404_v32, 1e+18  ;;  %v1079_v42 = vmul.f32 %v2731_v33, %v3419_v36 }
 0x1af   :  { %v1265_v3 = vsel %vm1233_vm7, %v1217_v10, %v1249_v21  ;;  %v1202_v26 = vmul.f32 0.5, %v1180_v35  ;;  %1424 = vlog2.f32 %v1157_v13  ;;  %v1415_v41 = vpop.eup %1414  ;;  %v1127_v54 = vmul.f32 %v1063_v37, %v1063_v37 }
 0x1b0   :  { %1281 = vst [vmem:[%s3123_s2 + $0x40] sm:$0xff] %v1265_v3  ;;  %1426 = vlog2.f32 %v2450_v18  ;;  %v1158_v27 = vadd.f32 %v1142_v28, %v1126_v40  ;;  %v1417_v7 = vpop.eup %1416  ;;  %v1064_v0 = vmul.f32 %v2811_v49, %v3420_v2  ;;  %v1080_v9 = vmul.f32 %v2811_v49, %v3421_v6 }
 0x1b1   :  { %v1218_v38 = vadd.f32 %v1202_v26, %v1100_v30  ;;  %v1419_v32 = vpop.eup %1418  ;;  %v1143_v31 = vmul.f32 %v1079_v42, %v1079_v42  ;;  %v1102_v51 = vmul.f32 0.6931472, %v1415_v41  ;;  %vm1235_vm13 = vcmp.gt.f32.partialorder %v3411_v11, 1e+18 }
 0x1b2   :  { %1428 = vlog2.f32 %v1158_v27  ;;  %v1182_v57 = vmul.f32 0.6931472, %v1419_v32  ;;  %v1128_v19 = vmul.f32 %v1064_v0, %v1064_v0  ;;  %v1144_v48 = vmul.f32 %v1080_v9, %v1080_v9 }
 0x1b3   :  { %v1266_v4 = vsel %vm1234_vm10, %v1218_v38, %v1250_v14  ;;  %1430 = vlog2.f32 %v2634_v52  ;;  %v1159_v33 = vadd.f32 %v1143_v31, %v1127_v54  ;;  %v1104_v5 = vmul.f32 0.6931472, %v1417_v7 }
 0x1b4   :  { %v1421_v46 = vpop.eup %1420  ;;  %1282 = vst [vmem:[%s3123_s2 + $0x48] sm:$0xff] %v1266_v4  ;;  %v1203_v50 = vmul.f32 0.5, %v1182_v57  ;;  %1432 = vlog2.f32 %v2754_v1  ;;  %v1160_v8 = vadd.f32 %v1144_v48, %v1128_v19  ;;  %vm1237_vm14 = vcmp.gt.f32.partialorder %v2386_v47, 1e+18 }
 0x1b5   :  { %1434 = vlog2.f32 %v1159_v33  ;;  %v1106_v11 = vmul.f32 0.6931472, %v1421_v46  ;;  %vm1238_vm6 = vcmp.gt.f32.partialorder %v2450_v18, 1e+18  ;;  %vm1239_vm12 = vcmp.gt.f32.partialorder %v2634_v52, 1e+18 }
 0x1b6   :  { %v1423_v49 = vpop.eup %1422  ;;  %v1219_v20 = vadd.f32 %v1203_v50, %v1102_v51  ;;  %1436 = vlog2.f32 %v1160_v8  ;;  %v1255_v18 = vld [vmem:[%s3123_s2 + $0x70] sm:$0xff]  ;;  %vm1240_vm0 = vcmp.gt.f32.partialorder %v2754_v1, 1e+18 }
 0x1b7   :  { %v1184_v43 = vmul.f32 0.6931472, %v1423_v49 }
 0x1b8   :  { %v1267_v60 = vsel %vm1235_vm13, %v1219_v20, %v1251_v23 }
 0x1b9   :  { %v1425_v29 = vpop.eup %1424  ;;  %v1204_v24 = vmul.f32 0.5, %v1184_v43  ;;  %1283 = vst [vmem:[%s3123_s2 + $0x50] sm:$0xff] %v1267_v60 }
 0x1ba   :  { %v1427_v22 = vpop.eup %1426  ;;  %v1186_v12 = vmul.f32 0.6931472, %v1425_v29 }
 0x1bb   :  { %v1220_v45 = vadd.f32 %v1204_v24, %v1104_v5  ;;  %v1108_v15 = vmul.f32 0.6931472, %v1427_v22 }
 0x1bc   :  { %v1429_v25 = vpop.eup %1428  ;;  %v1205_v34 = vmul.f32 0.5, %v1186_v12 }
 0x1bd   :  { %v1268_v63 = vsel %vm1236_vm15, %v1220_v45, %v1252_v62  ;;  %v1188_v39 = vmul.f32 0.6931472, %v1429_v25  ;;  %v1431_v21 = vpop.eup %1430 }
 0x1be   :  { %1284 = vst [vmem:[%s3123_s2 + $0x58] sm:$0xff] %v1268_v63  ;;  %v1221_v59 = vadd.f32 %v1205_v34, %v1106_v11  ;;  %v1433_v30 = vpop.eup %1432  ;;  %v1110_v16 = vmul.f32 0.6931472, %v1431_v21 }
 0x1bf   :  { %v1206_v61 = vmul.f32 0.5, %v1188_v39  ;;  %v1435_v17 = vpop.eup %1434  ;;  %v1112_v40 = vmul.f32 0.6931472, %v1433_v30 }
 0x1c0   :  { %v1269_v44 = vsel %vm1237_vm14, %v1221_v59, %v1253_v53  ;;  %v1190_v55 = vmul.f32 0.6931472, %v1435_v17  ;;  %v1437_v10 = vpop.eup %1436 }
 0x1c1   :  { %1285 = vst [vmem:[%s3123_s2 + $0x60] sm:$0xff] %v1269_v44  ;;  %v1222_v47 = vadd.f32 %v1206_v61, %v1108_v15  ;;  %v1192_v28 = vmul.f32 0.6931472, %v1437_v10 }
 0x1c2   :  { %v1207_v13 = vmul.f32 0.5, %v1190_v55 }
 0x1c3   :  { %v1270_v35 = vsel %vm1238_vm6, %v1222_v47, %v1254_v58  ;;  %v1208_v26 = vmul.f32 0.5, %v1192_v28 }
 0x1c4   :  { %1286 = vst [vmem:[%s3123_s2 + $0x68] sm:$0xff] %v1270_v35  ;;  %v1223_v3 = vadd.f32 %v1207_v13, %v1110_v16 }
 0x1c5   :  { %v1224_v41 = vadd.f32 %v1208_v26, %v1112_v40 }
 0x1c6   :  { %v1271_v37 = vsel %vm1239_vm12, %v1223_v3, %v1255_v18 }
 0x1c7   :  { %1287 = vst [vmem:[%s3123_s2 + $0x70] sm:$0xff] %v1271_v37  ;;  %v1272_v14 = vsel %vm1240_vm0, %v1224_v41, %v1256_v56 }
 0x1c8   :  { %1288 = vst [vmem:[%s3123_s2 + $0x78] sm:$0xff] %v1272_v14 }
 0x1c9 PF:  {}

</bundles_post_ra>
